<compile_context>
chip_gen: v7x
topology: tpu7x:2x2x1
jax: 0.10.0
libtpu: 0.0.40
codegen_flags: <defaults>
</compile_context>

<pallas_src>
import functools

import jax
import jax.numpy as jnp
from jax.experimental import pallas as pl
from jax.experimental.pallas import tpu as pltpu


# ------------------------------ fused kernel -------------------------------- #

def _fused_reward_kernel(arch_ref,                  # SMEM (n_blocks,) int32
                         xi_hbm,                    # ANY  (M, K8)  stem input
                         w_stem_ref, b_stem_ref,    # VMEM (K8, CH), (1, CH)
                         w_ch_hbm, b_ch_hbm,        # ANY  (nb*nc, CH, CH), (nb*nc, 1, CH)
                         w_cls_ref, b_cls_ref,      # VMEM (CH, NCP), (1, NCP)
                         tgt_ref,                   # VMEM (B, 1) int32
                         pre_acc_ref,               # SMEM (1,) f32
                         out_ref,                   # VMEM (1, 1) reward
                         h_ref,                     # VMEM scratch (M, CH) activations
                         wbuf, bbuf, sem,           # double-buffered weight DMA
                         *, batch, hw, n_classes, n_blocks, n_choices):

    def fetch(b, slot):
        # arch-selected candidate op for block b (flat index into nb*nc table)
        idx = b * n_choices + arch_ref[b]
        pltpu.make_async_copy(w_ch_hbm.at[idx], wbuf.at[slot], sem.at[0, slot]).start()
        pltpu.make_async_copy(b_ch_hbm.at[idx], bbuf.at[slot], sem.at[1, slot]).start()

    # Prefetch block 0's selected weights; overlaps with the stem copy + matmul.
    fetch(0, 0)

    # ---- stem: im2col'ed 3x3 conv as one MXU matmul + ReLU.  xi stays in HBM
    #      and is copied into a scoped VMEM buffer that is retired afterwards.
    def _stem(xi_vmem):
        pltpu.sync_copy(xi_hbm, xi_vmem)
        y = jnp.dot(xi_vmem[...], w_stem_ref[...],
                    preferred_element_type=jnp.float32)
        h_ref[...] = jnp.maximum(y + b_stem_ref[...], 0.0)

    pl.run_scoped(_stem, pltpu.VMEM(xi_hbm.shape, jnp.float32))

    # ---- arch-selected pointwise choice blocks (static loop, double-buffered DMA)
    for b in range(n_blocks):
        slot = b & 1
        pltpu.make_async_copy(w_ch_hbm.at[0], wbuf.at[slot], sem.at[0, slot]).wait()
        pltpu.make_async_copy(b_ch_hbm.at[0], bbuf.at[slot], sem.at[1, slot]).wait()
        if b + 1 < n_blocks:
            fetch(b + 1, 1 - slot)
        y = jnp.dot(h_ref[...], wbuf[slot], preferred_element_type=jnp.float32)
        h_ref[...] = jnp.maximum(y + bbuf[slot], 0.0)

    # ---- epilogue: pool -> classifier -> top-1 -> reward ----
    ch = h_ref.shape[1]
    ncp = w_cls_ref.shape[1]

    # Global average pool: tile-aligned reshape (HW is a multiple of 8) and a
    # sublane-axis sum on the XLU.
    pooled = jnp.sum(h_ref[...].reshape(batch, hw, ch), axis=1) * (1.0 / hw)

    logits = jnp.dot(pooled, w_cls_ref[...],
                     preferred_element_type=jnp.float32) + b_cls_ref[...]

    # Mask padded class columns, then first-index argmax (torch tie-break).
    cls_idx = jax.lax.broadcasted_iota(jnp.int32, (batch, ncp), 1)
    logits = jnp.where(cls_idx < n_classes, logits, -jnp.inf)
    row_max = jnp.max(logits, axis=-1, keepdims=True)
    argmax = jnp.min(jnp.where(logits == row_max, cls_idx, ncp),
                     axis=-1, keepdims=True)                      # (B, 1)

    correct = (argmax == tgt_ref[...]).astype(jnp.float32)        # (B, 1)
    top1 = jnp.sum(correct) * (1.0 / batch)
    out_ref[...] = jnp.reshape(top1 - pre_acc_ref[0], (1, 1))


# ----------------------------------- glue ----------------------------------- #

def _round_up(n, m):
    return ((n + m - 1) // m) * m


def im2col_3x3(x_nhwc):
    """Extract 3x3 patches (stride 1, pad 1) -> (B*H*W, 9*C). Pure layout glue."""
    # TODO(synk): at real SPOSMobileNet scale, replace this XLA-side im2col with
    # an in-kernel halo-read / shifted-accumulate stem to avoid the 9x HBM blowup.
    B, H, W, C = x_nhwc.shape
    xp = jnp.pad(x_nhwc, ((0, 0), (1, 1), (1, 1), (0, 0)))
    patches = []
    for dh in range(3):
        for dw in range(3):
            patches.append(xp[:, dh:dh + H, dw:dw + W, :])
    p = jnp.concatenate(patches, axis=-1)          # (B, H, W, 9*C)
    return p.reshape(B * H * W, 9 * C)


def init_params(key, c_in=4, c_hidden=32, n_blocks=3, n_choices=3,
                n_classes=16, lane=128):
    """Synthetic SPOS-style supernet weights, zero-padded to lane-dense shapes.

    The stem contraction dim K is padded only to a multiple of 8 (not 128);
    channel / class dims are padded to 128 lanes.  All padded rows/columns are
    exactly zero, so the padded computation matches the unpadded model.
    """
    ks = jax.random.split(key, 3)
    scale = 0.1
    k_stem = 9 * c_in
    kp = _round_up(k_stem, 8)
    chp = _round_up(c_hidden, lane)
    ncp = _round_up(n_classes, lane)

    w_stem = scale * jax.random.normal(ks[0], (k_stem, c_hidden), jnp.float32)
    w_choices = scale * jax.random.normal(
        ks[1], (n_blocks, n_choices, c_hidden, c_hidden), jnp.float32)
    w_cls = scale * jax.random.normal(ks[2], (c_hidden, n_classes), jnp.float32)

    return {
        "w_stem": jnp.pad(w_stem, ((0, kp - k_stem), (0, chp - c_hidden))),
        "b_stem": jnp.zeros((1, chp), jnp.float32),
        "w_choices": jnp.pad(
            w_choices,
            ((0, 0), (0, 0), (0, chp - c_hidden), (0, chp - c_hidden))),
        "b_choices": jnp.zeros((n_blocks, n_choices, 1, chp), jnp.float32),
        "w_cls": jnp.pad(w_cls, ((0, chp - c_hidden), (0, ncp - n_classes))),
        "b_cls": jnp.zeros((1, ncp), jnp.float32),
        "n_classes": n_classes,   # real (unpadded) class count, Python int
    }


def reward_fn_spos_forward(params, sample_arch, images_nchw, targets,
                           pre_arch_acc=0.0):
    """Equivalent of RewardFnSPOS.forward: reward = top1(sampled arch) - pre_arch_acc.

    sample_arch: int32 (n_blocks,) selecting one candidate op per block
                 (synthetic stand-in for str2arch(sample_arch[0])).
    images_nchw: (B, C, H, W) float images (PyTorch layout at the boundary).
    targets:     (B,) int32 labels.
    """
    # NCHW -> NHWC at the boundary (layout glue).
    x = jnp.transpose(images_nchw, (0, 2, 3, 1)).astype(jnp.float32)
    B, H, W, _ = x.shape
    HW = H * W
    M = B * HW

    # Stem im2col, padded only to a multiple-of-8 K (no 128-lane blowup).
    xi = im2col_3x3(x)                                        # (M, 9*Cin)
    K8 = params["w_stem"].shape[0]
    xi = jnp.pad(xi, ((0, 0), (0, K8 - xi.shape[1])))         # (M, K8)

    CH = params["w_stem"].shape[1]
    NCP = params["w_cls"].shape[1]
    n_blocks, n_choices = params["w_choices"].shape[:2]

    # Flatten (block, choice) so the in-kernel DMA indexes a single leading dim.
    w_ch_flat = params["w_choices"].reshape(n_blocks * n_choices, CH, CH)
    b_ch_flat = params["b_choices"].reshape(n_blocks * n_choices, 1, CH)

    kernel = functools.partial(
        _fused_reward_kernel, batch=B, hw=HW, n_classes=params["n_classes"],
        n_blocks=n_blocks, n_choices=n_choices)

    # Explicit scoped-VMEM budget from the actual resident set (+ headroom).
    resident_bytes = 4 * (
        M * CH                      # activation scratch
        + M * K8                    # scoped xi buffer (stem only)
        + 2 * CH * CH + 2 * CH      # double-buffered block weight/bias
        + K8 * CH + CH              # stem weight/bias
        + CH * NCP + NCP            # classifier weight/bias
        + B + 1                     # targets + output
    )
    vmem_limit = max(4 * resident_bytes, 16 * 1024 * 1024)

    reward = pl.pallas_call(
        kernel,
        out_shape=jax.ShapeDtypeStruct((1, 1), jnp.float32),
        in_specs=[
            pl.BlockSpec(memory_space=pltpu.MemorySpace.SMEM),   # sample_arch
            pl.BlockSpec(memory_space=pl.ANY),                   # xi (HBM, scoped DMA)
            pl.BlockSpec(memory_space=pltpu.MemorySpace.VMEM),   # w_stem
            pl.BlockSpec(memory_space=pltpu.MemorySpace.VMEM),   # b_stem
            pl.BlockSpec(memory_space=pl.ANY),                   # w_choices (HBM)
            pl.BlockSpec(memory_space=pl.ANY),                   # b_choices (HBM)
            pl.BlockSpec(memory_space=pltpu.MemorySpace.VMEM),   # w_cls
            pl.BlockSpec(memory_space=pltpu.MemorySpace.VMEM),   # b_cls
            pl.BlockSpec(memory_space=pltpu.MemorySpace.VMEM),   # targets (B,1)
            pl.BlockSpec(memory_space=pltpu.MemorySpace.SMEM),   # pre_arch_acc
        ],
        out_specs=pl.BlockSpec(memory_space=pltpu.MemorySpace.VMEM),
        scratch_shapes=[
            pltpu.VMEM((M, CH), jnp.float32),        # activations
            pltpu.VMEM((2, CH, CH), jnp.float32),    # block weight double buffer
            pltpu.VMEM((2, 1, CH), jnp.float32),     # block bias double buffer
            pltpu.SemaphoreType.DMA((2, 2)),
        ],
        compiler_params=pltpu.CompilerParams(vmem_limit_bytes=vmem_limit),
    )(
        sample_arch.astype(jnp.int32),
        xi,
        params["w_stem"], params["b_stem"],
        w_ch_flat, b_ch_flat,
        params["w_cls"], params["b_cls"],
        targets.astype(jnp.int32).reshape(B, 1),
        jnp.asarray(pre_arch_acc, jnp.float32).reshape(1),
    )
    return reward[0, 0]

# TODO(synk): checkpoint loading, CUDA device plumbing, val_loader iteration,
# str2arch parsing, top-5 metric/logging and FLOPs/param counting from the
# original module have no Pallas equivalent (synthetic deterministic supernet,
# single batch) and are intentionally omitted.


if __name__ == "__main__":
    key = jax.random.PRNGKey(0)
    k_params, k_img, k_tgt = jax.random.split(key, 3)

    B, Cin, H, W = 2, 4, 16, 16
    n_classes = 16
    params = init_params(k_params, c_in=Cin, c_hidden=32,
                         n_blocks=3, n_choices=3, n_classes=n_classes)

    images = jax.random.normal(k_img, (B, Cin, H, W), jnp.float32)   # NCHW input
    targets = jax.random.randint(k_tgt, (B,), 0, n_classes, jnp.int32)
    sample_arch = jnp.array([0, 2, 1], jnp.int32)   # per-block op choice
    pre_arch_acc = jnp.float32(0.25)

    fwd = jax.jit(functools.partial(reward_fn_spos_forward, params))
    reward = fwd(sample_arch, images, targets, pre_arch_acc)
    jax.block_until_ready(reward)
    print("KERNEL_OK")
</pallas_src>

<mosaic_0001>
module attributes {stable_mosaic.version = 11 : i64} {
  func.func @_fused_reward_kernel(%arg0: memref<3xi32, #tpu.memory_space<smem>>, %arg1: memref<512x40xf32, #tpu.memory_space<any>>, %arg2: memref<40x128xf32, #tpu.memory_space<vmem>>, %arg3: memref<1x128xf32, #tpu.memory_space<vmem>>, %arg4: memref<9x128x128xf32, #tpu.memory_space<any>>, %arg5: memref<9x1x128xf32, #tpu.memory_space<any>>, %arg6: memref<128x128xf32, #tpu.memory_space<vmem>>, %arg7: memref<1x128xf32, #tpu.memory_space<vmem>>, %arg8: memref<2x1xi32, #tpu.memory_space<vmem>>, %arg9: memref<1xf32, #tpu.memory_space<smem>>, %arg10: memref<1x1xf32, #tpu.memory_space<vmem>>, %arg11: memref<512x128xf32, #tpu.memory_space<vmem>>, %arg12: memref<2x128x128xf32, #tpu.memory_space<vmem>>, %arg13: memref<2x1x128xf32, #tpu.memory_space<vmem>>, %arg14: memref<2x2x!tpu.dma_semaphore, #tpu.memory_space<semaphore_mem>>) attributes {dimension_semantics = [], scalar_prefetch = 0 : i64, scratch_operands = 4 : i64, tpu.core_type = #tpu.core_type<tc>} {
    %c0 = arith.constant 0 : index
    %0 = memref.load %arg0[%c0] : memref<3xi32, #tpu.memory_space<smem>>
    %c0_i32 = arith.constant 0 : i32
    %1 = arith.addi %c0_i32, %0 : i32
    %c0_i32_0 = arith.constant 0 : i32
    %c0_i32_1 = arith.constant 0 : i32
    %c0_i32_2 = arith.constant 0 : i32
    %c0_i32_3 = arith.constant 0 : i32
    %c0_i32_4 = arith.constant 0 : i32
    %2 = tpu.memref_slice %arg4[%1, %c0_i32_3, %c0_i32_4] : memref<9x128x128xf32, #tpu.memory_space<any>> -> memref<1x128x128xf32, #tpu.memory_space<any>>
    %3 = tpu.memref_squeeze %2 : memref<1x128x128xf32, #tpu.memory_space<any>> -> memref<128x128xf32, #tpu.memory_space<any>>
    %c0_i32_5 = arith.constant 0 : i32
    %c0_i32_6 = arith.constant 0 : i32
    %4 = tpu.memref_slice %arg12[%c0_i32_0, %c0_i32_5, %c0_i32_6] : memref<2x128x128xf32, #tpu.memory_space<vmem>> -> memref<1x128x128xf32, #tpu.memory_space<vmem>>
    %5 = tpu.memref_squeeze %4 : memref<1x128x128xf32, #tpu.memory_space<vmem>> -> memref<128x128xf32, #tpu.memory_space<vmem>>
    %6 = tpu.memref_slice %arg14[%c0_i32_1, %c0_i32_2] : memref<2x2x!tpu.dma_semaphore, #tpu.memory_space<semaphore_mem>> -> memref<1x1x!tpu.dma_semaphore, #tpu.memory_space<semaphore_mem>>
    %7 = tpu.memref_squeeze %6 : memref<1x1x!tpu.dma_semaphore, #tpu.memory_space<semaphore_mem>> -> memref<!tpu.dma_semaphore, #tpu.memory_space<semaphore_mem>>
    tpu.enqueue_dma source(%3 : memref<128x128xf32, #tpu.memory_space<any>>) target(%5 : memref<128x128xf32, #tpu.memory_space<vmem>>) target_semaphore(%7 : memref<!tpu.dma_semaphore, #tpu.memory_space<semaphore_mem>>)
    %c0_i32_7 = arith.constant 0 : i32
    %c1_i32 = arith.constant 1 : i32
    %c0_i32_8 = arith.constant 0 : i32
    %c0_i32_9 = arith.constant 0 : i32
    %c0_i32_10 = arith.constant 0 : i32
    %8 = tpu.memref_slice %arg5[%1, %c0_i32_9, %c0_i32_10] : memref<9x1x128xf32, #tpu.memory_space<any>> -> memref<1x1x128xf32, #tpu.memory_space<any>>
    %9 = tpu.memref_squeeze %8 : memref<1x1x128xf32, #tpu.memory_space<any>> -> memref<1x128xf32, #tpu.memory_space<any>>
    %c0_i32_11 = arith.constant 0 : i32
    %c0_i32_12 = arith.constant 0 : i32
    %10 = tpu.memref_slice %arg13[%c0_i32_7, %c0_i32_11, %c0_i32_12] : memref<2x1x128xf32, #tpu.memory_space<vmem>> -> memref<1x1x128xf32, #tpu.memory_space<vmem>>
    %11 = tpu.memref_squeeze %10 : memref<1x1x128xf32, #tpu.memory_space<vmem>> -> memref<1x128xf32, #tpu.memory_space<vmem>>
    %12 = tpu.memref_slice %arg14[%c1_i32, %c0_i32_8] : memref<2x2x!tpu.dma_semaphore, #tpu.memory_space<semaphore_mem>> -> memref<1x1x!tpu.dma_semaphore, #tpu.memory_space<semaphore_mem>>
    %13 = tpu.memref_squeeze %12 : memref<1x1x!tpu.dma_semaphore, #tpu.memory_space<semaphore_mem>> -> memref<!tpu.dma_semaphore, #tpu.memory_space<semaphore_mem>>
    tpu.enqueue_dma source(%9 : memref<1x128xf32, #tpu.memory_space<any>>) target(%11 : memref<1x128xf32, #tpu.memory_space<vmem>>) target_semaphore(%13 : memref<!tpu.dma_semaphore, #tpu.memory_space<semaphore_mem>>)
    "tpu.region"() ({
      %alloca = memref.alloca() : memref<512x40xf32, #tpu.memory_space<vmem>>
      "tpu.region"() ({
        %156 = tpu.sem_alloc : memref<!tpu.dma_semaphore, #tpu.memory_space<semaphore_mem>>
        tpu.enqueue_dma source(%arg1 : memref<512x40xf32, #tpu.memory_space<any>>) target(%alloca : memref<512x40xf32, #tpu.memory_space<vmem>>) target_semaphore(%156 : memref<!tpu.dma_semaphore, #tpu.memory_space<semaphore_mem>>)
        tpu.wait_dma2 semaphore(%156 : memref<!tpu.dma_semaphore, #tpu.memory_space<semaphore_mem>>) src(%arg1 : memref<512x40xf32, #tpu.memory_space<any>>) dst(%alloca : memref<512x40xf32, #tpu.memory_space<vmem>>)
        tpu.yield
      }) : () -> ()
      %c0_143 = arith.constant 0 : index
      %c0_144 = arith.constant 0 : index
      %147 = vector.load %alloca[%c0_143, %c0_144] : memref<512x40xf32, #tpu.memory_space<vmem>>, vector<512x40xf32>
      %c0_145 = arith.constant 0 : index
      %c0_146 = arith.constant 0 : index
      %148 = vector.load %arg2[%c0_145, %c0_146] : memref<40x128xf32, #tpu.memory_space<vmem>>, vector<40x128xf32>
      %cst_147 = arith.constant dense<0.000000e+00> : vector<512x128xf32>
      %149 = tpu.matmul %147, %148, %cst_147 {dimension_numbers = #tpu.dot_dimension_numbers<[1], [0], [0], [1], [0, 0, 1, 1], [], []>} : vector<512x40xf32>, vector<40x128xf32>, vector<512x128xf32> -> vector<512x128xf32>
      %c0_148 = arith.constant 0 : index
      %c0_149 = arith.constant 0 : index
      %150 = vector.load %arg3[%c0_148, %c0_149] : memref<1x128xf32, #tpu.memory_space<vmem>>, vector<1x128xf32>
      %151 = vector.broadcast %150 : vector<1x128xf32> to vector<512x128xf32>
      %152 = arith.addf %149, %151 : vector<512x128xf32>
      %cst_150 = arith.constant 0.000000e+00 : f32
      %153 = vector.broadcast %cst_150 : f32 to vector<512x128xf32>
      %154 = arith.maximumf %152, %153 : vector<512x128xf32>
      %c0_151 = arith.constant 0 : index
      %c0_152 = arith.constant 0 : index
      %155 = vector.load %arg11[%c0_151, %c0_152] : memref<512x128xf32, #tpu.memory_space<vmem>>, vector<512x128xf32>
      tpu.vector_store %arg11[%c0_151, %c0_152], %154 {strides = array<i32>} : memref<512x128xf32, #tpu.memory_space<vmem>>, vector<512x128xf32>,
      tpu.yield
    }) : () -> ()
    %c0_i32_13 = arith.constant 0 : i32
    %c0_i32_14 = arith.constant 0 : i32
    %c0_i32_15 = arith.constant 0 : i32
    %c0_i32_16 = arith.constant 0 : i32
    %c0_i32_17 = arith.constant 0 : i32
    %c0_i32_18 = arith.constant 0 : i32
    %14 = tpu.memref_slice %arg4[%c0_i32_13, %c0_i32_17, %c0_i32_18] : memref<9x128x128xf32, #tpu.memory_space<any>> -> memref<1x128x128xf32, #tpu.memory_space<any>>
    %15 = tpu.memref_squeeze %14 : memref<1x128x128xf32, #tpu.memory_space<any>> -> memref<128x128xf32, #tpu.memory_space<any>>
    %c0_i32_19 = arith.constant 0 : i32
    %c0_i32_20 = arith.constant 0 : i32
    %16 = tpu.memref_slice %arg12[%c0_i32_14, %c0_i32_19, %c0_i32_20] : memref<2x128x128xf32, #tpu.memory_space<vmem>> -> memref<1x128x128xf32, #tpu.memory_space<vmem>>
    %17 = tpu.memref_squeeze %16 : memref<1x128x128xf32, #tpu.memory_space<vmem>> -> memref<128x128xf32, #tpu.memory_space<vmem>>
    %18 = tpu.memref_slice %arg14[%c0_i32_15, %c0_i32_16] : memref<2x2x!tpu.dma_semaphore, #tpu.memory_space<semaphore_mem>> -> memref<1x1x!tpu.dma_semaphore, #tpu.memory_space<semaphore_mem>>
    %19 = tpu.memref_squeeze %18 : memref<1x1x!tpu.dma_semaphore, #tpu.memory_space<semaphore_mem>> -> memref<!tpu.dma_semaphore, #tpu.memory_space<semaphore_mem>>
    tpu.wait_dma2 semaphore(%19 : memref<!tpu.dma_semaphore, #tpu.memory_space<semaphore_mem>>) src(%15 : memref<128x128xf32, #tpu.memory_space<any>>) dst(%17 : memref<128x128xf32, #tpu.memory_space<vmem>>)
    %c0_i32_21 = arith.constant 0 : i32
    %c0_i32_22 = arith.constant 0 : i32
    %c1_i32_23 = arith.constant 1 : i32
    %c0_i32_24 = arith.constant 0 : i32
    %c0_i32_25 = arith.constant 0 : i32
    %c0_i32_26 = arith.constant 0 : i32
    %20 = tpu.memref_slice %arg5[%c0_i32_21, %c0_i32_25, %c0_i32_26] : memref<9x1x128xf32, #tpu.memory_space<any>> -> memref<1x1x128xf32, #tpu.memory_space<any>>
    %21 = tpu.memref_squeeze %20 : memref<1x1x128xf32, #tpu.memory_space<any>> -> memref<1x128xf32, #tpu.memory_space<any>>
    %c0_i32_27 = arith.constant 0 : i32
    %c0_i32_28 = arith.constant 0 : i32
    %22 = tpu.memref_slice %arg13[%c0_i32_22, %c0_i32_27, %c0_i32_28] : memref<2x1x128xf32, #tpu.memory_space<vmem>> -> memref<1x1x128xf32, #tpu.memory_space<vmem>>
    %23 = tpu.memref_squeeze %22 : memref<1x1x128xf32, #tpu.memory_space<vmem>> -> memref<1x128xf32, #tpu.memory_space<vmem>>
    %24 = tpu.memref_slice %arg14[%c1_i32_23, %c0_i32_24] : memref<2x2x!tpu.dma_semaphore, #tpu.memory_space<semaphore_mem>> -> memref<1x1x!tpu.dma_semaphore, #tpu.memory_space<semaphore_mem>>
    %25 = tpu.memref_squeeze %24 : memref<1x1x!tpu.dma_semaphore, #tpu.memory_space<semaphore_mem>> -> memref<!tpu.dma_semaphore, #tpu.memory_space<semaphore_mem>>
    tpu.wait_dma2 semaphore(%25 : memref<!tpu.dma_semaphore, #tpu.memory_space<semaphore_mem>>) src(%21 : memref<1x128xf32, #tpu.memory_space<any>>) dst(%23 : memref<1x128xf32, #tpu.memory_space<vmem>>)
    %c1 = arith.constant 1 : index
    %26 = memref.load %arg0[%c1] : memref<3xi32, #tpu.memory_space<smem>>
    %c3_i32 = arith.constant 3 : i32
    %27 = arith.addi %c3_i32, %26 : i32
    %c1_i32_29 = arith.constant 1 : i32
    %c0_i32_30 = arith.constant 0 : i32
    %c1_i32_31 = arith.constant 1 : i32
    %c0_i32_32 = arith.constant 0 : i32
    %c0_i32_33 = arith.constant 0 : i32
    %28 = tpu.memref_slice %arg4[%27, %c0_i32_32, %c0_i32_33] : memref<9x128x128xf32, #tpu.memory_space<any>> -> memref<1x128x128xf32, #tpu.memory_space<any>>
    %29 = tpu.memref_squeeze %28 : memref<1x128x128xf32, #tpu.memory_space<any>> -> memref<128x128xf32, #tpu.memory_space<any>>
    %c0_i32_34 = arith.constant 0 : i32
    %c0_i32_35 = arith.constant 0 : i32
    %30 = tpu.memref_slice %arg12[%c1_i32_29, %c0_i32_34, %c0_i32_35] : memref<2x128x128xf32, #tpu.memory_space<vmem>> -> memref<1x128x128xf32, #tpu.memory_space<vmem>>
    %31 = tpu.memref_squeeze %30 : memref<1x128x128xf32, #tpu.memory_space<vmem>> -> memref<128x128xf32, #tpu.memory_space<vmem>>
    %32 = tpu.memref_slice %arg14[%c0_i32_30, %c1_i32_31] : memref<2x2x!tpu.dma_semaphore, #tpu.memory_space<semaphore_mem>> -> memref<1x1x!tpu.dma_semaphore, #tpu.memory_space<semaphore_mem>>
    %33 = tpu.memref_squeeze %32 : memref<1x1x!tpu.dma_semaphore, #tpu.memory_space<semaphore_mem>> -> memref<!tpu.dma_semaphore, #tpu.memory_space<semaphore_mem>>
    tpu.enqueue_dma source(%29 : memref<128x128xf32, #tpu.memory_space<any>>) target(%31 : memref<128x128xf32, #tpu.memory_space<vmem>>) target_semaphore(%33 : memref<!tpu.dma_semaphore, #tpu.memory_space<semaphore_mem>>)
    %c1_i32_36 = arith.constant 1 : i32
    %c1_i32_37 = arith.constant 1 : i32
    %c1_i32_38 = arith.constant 1 : i32
    %c0_i32_39 = arith.constant 0 : i32
    %c0_i32_40 = arith.constant 0 : i32
    %34 = tpu.memref_slice %arg5[%27, %c0_i32_39, %c0_i32_40] : memref<9x1x128xf32, #tpu.memory_space<any>> -> memref<1x1x128xf32, #tpu.memory_space<any>>
    %35 = tpu.memref_squeeze %34 : memref<1x1x128xf32, #tpu.memory_space<any>> -> memref<1x128xf32, #tpu.memory_space<any>>
    %c0_i32_41 = arith.constant 0 : i32
    %c0_i32_42 = arith.constant 0 : i32
    %36 = tpu.memref_slice %arg13[%c1_i32_36, %c0_i32_41, %c0_i32_42] : memref<2x1x128xf32, #tpu.memory_space<vmem>> -> memref<1x1x128xf32, #tpu.memory_space<vmem>>
    %37 = tpu.memref_squeeze %36 : memref<1x1x128xf32, #tpu.memory_space<vmem>> -> memref<1x128xf32, #tpu.memory_space<vmem>>
    %38 = tpu.memref_slice %arg14[%c1_i32_37, %c1_i32_38] : memref<2x2x!tpu.dma_semaphore, #tpu.memory_space<semaphore_mem>> -> memref<1x1x!tpu.dma_semaphore, #tpu.memory_space<semaphore_mem>>
    %39 = tpu.memref_squeeze %38 : memref<1x1x!tpu.dma_semaphore, #tpu.memory_space<semaphore_mem>> -> memref<!tpu.dma_semaphore, #tpu.memory_space<semaphore_mem>>
    tpu.enqueue_dma source(%35 : memref<1x128xf32, #tpu.memory_space<any>>) target(%37 : memref<1x128xf32, #tpu.memory_space<vmem>>) target_semaphore(%39 : memref<!tpu.dma_semaphore, #tpu.memory_space<semaphore_mem>>)
    %c0_43 = arith.constant 0 : index
    %c0_44 = arith.constant 0 : index
    %40 = vector.load %arg11[%c0_43, %c0_44] : memref<512x128xf32, #tpu.memory_space<vmem>>, vector<512x128xf32>
    %c0_45 = arith.constant 0 : index
    %c0_46 = arith.constant 0 : index
    %c0_47 = arith.constant 0 : index
    %41 = vector.load %arg12[%c0_45, %c0_46, %c0_47] : memref<2x128x128xf32, #tpu.memory_space<vmem>>, vector<1x128x128xf32>
    %42 = vector.shape_cast %41 : vector<1x128x128xf32> to vector<128x128xf32>
    %cst = arith.constant dense<0.000000e+00> : vector<512x128xf32>
    %43 = tpu.matmul %40, %42, %cst {dimension_numbers = #tpu.dot_dimension_numbers<[1], [0], [0], [1], [0, 0, 1, 1], [], []>} : vector<512x128xf32>, vector<128x128xf32>, vector<512x128xf32> -> vector<512x128xf32>
    %c0_48 = arith.constant 0 : index
    %c0_49 = arith.constant 0 : index
    %c0_50 = arith.constant 0 : index
    %44 = vector.load %arg13[%c0_48, %c0_49, %c0_50] : memref<2x1x128xf32, #tpu.memory_space<vmem>>, vector<1x1x128xf32>
    %45 = vector.shape_cast %44 : vector<1x1x128xf32> to vector<1x128xf32>
    %46 = vector.broadcast %45 : vector<1x128xf32> to vector<512x128xf32>
    %47 = arith.addf %43, %46 : vector<512x128xf32>
    %cst_51 = arith.constant 0.000000e+00 : f32
    %48 = vector.broadcast %cst_51 : f32 to vector<512x128xf32>
    %49 = arith.maximumf %47, %48 : vector<512x128xf32>
    %c0_52 = arith.constant 0 : index
    %c0_53 = arith.constant 0 : index
    %50 = vector.load %arg11[%c0_52, %c0_53] : memref<512x128xf32, #tpu.memory_space<vmem>>, vector<512x128xf32>
    tpu.vector_store %arg11[%c0_52, %c0_53], %49 {strides = array<i32>} : memref<512x128xf32, #tpu.memory_space<vmem>>, vector<512x128xf32>,
    %c0_i32_54 = arith.constant 0 : i32
    %c1_i32_55 = arith.constant 1 : i32
    %c0_i32_56 = arith.constant 0 : i32
    %c1_i32_57 = arith.constant 1 : i32
    %c0_i32_58 = arith.constant 0 : i32
    %c0_i32_59 = arith.constant 0 : i32
    %51 = tpu.memref_slice %arg4[%c0_i32_54, %c0_i32_58, %c0_i32_59] : memref<9x128x128xf32, #tpu.memory_space<any>> -> memref<1x128x128xf32, #tpu.memory_space<any>>
    %52 = tpu.memref_squeeze %51 : memref<1x128x128xf32, #tpu.memory_space<any>> -> memref<128x128xf32, #tpu.memory_space<any>>
    %c0_i32_60 = arith.constant 0 : i32
    %c0_i32_61 = arith.constant 0 : i32
    %53 = tpu.memref_slice %arg12[%c1_i32_55, %c0_i32_60, %c0_i32_61] : memref<2x128x128xf32, #tpu.memory_space<vmem>> -> memref<1x128x128xf32, #tpu.memory_space<vmem>>
    %54 = tpu.memref_squeeze %53 : memref<1x128x128xf32, #tpu.memory_space<vmem>> -> memref<128x128xf32, #tpu.memory_space<vmem>>
    %55 = tpu.memref_slice %arg14[%c0_i32_56, %c1_i32_57] : memref<2x2x!tpu.dma_semaphore, #tpu.memory_space<semaphore_mem>> -> memref<1x1x!tpu.dma_semaphore, #tpu.memory_space<semaphore_mem>>
    %56 = tpu.memref_squeeze %55 : memref<1x1x!tpu.dma_semaphore, #tpu.memory_space<semaphore_mem>> -> memref<!tpu.dma_semaphore, #tpu.memory_space<semaphore_mem>>
    tpu.wait_dma2 semaphore(%56 : memref<!tpu.dma_semaphore, #tpu.memory_space<semaphore_mem>>) src(%52 : memref<128x128xf32, #tpu.memory_space<any>>) dst(%54 : memref<128x128xf32, #tpu.memory_space<vmem>>)
    %c0_i32_62 = arith.constant 0 : i32
    %c1_i32_63 = arith.constant 1 : i32
    %c1_i32_64 = arith.constant 1 : i32
    %c1_i32_65 = arith.constant 1 : i32
    %c0_i32_66 = arith.constant 0 : i32
    %c0_i32_67 = arith.constant 0 : i32
    %57 = tpu.memref_slice %arg5[%c0_i32_62, %c0_i32_66, %c0_i32_67] : memref<9x1x128xf32, #tpu.memory_space<any>> -> memref<1x1x128xf32, #tpu.memory_space<any>>
    %58 = tpu.memref_squeeze %57 : memref<1x1x128xf32, #tpu.memory_space<any>> -> memref<1x128xf32, #tpu.memory_space<any>>
    %c0_i32_68 = arith.constant 0 : i32
    %c0_i32_69 = arith.constant 0 : i32
    %59 = tpu.memref_slice %arg13[%c1_i32_63, %c0_i32_68, %c0_i32_69] : memref<2x1x128xf32, #tpu.memory_space<vmem>> -> memref<1x1x128xf32, #tpu.memory_space<vmem>>
    %60 = tpu.memref_squeeze %59 : memref<1x1x128xf32, #tpu.memory_space<vmem>> -> memref<1x128xf32, #tpu.memory_space<vmem>>
    %61 = tpu.memref_slice %arg14[%c1_i32_64, %c1_i32_65] : memref<2x2x!tpu.dma_semaphore, #tpu.memory_space<semaphore_mem>> -> memref<1x1x!tpu.dma_semaphore, #tpu.memory_space<semaphore_mem>>
    %62 = tpu.memref_squeeze %61 : memref<1x1x!tpu.dma_semaphore, #tpu.memory_space<semaphore_mem>> -> memref<!tpu.dma_semaphore, #tpu.memory_space<semaphore_mem>>
    tpu.wait_dma2 semaphore(%62 : memref<!tpu.dma_semaphore, #tpu.memory_space<semaphore_mem>>) src(%58 : memref<1x128xf32, #tpu.memory_space<any>>) dst(%60 : memref<1x128xf32, #tpu.memory_space<vmem>>)
    %c2 = arith.constant 2 : index
    %63 = memref.load %arg0[%c2] : memref<3xi32, #tpu.memory_space<smem>>
    %c6_i32 = arith.constant 6 : i32
    %64 = arith.addi %c6_i32, %63 : i32
    %c0_i32_70 = arith.constant 0 : i32
    %c0_i32_71 = arith.constant 0 : i32
    %c0_i32_72 = arith.constant 0 : i32
    %c0_i32_73 = arith.constant 0 : i32
    %c0_i32_74 = arith.constant 0 : i32
    %65 = tpu.memref_slice %arg4[%64, %c0_i32_73, %c0_i32_74] : memref<9x128x128xf32, #tpu.memory_space<any>> -> memref<1x128x128xf32, #tpu.memory_space<any>>
    %66 = tpu.memref_squeeze %65 : memref<1x128x128xf32, #tpu.memory_space<any>> -> memref<128x128xf32, #tpu.memory_space<any>>
    %c0_i32_75 = arith.constant 0 : i32
    %c0_i32_76 = arith.constant 0 : i32
    %67 = tpu.memref_slice %arg12[%c0_i32_70, %c0_i32_75, %c0_i32_76] : memref<2x128x128xf32, #tpu.memory_space<vmem>> -> memref<1x128x128xf32, #tpu.memory_space<vmem>>
    %68 = tpu.memref_squeeze %67 : memref<1x128x128xf32, #tpu.memory_space<vmem>> -> memref<128x128xf32, #tpu.memory_space<vmem>>
    %69 = tpu.memref_slice %arg14[%c0_i32_71, %c0_i32_72] : memref<2x2x!tpu.dma_semaphore, #tpu.memory_space<semaphore_mem>> -> memref<1x1x!tpu.dma_semaphore, #tpu.memory_space<semaphore_mem>>
    %70 = tpu.memref_squeeze %69 : memref<1x1x!tpu.dma_semaphore, #tpu.memory_space<semaphore_mem>> -> memref<!tpu.dma_semaphore, #tpu.memory_space<semaphore_mem>>
    tpu.enqueue_dma source(%66 : memref<128x128xf32, #tpu.memory_space<any>>) target(%68 : memref<128x128xf32, #tpu.memory_space<vmem>>) target_semaphore(%70 : memref<!tpu.dma_semaphore, #tpu.memory_space<semaphore_mem>>)
    %c0_i32_77 = arith.constant 0 : i32
    %c1_i32_78 = arith.constant 1 : i32
    %c0_i32_79 = arith.constant 0 : i32
    %c0_i32_80 = arith.constant 0 : i32
    %c0_i32_81 = arith.constant 0 : i32
    %71 = tpu.memref_slice %arg5[%64, %c0_i32_80, %c0_i32_81] : memref<9x1x128xf32, #tpu.memory_space<any>> -> memref<1x1x128xf32, #tpu.memory_space<any>>
    %72 = tpu.memref_squeeze %71 : memref<1x1x128xf32, #tpu.memory_space<any>> -> memref<1x128xf32, #tpu.memory_space<any>>
    %c0_i32_82 = arith.constant 0 : i32
    %c0_i32_83 = arith.constant 0 : i32
    %73 = tpu.memref_slice %arg13[%c0_i32_77, %c0_i32_82, %c0_i32_83] : memref<2x1x128xf32, #tpu.memory_space<vmem>> -> memref<1x1x128xf32, #tpu.memory_space<vmem>>
    %74 = tpu.memref_squeeze %73 : memref<1x1x128xf32, #tpu.memory_space<vmem>> -> memref<1x128xf32, #tpu.memory_space<vmem>>
    %75 = tpu.memref_slice %arg14[%c1_i32_78, %c0_i32_79] : memref<2x2x!tpu.dma_semaphore, #tpu.memory_space<semaphore_mem>> -> memref<1x1x!tpu.dma_semaphore, #tpu.memory_space<semaphore_mem>>
    %76 = tpu.memref_squeeze %75 : memref<1x1x!tpu.dma_semaphore, #tpu.memory_space<semaphore_mem>> -> memref<!tpu.dma_semaphore, #tpu.memory_space<semaphore_mem>>
    tpu.enqueue_dma source(%72 : memref<1x128xf32, #tpu.memory_space<any>>) target(%74 : memref<1x128xf32, #tpu.memory_space<vmem>>) target_semaphore(%76 : memref<!tpu.dma_semaphore, #tpu.memory_space<semaphore_mem>>)
    %c0_84 = arith.constant 0 : index
    %c0_85 = arith.constant 0 : index
    %77 = vector.load %arg11[%c0_84, %c0_85] : memref<512x128xf32, #tpu.memory_space<vmem>>, vector<512x128xf32>
    %c1_86 = arith.constant 1 : index
    %c0_87 = arith.constant 0 : index
    %c0_88 = arith.constant 0 : index
    %78 = vector.load %arg12[%c1_86, %c0_87, %c0_88] : memref<2x128x128xf32, #tpu.memory_space<vmem>>, vector<1x128x128xf32>
    %79 = vector.shape_cast %78 : vector<1x128x128xf32> to vector<128x128xf32>
    %cst_89 = arith.constant dense<0.000000e+00> : vector<512x128xf32>
    %80 = tpu.matmul %77, %79, %cst_89 {dimension_numbers = #tpu.dot_dimension_numbers<[1], [0], [0], [1], [0, 0, 1, 1], [], []>} : vector<512x128xf32>, vector<128x128xf32>, vector<512x128xf32> -> vector<512x128xf32>
    %c1_90 = arith.constant 1 : index
    %c0_91 = arith.constant 0 : index
    %c0_92 = arith.constant 0 : index
    %81 = vector.load %arg13[%c1_90, %c0_91, %c0_92] : memref<2x1x128xf32, #tpu.memory_space<vmem>>, vector<1x1x128xf32>
    %82 = vector.shape_cast %81 : vector<1x1x128xf32> to vector<1x128xf32>
    %83 = vector.broadcast %82 : vector<1x128xf32> to vector<512x128xf32>
    %84 = arith.addf %80, %83 : vector<512x128xf32>
    %cst_93 = arith.constant 0.000000e+00 : f32
    %85 = vector.broadcast %cst_93 : f32 to vector<512x128xf32>
    %86 = arith.maximumf %84, %85 : vector<512x128xf32>
    %c0_94 = arith.constant 0 : index
    %c0_95 = arith.constant 0 : index
    %87 = vector.load %arg11[%c0_94, %c0_95] : memref<512x128xf32, #tpu.memory_space<vmem>>, vector<512x128xf32>
    tpu.vector_store %arg11[%c0_94, %c0_95], %86 {strides = array<i32>} : memref<512x128xf32, #tpu.memory_space<vmem>>, vector<512x128xf32>,
    %c0_i32_96 = arith.constant 0 : i32
    %c0_i32_97 = arith.constant 0 : i32
    %c0_i32_98 = arith.constant 0 : i32
    %c0_i32_99 = arith.constant 0 : i32
    %c0_i32_100 = arith.constant 0 : i32
    %c0_i32_101 = arith.constant 0 : i32
    %88 = tpu.memref_slice %arg4[%c0_i32_96, %c0_i32_100, %c0_i32_101] : memref<9x128x128xf32, #tpu.memory_space<any>> -> memref<1x128x128xf32, #tpu.memory_space<any>>
    %89 = tpu.memref_squeeze %88 : memref<1x128x128xf32, #tpu.memory_space<any>> -> memref<128x128xf32, #tpu.memory_space<any>>
    %c0_i32_102 = arith.constant 0 : i32
    %c0_i32_103 = arith.constant 0 : i32
    %90 = tpu.memref_slice %arg12[%c0_i32_97, %c0_i32_102, %c0_i32_103] : memref<2x128x128xf32, #tpu.memory_space<vmem>> -> memref<1x128x128xf32, #tpu.memory_space<vmem>>
    %91 = tpu.memref_squeeze %90 : memref<1x128x128xf32, #tpu.memory_space<vmem>> -> memref<128x128xf32, #tpu.memory_space<vmem>>
    %92 = tpu.memref_slice %arg14[%c0_i32_98, %c0_i32_99] : memref<2x2x!tpu.dma_semaphore, #tpu.memory_space<semaphore_mem>> -> memref<1x1x!tpu.dma_semaphore, #tpu.memory_space<semaphore_mem>>
    %93 = tpu.memref_squeeze %92 : memref<1x1x!tpu.dma_semaphore, #tpu.memory_space<semaphore_mem>> -> memref<!tpu.dma_semaphore, #tpu.memory_space<semaphore_mem>>
    tpu.wait_dma2 semaphore(%93 : memref<!tpu.dma_semaphore, #tpu.memory_space<semaphore_mem>>) src(%89 : memref<128x128xf32, #tpu.memory_space<any>>) dst(%91 : memref<128x128xf32, #tpu.memory_space<vmem>>)
    %c0_i32_104 = arith.constant 0 : i32
    %c0_i32_105 = arith.constant 0 : i32
    %c1_i32_106 = arith.constant 1 : i32
    %c0_i32_107 = arith.constant 0 : i32
    %c0_i32_108 = arith.constant 0 : i32
    %c0_i32_109 = arith.constant 0 : i32
    %94 = tpu.memref_slice %arg5[%c0_i32_104, %c0_i32_108, %c0_i32_109] : memref<9x1x128xf32, #tpu.memory_space<any>> -> memref<1x1x128xf32, #tpu.memory_space<any>>
    %95 = tpu.memref_squeeze %94 : memref<1x1x128xf32, #tpu.memory_space<any>> -> memref<1x128xf32, #tpu.memory_space<any>>
    %c0_i32_110 = arith.constant 0 : i32
    %c0_i32_111 = arith.constant 0 : i32
    %96 = tpu.memref_slice %arg13[%c0_i32_105, %c0_i32_110, %c0_i32_111] : memref<2x1x128xf32, #tpu.memory_space<vmem>> -> memref<1x1x128xf32, #tpu.memory_space<vmem>>
    %97 = tpu.memref_squeeze %96 : memref<1x1x128xf32, #tpu.memory_space<vmem>> -> memref<1x128xf32, #tpu.memory_space<vmem>>
    %98 = tpu.memref_slice %arg14[%c1_i32_106, %c0_i32_107] : memref<2x2x!tpu.dma_semaphore, #tpu.memory_space<semaphore_mem>> -> memref<1x1x!tpu.dma_semaphore, #tpu.memory_space<semaphore_mem>>
    %99 = tpu.memref_squeeze %98 : memref<1x1x!tpu.dma_semaphore, #tpu.memory_space<semaphore_mem>> -> memref<!tpu.dma_semaphore, #tpu.memory_space<semaphore_mem>>
    tpu.wait_dma2 semaphore(%99 : memref<!tpu.dma_semaphore, #tpu.memory_space<semaphore_mem>>) src(%95 : memref<1x128xf32, #tpu.memory_space<any>>) dst(%97 : memref<1x128xf32, #tpu.memory_space<vmem>>)
    %c0_112 = arith.constant 0 : index
    %c0_113 = arith.constant 0 : index
    %100 = vector.load %arg11[%c0_112, %c0_113] : memref<512x128xf32, #tpu.memory_space<vmem>>, vector<512x128xf32>
    %c0_114 = arith.constant 0 : index
    %c0_115 = arith.constant 0 : index
    %c0_116 = arith.constant 0 : index
    %101 = vector.load %arg12[%c0_114, %c0_115, %c0_116] : memref<2x128x128xf32, #tpu.memory_space<vmem>>, vector<1x128x128xf32>
    %102 = vector.shape_cast %101 : vector<1x128x128xf32> to vector<128x128xf32>
    %cst_117 = arith.constant dense<0.000000e+00> : vector<512x128xf32>
    %103 = tpu.matmul %100, %102, %cst_117 {dimension_numbers = #tpu.dot_dimension_numbers<[1], [0], [0], [1], [0, 0, 1, 1], [], []>} : vector<512x128xf32>, vector<128x128xf32>, vector<512x128xf32> -> vector<512x128xf32>
    %c0_118 = arith.constant 0 : index
    %c0_119 = arith.constant 0 : index
    %c0_120 = arith.constant 0 : index
    %104 = vector.load %arg13[%c0_118, %c0_119, %c0_120] : memref<2x1x128xf32, #tpu.memory_space<vmem>>, vector<1x1x128xf32>
    %105 = vector.shape_cast %104 : vector<1x1x128xf32> to vector<1x128xf32>
    %106 = vector.broadcast %105 : vector<1x128xf32> to vector<512x128xf32>
    %107 = arith.addf %103, %106 : vector<512x128xf32>
    %cst_121 = arith.constant 0.000000e+00 : f32
    %108 = vector.broadcast %cst_121 : f32 to vector<512x128xf32>
    %109 = arith.maximumf %107, %108 : vector<512x128xf32>
    %c0_122 = arith.constant 0 : index
    %c0_123 = arith.constant 0 : index
    %110 = vector.load %arg11[%c0_122, %c0_123] : memref<512x128xf32, #tpu.memory_space<vmem>>, vector<512x128xf32>
    tpu.vector_store %arg11[%c0_122, %c0_123], %109 {strides = array<i32>} : memref<512x128xf32, #tpu.memory_space<vmem>>, vector<512x128xf32>,
    %c0_124 = arith.constant 0 : index
    %c0_125 = arith.constant 0 : index
    %111 = vector.load %arg11[%c0_124, %c0_125] : memref<512x128xf32, #tpu.memory_space<vmem>>, vector<512x128xf32>
    %112 = vector.shape_cast %111 : vector<512x128xf32> to vector<2x256x128xf32>
    %cst_126 = arith.constant dense<0.000000e+00> : vector<2x128xf32>
    %113 = vector.multi_reduction <add>, %112, %cst_126 [1] : vector<2x256x128xf32> to vector<2x128xf32>
    %cst_127 = arith.constant 3.906250e-03 : f32
    %114 = vector.broadcast %cst_127 : f32 to vector<2x128xf32>
    %115 = arith.mulf %113, %114 : vector<2x128xf32>
    %c0_128 = arith.constant 0 : index
    %c0_129 = arith.constant 0 : index
    %116 = vector.load %arg6[%c0_128, %c0_129] : memref<128x128xf32, #tpu.memory_space<vmem>>, vector<128x128xf32>
    %cst_130 = arith.constant dense<0.000000e+00> : vector<2x128xf32>
    %117 = tpu.matmul %115, %116, %cst_130 {dimension_numbers = #tpu.dot_dimension_numbers<[1], [0], [0], [1], [0, 0, 1, 1], [], []>} : vector<2x128xf32>, vector<128x128xf32>, vector<2x128xf32> -> vector<2x128xf32>
    %c0_131 = arith.constant 0 : index
    %c0_132 = arith.constant 0 : index
    %118 = vector.load %arg7[%c0_131, %c0_132] : memref<1x128xf32, #tpu.memory_space<vmem>>, vector<1x128xf32>
    %119 = vector.broadcast %118 : vector<1x128xf32> to vector<2x128xf32>
    %120 = arith.addf %117, %119 : vector<2x128xf32>
    %121 = tpu.iota {dimensions = array<i32: 1>} : vector<2x128xi32>
    %c16_i32 = arith.constant 16 : i32
    %122 = vector.broadcast %c16_i32 : i32 to vector<2x128xi32>
    %123 = arith.cmpi slt, %121, %122 : vector<2x128xi32>
    %cst_133 = arith.constant 0xFF800000 : f32
    %124 = vector.broadcast %cst_133 : f32 to vector<2x128xf32>
    %125 = arith.select %123, %120, %124 : vector<2x128xi1>, vector<2x128xf32>
    %cst_134 = arith.constant dense<0xFF800000> : vector<2xf32>
    %126 = vector.multi_reduction <maximumf>, %125, %cst_134 [1] : vector<2x128xf32> to vector<2xf32>
    %127 = vector.shape_cast %126 : vector<2xf32> to vector<2x1xf32>
    %128 = vector.broadcast %127 : vector<2x1xf32> to vector<2x128xf32>
    %129 = arith.cmpf oeq, %125, %128 : vector<2x128xf32>
    %c128_i32 = arith.constant 128 : i32
    %130 = vector.broadcast %c128_i32 : i32 to vector<2x128xi32>
    %131 = arith.select %129, %121, %130 : vector<2x128xi1>, vector<2x128xi32>
    %cst_135 = arith.constant dense<2147483647> : vector<2xi32>
    %132 = vector.multi_reduction <minsi>, %131, %cst_135 [1] : vector<2x128xi32> to vector<2xi32>
    %133 = vector.shape_cast %132 : vector<2xi32> to vector<2x1xi32>
    %c0_136 = arith.constant 0 : index
    %c0_137 = arith.constant 0 : index
    %134 = vector.load %arg8[%c0_136, %c0_137] : memref<2x1xi32, #tpu.memory_space<vmem>>, vector<2x1xi32>
    %135 = arith.cmpi eq, %133, %134 : vector<2x1xi32>
    %136 = arith.extui %135 : vector<2x1xi1> to vector<2x1xi32>
    %137 = arith.sitofp %136 : vector<2x1xi32> to vector<2x1xf32>
    %138 = vector.shape_cast %137 : vector<2x1xf32> to vector<1x2x1xf32>
    %cst_138 = arith.constant dense<0.000000e+00> : vector<1xf32>
    %139 = vector.multi_reduction <add>, %138, %cst_138 [1, 2] : vector<1x2x1xf32> to vector<1xf32>
    %140 = vector.shape_cast %139 : vector<1xf32> to vector<1x1x1xf32>
    %141 = vector.extract %140[0, 0, 0] : f32 from vector<1x1x1xf32>
    %cst_139 = arith.constant 5.000000e-01 : f32
    %142 = arith.mulf %141, %cst_139 : f32
    %c0_140 = arith.constant 0 : index
    %143 = memref.load %arg9[%c0_140] : memref<1xf32, #tpu.memory_space<smem>>
    %144 = arith.subf %142, %143 : f32
    %145 = vector.broadcast %144 : f32 to vector<1x1xf32>
    %c0_141 = arith.constant 0 : index
    %c0_142 = arith.constant 0 : index
    %146 = vector.load %arg10[%c0_141, %c0_142] : memref<1x1xf32, #tpu.memory_space<vmem>>, vector<1x1xf32>
    tpu.vector_store %arg10[%c0_141, %c0_142], %145 {strides = array<i32>} : memref<1x1xf32, #tpu.memory_space<vmem>>, vector<1x1xf32>,
    return
  }
}

</mosaic_0001>

<bundles_post_ra>
// kernel: reward_fn_spos_forward.1
= control target key start
LH: loop header
LB: loop body
LE: loop exit
PB: predicated region body
PF: predicated region fallthrough
CT: control target
= control target key end

     0   :  { %16 = vsyncpa [#allocation9], 0  ;;  %s6735_s0 = inlined_call_operand.vmem [shape: s32[3], index: 0, kind: input, shape index: {}]   ;;  %s6736_s1 = inlined_call_operand.vmem [shape: f32[512,40], index: 1, kind: input, shape index: {}]   ;;  %s6737_s2 = inlined_call_operand.vmem [shape: f32[40,128], index: 2, kind: input, shape index: {}]   ;;  %s6738_s3 = inlined_call_operand.vmem [shape: f32[1,128], index: 3, kind: input, shape index: {}, may-alias: {3,7}]   ;;  %s6739_s4 = inlined_call_operand.vmem [shape: f32[9,128,128], index: 4, kind: input, shape index: {}]   ;;  %s6740_s5 = inlined_call_operand.vmem [shape: f32[9,1,128], index: 5, kind: input, shape index: {}]   ;;  %s6741_s6 = inlined_call_operand.vmem [shape: f32[128,128], index: 6, kind: input, shape index: {}]   ;;  %s6742_s7 = inlined_call_operand.vmem [shape: f32[1,128], index: 7, kind: input, shape index: {}, may-alias: {3,7}]   ;;  %s6743_s8 = inlined_call_operand.vmem [shape: s32[2,1], index: 8, kind: input, shape index: {}]   ;;  %s6744_s9 = inlined_call_operand.<no memory space> [shape: f32[1], index: 9, kind: input, shape index: {}]   ;;  %s6745_s10 = inlined_call_operand.hbm [shape: f32[1,1], index: 10, kind: output, shape index: {}]  }
   0x1   :  { %17 = vsyncpa [#allocation8], 0  ;;  %s24_s15 = sshll.u32 %s6735_s0, 4  ;;  %s25_s15 = int_to_ptr.vmem [resolvable:$true] %s24_s15 }
   0x2   :  { %s4685_s16 = scalar_lea.vmem %s25_s15, 16  ;;  %p4690_p1 = scmp.lt.s32.totalorder %s25_s15, %s25_s15 }
   0x3   :  { %p4686_p0 = scmp.ne.s32.totalorder %s25_s15, %s4685_s16  ;;  %p4691_p2 = scmp.lt.s32.totalorder %s4685_s16, %s4685_s16 }
   0x5   :  { %p4692_p3 = por %p4691_p2, %p4690_p1 }
   0x7   :  { %p4693_p4 = pnand %p4692_p3, %p4686_p0 }
   0x9   :  { %4696 = shalt.err (!%p4693_p4)
}
   0xa   :  { %s4737_s17 = smov [#allocation7]  }
   0xb   :  { %27 = dma.vmem_to_smem %s25_s15, 16, %s4737_s17, [#allocation9]  }
   0xc   :  { %4719 = dma.done.wait [#allocation9], 16  }
   0xd   :  { %4720 = vsyncadd [#allocation9], 4294967280 }
   0xe   :  { %43 = sfence }
   0xf   :  { %s44_s18 = sld [smem:[#allocation7]] }
  0x15   :  { %s3582_s19 = sshll.u32 %s44_s18, 7 }
  0x16   :  { %s46_s22 = scalar_lea.vmem %s6739_s4, %s3582_s19 }
  0x17   :  { %v4803_v0 = vld [vmem:[%s46_s22] sm:$0xff]  ;;  %v4805_v1 = vld [vmem:[%s46_s22 + $0x8] sm:$0xff]  ;;  %v4807_v2 = vld [vmem:[%s46_s22 + $0x10] sm:$0xff] }
  0x18   :  { %6788 = vst [vmem:[#allocation29_spill] sm:$0xff] %v4803_v0  ;;  %6789 = vst [vmem:[#allocation30_spill] sm:$0xff] %v4805_v1  ;;  %v4809_v3 = vld [vmem:[%s46_s22 + $0x18] sm:$0xff]  ;;  %v4811_v4 = vld [vmem:[%s46_s22 + $0x20] sm:$0xff] }
  0x19   :  { %6790 = vst [vmem:[#allocation31_spill] sm:$0xff] %v4807_v2  ;;  %6791 = vst [vmem:[#allocation32_spill] sm:$0xff] %v4809_v3  ;;  %v4813_v5 = vld [vmem:[%s46_s22 + $0x28] sm:$0xff]  ;;  %v4815_v6 = vld [vmem:[%s46_s22 + $0x30] sm:$0xff] }
  0x1a   :  { %6792 = vst [vmem:[#allocation33_spill] sm:$0xff] %v4811_v4  ;;  %6793 = vst [vmem:[#allocation34_spill] sm:$0xff] %v4813_v5  ;;  %v4817_v7 = vld [vmem:[%s46_s22 + $0x38] sm:$0xff]  ;;  %v4819_v8 = vld [vmem:[%s46_s22 + $0x40] sm:$0xff] }
  0x1b   :  { %6794 = vst [vmem:[#allocation35_spill] sm:$0xff] %v4815_v6  ;;  %6795 = vst [vmem:[#allocation36_spill] sm:$0xff] %v4817_v7  ;;  %v4821_v9 = vld [vmem:[%s46_s22 + $0x48] sm:$0xff]  ;;  %v4823_v10 = vld [vmem:[%s46_s22 + $0x50] sm:$0xff] }
  0x1c   :  { %6796 = vst [vmem:[#allocation37_spill] sm:$0xff] %v4819_v8  ;;  %6797 = vst [vmem:[#allocation38_spill] sm:$0xff] %v4821_v9  ;;  %v4825_v11 = vld [vmem:[%s46_s22 + $0x58] sm:$0xff]  ;;  %v4827_v12 = vld [vmem:[%s46_s22 + $0x60] sm:$0xff] }
  0x1d   :  { %6798 = vst [vmem:[#allocation39_spill] sm:$0xff] %v4823_v10  ;;  %6799 = vst [vmem:[#allocation40_spill] sm:$0xff] %v4825_v11  ;;  %v4829_v13 = vld [vmem:[%s46_s22 + $0x68] sm:$0xff]  ;;  %v4831_v14 = vld [vmem:[%s46_s22 + $0x70] sm:$0xff] }
  0x1e   :  { %6800 = vst [vmem:[#allocation41_spill] sm:$0xff] %v4827_v12  ;;  %6801 = vst [vmem:[#allocation42_spill] sm:$0xff] %v4829_v13  ;;  %v4833_v15 = vld [vmem:[%s46_s22 + $0x78] sm:$0xff] }
  0x1f   :  { %6802 = vst [vmem:[#allocation43_spill] sm:$0xff] %v4831_v14  ;;  %6803 = vst [vmem:[#allocation44_spill] sm:$0xff] %v4833_v15 }
  0x20   :  { %118 = vsyncadd [#allocation5], 2048  ;;  %s119_s24 = scalar_lea.vmem %s6740_s5, %s44_s18 }
  0x21   :  { %v138_v16 = vld [vmem:[%s119_s24] sm:$0x1] }
  0x22   :  { %139 = vst [vmem:[#allocation4] sm:$0x1] %v138_v16 }
  0x23   :  { %164 = vsyncadd [#allocation5 + $0x2], 16 }
  0x24   :  { %v4841_v17 = vld [vmem:[%s6736_s1] sm:$0xff]  ;;  %v4846_v18 = vld [vmem:[%s6736_s1 + $0x8] sm:$0xff]  ;;  %v4851_v19 = vld [vmem:[%s6736_s1 + $0x10] sm:$0xff] }
  0x25   :  { %v4856_v20 = vld [vmem:[%s6736_s1 + $0x18] sm:$0xff]  ;;  %v4861_v21 = vld [vmem:[%s6736_s1 + $0x20] sm:$0xff]  ;;  %v4866_v22 = vld [vmem:[%s6736_s1 + $0x28] sm:$0xff] }
  0x26   :  { %v4871_v23 = vld [vmem:[%s6736_s1 + $0x30] sm:$0xff]  ;;  %v4876_v24 = vld [vmem:[%s6736_s1 + $0x38] sm:$0xff]  ;;  %v4881_v25 = vld [vmem:[%s6736_s1 + $0x40] sm:$0xff] }
  0x27   :  { %v4886_v26 = vld [vmem:[%s6736_s1 + $0x48] sm:$0xff]  ;;  %v4891_v27 = vld [vmem:[%s6736_s1 + $0x50] sm:$0xff]  ;;  %v4896_v28 = vld [vmem:[%s6736_s1 + $0x58] sm:$0xff] }
  0x28   :  { %v4901_v29 = vld [vmem:[%s6736_s1 + $0x60] sm:$0xff]  ;;  %v4906_v30 = vld [vmem:[%s6736_s1 + $0x68] sm:$0xff]  ;;  %v4911_v31 = vld [vmem:[%s6736_s1 + $0x70] sm:$0xff] }
  0x29   :  { %v4916_v32 = vld [vmem:[%s6736_s1 + $0x78] sm:$0xff]  ;;  %v4921_v33 = vld [vmem:[%s6736_s1 + $0x80] sm:$0xff]  ;;  %v4926_v34 = vld [vmem:[%s6736_s1 + $0x88] sm:$0xff] }
  0x2a   :  { %v4931_v35 = vld [vmem:[%s6736_s1 + $0x90] sm:$0xff]  ;;  %v4936_v36 = vld [vmem:[%s6736_s1 + $0x98] sm:$0xff]  ;;  %v4941_v37 = vld [vmem:[%s6736_s1 + $0xa0] sm:$0xff] }
  0x2b   :  { %v4946_v38 = vld [vmem:[%s6736_s1 + $0xa8] sm:$0xff]  ;;  %v4951_v39 = vld [vmem:[%s6736_s1 + $0xb0] sm:$0xff]  ;;  %v4956_v40 = vld [vmem:[%s6736_s1 + $0xb8] sm:$0xff] }
  0x2c   :  { %v4961_v41 = vld [vmem:[%s6736_s1 + $0xc0] sm:$0xff]  ;;  %v4966_v42 = vld [vmem:[%s6736_s1 + $0xc8] sm:$0xff]  ;;  %v4971_v43 = vld [vmem:[%s6736_s1 + $0xd0] sm:$0xff] }
  0x2d   :  { %v4976_v44 = vld [vmem:[%s6736_s1 + $0xd8] sm:$0xff]  ;;  %v4981_v45 = vld [vmem:[%s6736_s1 + $0xe0] sm:$0xff]  ;;  %v4986_v46 = vld [vmem:[%s6736_s1 + $0xe8] sm:$0xff] }
  0x2e   :  { %v4991_v47 = vld [vmem:[%s6736_s1 + $0xf0] sm:$0xff]  ;;  %v4996_v48 = vld [vmem:[%s6736_s1 + $0xf8] sm:$0xff]  ;;  %v5001_v49 = vld [vmem:[%s6736_s1 + $0x100] sm:$0xff] }
  0x2f   :  { %v5006_v50 = vld [vmem:[%s6736_s1 + $0x108] sm:$0xff]  ;;  %v5011_v51 = vld [vmem:[%s6736_s1 + $0x110] sm:$0xff]  ;;  %v5016_v52 = vld [vmem:[%s6736_s1 + $0x118] sm:$0xff] }
  0x30   :  { %v5021_v53 = vld [vmem:[%s6736_s1 + $0x120] sm:$0xff]  ;;  %v5026_v54 = vld [vmem:[%s6736_s1 + $0x128] sm:$0xff]  ;;  %v5031_v55 = vld [vmem:[%s6736_s1 + $0x130] sm:$0xff] }
  0x31   :  { %v5036_v56 = vld [vmem:[%s6736_s1 + $0x138] sm:$0xff]  ;;  %v5041_v57 = vld [vmem:[%s6736_s1 + $0x140] sm:$0xff]  ;;  %v5046_v58 = vld [vmem:[%s6736_s1 + $0x148] sm:$0xff] }
  0x32   :  { %v5051_v59 = vld [vmem:[%s6736_s1 + $0x150] sm:$0xff]  ;;  %v5056_v60 = vld [vmem:[%s6736_s1 + $0x158] sm:$0xff]  ;;  %v5061_v61 = vld [vmem:[%s6736_s1 + $0x160] sm:$0xff] }
  0x33   :  { %v5066_v62 = vld [vmem:[%s6736_s1 + $0x168] sm:$0xff]  ;;  %v5071_v63 = vld [vmem:[%s6736_s1 + $0x170] sm:$0xff]  ;;  %v5076_v16 = vld [vmem:[%s6736_s1 + $0x178] sm:$0xff] }
  0x34   :  { %v5081_v15 = vld [vmem:[%s6736_s1 + $0x180] sm:$0xff]  ;;  %v5086_v14 = vld [vmem:[%s6736_s1 + $0x188] sm:$0xff]  ;;  %v5091_v13 = vld [vmem:[%s6736_s1 + $0x190] sm:$0xff] }
  0x35   :  { %v5096_v12 = vld [vmem:[%s6736_s1 + $0x198] sm:$0xff]  ;;  %v5101_v11 = vld [vmem:[%s6736_s1 + $0x1a0] sm:$0xff]  ;;  %v5106_v10 = vld [vmem:[%s6736_s1 + $0x1a8] sm:$0xff] }
  0x36   :  { %v5111_v9 = vld [vmem:[%s6736_s1 + $0x1b0] sm:$0xff]  ;;  %v5116_v8 = vld [vmem:[%s6736_s1 + $0x1b8] sm:$0xff]  ;;  %v5121_v7 = vld [vmem:[%s6736_s1 + $0x1c0] sm:$0xff] }
  0x37   :  { %v5126_v6 = vld [vmem:[%s6736_s1 + $0x1c8] sm:$0xff]  ;;  %v5131_v5 = vld [vmem:[%s6736_s1 + $0x1d0] sm:$0xff]  ;;  %v5136_v4 = vld [vmem:[%s6736_s1 + $0x1d8] sm:$0xff] }
  0x38   :  { %6804 = vst [vmem:[#allocation45_spill] sm:$0xff] %v5126_v6  ;;  %6805 = vst [vmem:[#allocation46_spill] sm:$0xff] %v5131_v5  ;;  %v5141_v3 = vld [vmem:[%s6736_s1 + $0x1e0] sm:$0xff]  ;;  %v5146_v2 = vld [vmem:[%s6736_s1 + $0x1e8] sm:$0xff] }
  0x39   :  { %6806 = vst [vmem:[#allocation47_spill] sm:$0xff] %v5136_v4  ;;  %6807 = vst [vmem:[#allocation48_spill] sm:$0xff] %v5141_v3  ;;  %v5151_v1 = vld [vmem:[%s6736_s1 + $0x1f0] sm:$0xff]  ;;  %v5156_v0 = vld [vmem:[%s6736_s1 + $0x1f8] sm:$0xff] }
  0x3a   :  { %6808 = vst [vmem:[#allocation49_spill] sm:$0xff] %v5146_v2  ;;  %6809 = vst [vmem:[#allocation50_spill] sm:$0xff] %v5151_v1 }
  0x3b   :  { %6810 = vst [vmem:[#allocation51_spill] sm:$0xff] %v5156_v0 }
  0x3c   :  { %332 = vsyncadd [#allocation14], 8192 }
  0x3d   :  { %4721 = dma.done.wait [#allocation14], 8192 }
  0x3e   :  { %4722 = vsyncadd [#allocation14], 4294959104  ;;  %v400_v3 = vld [vmem:[%s6737_s2] sm:$0xff]  ;;  %v401_v2 = vld [vmem:[%s6737_s2 + $0x8] sm:$0xff]  ;;  %vm412_vm0 = vcmask 326656  }
  0x3f   :  { %v402_v1 = vld [vmem:[%s6737_s2 + $0x10] sm:$0xff]  ;;  %v4550_v4 = vpack.c.bf16 %v401_v2, %v400_v3  ;;  %v403_v0 = vld [vmem:[%s6737_s2 + $0x18] sm:$0xff]  ;;  %4035 = vmatprep.mubr.msk.f32.mxu0 %vm412_vm0, %v4841_v17  ;;  %v404_v6 = vld [vmem:[%s6737_s2 + $0x20] sm:$0xff] }
  0x40   :  { %v4554_v5 = vpack.c.bf16 %v403_v0, %v402_v1  ;;  %v6811_v0 = vld [vmem:[#allocation45_spill] sm:$0xff]  ;;  %v6812_v1 = vld [vmem:[#allocation46_spill] sm:$0xff]  ;;  %v6813_v2 = vld [vmem:[#allocation47_spill] sm:$0xff] }
  0x41   :  { %4551 = vmatprep.subr.bf16.mxu0 %v4550_v4  ;;  %v6814_v3 = vld [vmem:[#allocation48_spill] sm:$0xff] }
  0x42   :  { %4553 = vmatpush3.bf16.msra.mxu0 %v4550_v4  ;;  %v6815_v4 = vld [vmem:[#allocation49_spill] sm:$0xff] }
  0x43   :  { %4555 = vmatprep.subr.bf16.mxu0 %v4554_v5 }
  0x46   :  { %4557 = vmatpush3.bf16.msra.mxu0 %v4554_v5  ;;  %v6816_v5 = vld [vmem:[#allocation50_spill] sm:$0xff] }
  0x47   :  { %4033 = vmatprep.subr.mxu0 %v404_v6 }
  0x4a   :  { %4034 = vmatpush3.msra.mxu0 %v404_v6  ;;  %v6817_v6 = vld [vmem:[#allocation51_spill] sm:$0xff] }
  0x4b   :  { %4036 = vmatmul.mubr.msk.f32.vlgmr.msra.gmra.mrb[0].mxu0 %vm412_vm0, %v4846_v18 }
  0x4c   :  { %4038 = vmatprep.mubr.msk.f32.mxu0 %vm412_vm0, %v4851_v19 }
  0x4f   :  { %4039 = vmatmul.mubr.msk.f32.gmra.mrb[2].mxu0 %vm412_vm0, %v4856_v20 }
  0x50   :  { %4041 = vmatprep.mubr.msk.f32.mxu0 %vm412_vm0, %v4861_v21 }
  0x53   :  { %4042 = vmatmul.mubr.msk.f32.gmra.mrb[4].mxu0 %vm412_vm0, %v4866_v22 }
  0x54   :  { %4044 = vmatprep.mubr.msk.f32.mxu0 %vm412_vm0, %v4871_v23 }
  0x57   :  { %4045 = vmatmul.mubr.msk.f32.gmra.mrb[6].mxu0 %vm412_vm0, %v4876_v24 }
  0x58   :  { %4047 = vmatprep.mubr.msk.f32.mxu0 %vm412_vm0, %v4881_v25 }
  0x5b   :  { %4048 = vmatmul.mubr.msk.f32.gmra.mrb[8].mxu0 %vm412_vm0, %v4886_v26 }
  0x5c   :  { %4050 = vmatprep.mubr.msk.f32.mxu0 %vm412_vm0, %v4891_v27 }
  0x5f   :  { %4051 = vmatmul.mubr.msk.f32.gmra.mrb[10].mxu0 %vm412_vm0, %v4896_v28 }
  0x60   :  { %4053 = vmatprep.mubr.msk.f32.mxu0 %vm412_vm0, %v4901_v29 }
  0x63   :  { %4054 = vmatmul.mubr.msk.f32.gmra.mrb[12].mxu0 %vm412_vm0, %v4906_v30 }
  0x64   :  { %4056 = vmatprep.mubr.msk.f32.mxu0 %vm412_vm0, %v4911_v31 }
  0x67   :  { %4057 = vmatmul.mubr.msk.f32.gmra.mrb[14].mxu0 %vm412_vm0, %v4916_v32 }
  0x68   :  { %4059 = vmatprep.mubr.msk.f32.mxu0 %vm412_vm0, %v4921_v33 }
  0x6b   :  { %4060 = vmatmul.mubr.msk.f32.gmra.mrb[16].mxu0 %vm412_vm0, %v4926_v34 }
  0x6c   :  { %4062 = vmatprep.mubr.msk.f32.mxu0 %vm412_vm0, %v4931_v35 }
  0x6f   :  { %4063 = vmatmul.mubr.msk.f32.gmra.mrb[18].mxu0 %vm412_vm0, %v4936_v36 }
  0x70   :  { %4065 = vmatprep.mubr.msk.f32.mxu0 %vm412_vm0, %v4941_v37 }
  0x73   :  { %4066 = vmatmul.mubr.msk.f32.gmra.mrb[20].mxu0 %vm412_vm0, %v4946_v38 }
  0x74   :  { %4068 = vmatprep.mubr.msk.f32.mxu0 %vm412_vm0, %v4951_v39 }
  0x77   :  { %4069 = vmatmul.mubr.msk.f32.gmra.mrb[22].mxu0 %vm412_vm0, %v4956_v40 }
  0x78   :  { %4071 = vmatprep.mubr.msk.f32.mxu0 %vm412_vm0, %v4961_v41 }
  0x7b   :  { %4072 = vmatmul.mubr.msk.f32.gmra.mrb[24].mxu0 %vm412_vm0, %v4966_v42 }
  0x7c   :  { %4074 = vmatprep.mubr.msk.f32.mxu0 %vm412_vm0, %v4971_v43 }
  0x7f   :  { %4075 = vmatmul.mubr.msk.f32.gmra.mrb[26].mxu0 %vm412_vm0, %v4976_v44 }
  0x80   :  { %4077 = vmatprep.mubr.msk.f32.mxu0 %vm412_vm0, %v4981_v45 }
  0x83   :  { %4078 = vmatmul.mubr.msk.f32.gmra.mrb[28].mxu0 %vm412_vm0, %v4986_v46 }
  0x84   :  { %4080 = vmatprep.mubr.msk.f32.mxu0 %vm412_vm0, %v4991_v47 }
  0x87   :  { %4081 = vmatmul.mubr.msk.f32.gmra.mrb[30].mxu0 %vm412_vm0, %v4996_v48 }
  0x88   :  { %4083 = vmatprep.mubr.msk.f32.mxu0 %vm412_vm0, %v5001_v49 }
  0x8b   :  { %4084 = vmatmul.mubr.msk.f32.gmra.mrb[32].mxu0 %vm412_vm0, %v5006_v50 }
  0x8c   :  { %4086 = vmatprep.mubr.msk.f32.mxu0 %vm412_vm0, %v5011_v51 }
  0x8f   :  { %4087 = vmatmul.mubr.msk.f32.gmra.mrb[34].mxu0 %vm412_vm0, %v5016_v52 }
  0x90   :  { %4089 = vmatprep.mubr.msk.f32.mxu0 %vm412_vm0, %v5021_v53 }
  0x93   :  { %4090 = vmatmul.mubr.msk.f32.gmra.mrb[36].mxu0 %vm412_vm0, %v5026_v54 }
  0x94   :  { %4092 = vmatprep.mubr.msk.f32.mxu0 %vm412_vm0, %v5031_v55 }
  0x97   :  { %4093 = vmatmul.mubr.msk.f32.gmra.mrb[38].mxu0 %vm412_vm0, %v5036_v56 }
  0x98   :  { %4095 = vmatprep.mubr.msk.f32.mxu0 %vm412_vm0, %v5041_v57 }
  0x9b   :  { %4096 = vmatmul.mubr.msk.f32.gmra.mrb[40].mxu0 %vm412_vm0, %v5046_v58 }
  0x9c   :  { %4098 = vmatprep.mubr.msk.f32.mxu0 %vm412_vm0, %v5051_v59 }
  0x9f   :  { %4099 = vmatmul.mubr.msk.f32.gmra.mrb[42].mxu0 %vm412_vm0, %v5056_v60 }
  0xa0   :  { %4101 = vmatprep.mubr.msk.f32.mxu0 %vm412_vm0, %v5061_v61 }
  0xa3   :  { %4102 = vmatmul.mubr.msk.f32.gmra.mrb[44].mxu0 %vm412_vm0, %v5066_v62 }
  0xa4   :  { %4104 = vmatprep.mubr.msk.f32.mxu0 %vm412_vm0, %v5071_v63 }
  0xa7   :  { %4105 = vmatmul.mubr.msk.f32.gmra.mrb[46].mxu0 %vm412_vm0, %v5076_v16 }
  0xa8   :  { %4107 = vmatprep.mubr.msk.f32.mxu0 %vm412_vm0, %v5081_v15 }
  0xab   :  { %4108 = vmatmul.mubr.msk.f32.gmra.mrb[48].mxu0 %vm412_vm0, %v5086_v14 }
  0xac   :  { %4110 = vmatprep.mubr.msk.f32.mxu0 %vm412_vm0, %v5091_v13 }
  0xaf   :  { %4111 = vmatmul.mubr.msk.f32.gmra.mrb[50].mxu0 %vm412_vm0, %v5096_v12 }
  0xb0   :  { %4113 = vmatprep.mubr.msk.f32.mxu0 %vm412_vm0, %v5101_v11 }
  0xb3   :  { %4114 = vmatmul.mubr.msk.f32.gmra.mrb[52].mxu0 %vm412_vm0, %v5106_v10 }
  0xb4   :  { %4116 = vmatprep.mubr.msk.f32.mxu0 %vm412_vm0, %v5111_v9 }
  0xb7   :  { %4117 = vmatmul.mubr.msk.f32.gmra.mrb[54].mxu0 %vm412_vm0, %v5116_v8 }
  0xb8   :  { %4119 = vmatprep.mubr.msk.f32.mxu0 %vm412_vm0, %v5121_v7  ;;  %v5304_v7 = vld [vmem:[%s6738_s3] ss:$0 sm:$0xff] }
  0xbb   :  { %4120 = vmatmul.mubr.msk.f32.gmra.mrb[56].mxu0 %vm412_vm0, %v6811_v0 }
  0xbc   :  { %4122 = vmatprep.mubr.msk.f32.mxu0 %vm412_vm0, %v6812_v1 }
  0xbf   :  { %4123 = vmatmul.mubr.msk.f32.gmra.mrb[58].mxu0 %vm412_vm0, %v6813_v2 }
  0xc0   :  { %4125 = vmatprep.mubr.msk.f32.mxu0 %vm412_vm0, %v6814_v3 }
  0xc3   :  { %4126 = vmatmul.mubr.msk.f32.gmra.mrb[60].mxu0 %vm412_vm0, %v6815_v4 }
  0xc4   :  { %4128 = vmatprep.mubr.msk.f32.mxu0 %vm412_vm0, %v6816_v5 }
  0xc7   :  { %4129 = vmatmul.mubr.msk.f32.gmra.mrb[62].mxu0 %vm412_vm0, %v6817_v6 }
 0x11e   :  { %v4037_v8 = vpop.f32.mrb[0].mxu0 }
 0x11f   :  { %v5307_v9 = vadd.f32 %v4037_v8, %v5304_v7  ;;  %v671_v10 = vpop.f32.mrb[1].mxu0 }
 0x120   :  { %v5310_v11 = vadd.f32 %v5304_v7, %v671_v10 }
 0x122   :  { %v4040_v14 = vpop.f32.mrb[2].mxu0 }
 0x123   :  { %v5315_v15 = vadd.f32 %v4040_v14, %v5304_v7  ;;  %v681_v17 = vpop.f32.mrb[3].mxu0 }
 0x124   :  { %v5318_v18 = vadd.f32 %v5304_v7, %v681_v17 }
 0x126   :  { %v4043_v21 = vpop.f32.mrb[4].mxu0 }
 0x127   :  { %v5323_v22 = vadd.f32 %v4043_v21, %v5304_v7  ;;  %v691_v23 = vpop.f32.mrb[5].mxu0 }
 0x128   :  { %v5326_v24 = vadd.f32 %v5304_v7, %v691_v23 }
 0x12a   :  { %v4046_v27 = vpop.f32.mrb[6].mxu0 }
 0x12b   :  { %v5331_v28 = vadd.f32 %v4046_v27, %v5304_v7  ;;  %v701_v29 = vpop.f32.mrb[7].mxu0 }
 0x12c   :  { %v5334_v30 = vadd.f32 %v5304_v7, %v701_v29 }
 0x12e   :  { %v4049_v33 = vpop.f32.mrb[8].mxu0 }
 0x12f   :  { %v5339_v34 = vadd.f32 %v4049_v33, %v5304_v7  ;;  %v711_v35 = vpop.f32.mrb[9].mxu0 }
 0x130   :  { %v5342_v36 = vadd.f32 %v5304_v7, %v711_v35 }
 0x132   :  { %v4052_v39 = vpop.f32.mrb[10].mxu0 }
 0x133   :  { %v5347_v40 = vadd.f32 %v4052_v39, %v5304_v7  ;;  %v721_v41 = vpop.f32.mrb[11].mxu0 }
 0x134   :  { %v5350_v42 = vadd.f32 %v5304_v7, %v721_v41 }
 0x136   :  { %v4055_v45 = vpop.f32.mrb[12].mxu0 }
 0x137   :  { %v5355_v46 = vadd.f32 %v4055_v45, %v5304_v7  ;;  %v731_v47 = vpop.f32.mrb[13].mxu0 }
 0x138   :  { %v5358_v48 = vadd.f32 %v5304_v7, %v731_v47 }
 0x13a   :  { %v4058_v51 = vpop.f32.mrb[14].mxu0 }
 0x13b   :  { %v5363_v52 = vadd.f32 %v4058_v51, %v5304_v7  ;;  %v741_v53 = vpop.f32.mrb[15].mxu0 }
 0x13c   :  { %v5366_v54 = vadd.f32 %v5304_v7, %v741_v53 }
 0x13e   :  { %v4061_v57 = vpop.f32.mrb[16].mxu0 }
 0x13f   :  { %v5371_v58 = vadd.f32 %v4061_v57, %v5304_v7  ;;  %v751_v59 = vpop.f32.mrb[17].mxu0 }
 0x140   :  { %v5374_v60 = vadd.f32 %v5304_v7, %v751_v59 }
 0x142   :  { %v4064_v63 = vpop.f32.mrb[18].mxu0 }
 0x143   :  { %v5379_v16 = vadd.f32 %v4064_v63, %v5304_v7  ;;  %v761_v0 = vpop.f32.mrb[19].mxu0 }
 0x144   :  { %v5382_v1 = vadd.f32 %v5304_v7, %v761_v0 }
 0x146   :  { %v4067_v4 = vpop.f32.mrb[20].mxu0 }
 0x147   :  { %v5387_v5 = vadd.f32 %v4067_v4, %v5304_v7  ;;  %v771_v6 = vpop.f32.mrb[21].mxu0 }
 0x148   :  { %v5390_v8 = vadd.f32 %v5304_v7, %v771_v6 }
 0x14a   :  { %v4070_v17 = vpop.f32.mrb[22].mxu0 }
 0x14b   :  { %v5395_v21 = vadd.f32 %v4070_v17, %v5304_v7  ;;  %v781_v23 = vpop.f32.mrb[23].mxu0 }
 0x14c   :  { %v5398_v27 = vadd.f32 %v5304_v7, %v781_v23 }
 0x14e   :  { %v4073_v35 = vpop.f32.mrb[24].mxu0 }
 0x14f   :  { %v5403_v39 = vadd.f32 %v4073_v35, %v5304_v7  ;;  %v791_v41 = vpop.f32.mrb[25].mxu0 }
 0x150   :  { %v5406_v45 = vadd.f32 %v5304_v7, %v791_v41 }
 0x152   :  { %v4076_v53 = vpop.f32.mrb[26].mxu0 }
 0x153   :  { %v5411_v57 = vadd.f32 %v4076_v53, %v5304_v7  ;;  %v801_v59 = vpop.f32.mrb[27].mxu0 }
 0x154   :  { %v5414_v63 = vadd.f32 %v5304_v7, %v801_v59 }
 0x156   :  { %v4079_v6 = vpop.f32.mrb[28].mxu0 }
 0x157   :  { %v5419_v17 = vadd.f32 %v4079_v6, %v5304_v7  ;;  %v811_v23 = vpop.f32.mrb[29].mxu0 }
 0x158   :  { %v5422_v35 = vadd.f32 %v5304_v7, %v811_v23 }
 0x15a   :  { %v4082_v47 = vpop.f32.mrb[30].mxu0 }
 0x15b   :  { %v5427_v59 = vadd.f32 %v4082_v47, %v5304_v7  ;;  %v821_v51 = vpop.f32.mrb[31].mxu0 }
 0x15c   :  { %v5430_v0 = vadd.f32 %v5304_v7, %v821_v51 }
 0x15e   :  { %v4085_v29 = vpop.f32.mrb[32].mxu0 }
 0x15f   :  { %v5435_v23 = vadd.f32 %v4085_v29, %v5304_v7  ;;  %v831_v33 = vpop.f32.mrb[33].mxu0 }
 0x160   :  { %v5438_v41 = vadd.f32 %v5304_v7, %v831_v33 }
 0x162   :  { %v4088_v10 = vpop.f32.mrb[34].mxu0 }
 0x163   :  { %v5443_v51 = vadd.f32 %v4088_v10, %v5304_v7  ;;  %v841_v14 = vpop.f32.mrb[35].mxu0 }
 0x164   :  { %v5446_v4 = vadd.f32 %v5304_v7, %v841_v14 }
 0x166   :  { %v4091_v2 = vpop.f32.mrb[36].mxu0 }
 0x167   :  { %v5451_v33 = vadd.f32 %v4091_v2, %v5304_v7  ;;  %v851_v3 = vpop.f32.mrb[37].mxu0 }
 0x168   :  { %v5454_v53 = vadd.f32 %v5304_v7, %v851_v3 }
 0x16a   :  { %v4094_v61 = vpop.f32.mrb[38].mxu0 }
 0x16b   :  { %v5459_v14 = vadd.f32 %v4094_v61, %v5304_v7  ;;  %v861_v62 = vpop.f32.mrb[39].mxu0 }
 0x16c   :  { %v5462_v6 = vadd.f32 %v5304_v7, %v861_v62 }
 0x16e   :  { %v4097_v55 = vpop.f32.mrb[40].mxu0 }
 0x16f   :  { %v5467_v3 = vadd.f32 %v4097_v55, %v5304_v7  ;;  %v871_v56 = vpop.f32.mrb[41].mxu0 }
 0x170   :  { %v5470_v47 = vadd.f32 %v5304_v7, %v871_v56 }
 0x172   :  { %v4100_v49 = vpop.f32.mrb[42].mxu0 }
 0x173   :  { %v5475_v62 = vadd.f32 %v4100_v49, %v5304_v7  ;;  %v881_v50 = vpop.f32.mrb[43].mxu0 }
 0x174   :  { %v5478_v29 = vadd.f32 %v5304_v7, %v881_v50 }
 0x176   :  { %v4103_v43 = vpop.f32.mrb[44].mxu0 }
 0x177   :  { %v5483_v56 = vadd.f32 %v4103_v43, %v5304_v7  ;;  %v891_v44 = vpop.f32.mrb[45].mxu0 }
 0x178   :  { %v5486_v10 = vadd.f32 %v5304_v7, %v891_v44 }
 0x17a   :  { %v4106_v37 = vpop.f32.mrb[46].mxu0 }
 0x17b   :  { %v5491_v50 = vadd.f32 %v4106_v37, %v5304_v7  ;;  %v901_v38 = vpop.f32.mrb[47].mxu0 }
 0x17c   :  { %v5494_v2 = vadd.f32 %v5304_v7, %v901_v38 }
 0x17e   :  { %v4109_v31 = vpop.f32.mrb[48].mxu0 }
 0x17f   :  { %v5499_v44 = vadd.f32 %v4109_v31, %v5304_v7  ;;  %v911_v32 = vpop.f32.mrb[49].mxu0 }
 0x180   :  { %v5502_v61 = vadd.f32 %v5304_v7, %v911_v32 }
 0x182   :  { %v4112_v25 = vpop.f32.mrb[50].mxu0 }
 0x183   :  { %v5507_v38 = vadd.f32 %v4112_v25, %v5304_v7  ;;  %v921_v26 = vpop.f32.mrb[51].mxu0 }
 0x184   :  { %v5510_v55 = vadd.f32 %v5304_v7, %v921_v26 }
 0x185   :  { %6818 = vst [vmem:[#allocation52_spill] sm:$0xff] %v5507_v38 }
 0x186   :  { %6819 = vst [vmem:[#allocation53_spill] sm:$0xff] %v5510_v55  ;;  %v4115_v19 = vpop.f32.mrb[52].mxu0 }
 0x187   :  { %v5515_v32 = vadd.f32 %v4115_v19, %v5304_v7  ;;  %v931_v20 = vpop.f32.mrb[53].mxu0 }
 0x188   :  { %v5518_v49 = vadd.f32 %v5304_v7, %v931_v20 }
 0x189   :  { %6820 = vst [vmem:[#allocation54_spill] sm:$0xff] %v5515_v32 }
 0x18a   :  { %6821 = vst [vmem:[#allocation55_spill] sm:$0xff] %v5518_v49  ;;  %v4118_v12 = vpop.f32.mrb[54].mxu0 }
 0x18b   :  { %v5523_v26 = vadd.f32 %v4118_v12, %v5304_v7  ;;  %v941_v13 = vpop.f32.mrb[55].mxu0 }
 0x18c   :  { %v5526_v43 = vadd.f32 %v5304_v7, %v941_v13 }
 0x18d   :  { %6822 = vst [vmem:[#allocation56_spill] sm:$0xff] %v5523_v26 }
 0x18e   :  { %6823 = vst [vmem:[#allocation57_spill] sm:$0xff] %v5526_v43  ;;  %v4121_v38 = vpop.f32.mrb[56].mxu0 }
 0x18f   :  { %v5531_v20 = vadd.f32 %v4121_v38, %v5304_v7  ;;  %v951_v55 = vpop.f32.mrb[57].mxu0 }
 0x190   :  { %v5534_v37 = vadd.f32 %v5304_v7, %v951_v55 }
 0x191   :  { %6824 = vst [vmem:[#allocation58_spill] sm:$0xff] %v5531_v20 }
 0x192   :  { %6825 = vst [vmem:[#allocation59_spill] sm:$0xff] %v5534_v37  ;;  %v4124_v32 = vpop.f32.mrb[58].mxu0 }
 0x193   :  { %v5539_v13 = vadd.f32 %v4124_v32, %v5304_v7  ;;  %v961_v49 = vpop.f32.mrb[59].mxu0 }
 0x194   :  { %v5542_v31 = vadd.f32 %v5304_v7, %v961_v49 }
 0x195   :  { %6826 = vst [vmem:[#allocation60_spill] sm:$0xff] %v5539_v13 }
 0x196   :  { %6827 = vst [vmem:[#allocation61_spill] sm:$0xff] %v5542_v31  ;;  %v4127_v26 = vpop.f32.mrb[60].mxu0 }
 0x197   :  { %v5547_v55 = vadd.f32 %v4127_v26, %v5304_v7  ;;  %v971_v43 = vpop.f32.mrb[61].mxu0 }
 0x198   :  { %v5550_v25 = vadd.f32 %v5304_v7, %v971_v43 }
 0x199   :  { %6828 = vst [vmem:[#allocation62_spill] sm:$0xff] %v5547_v55 }
 0x19a   :  { %6829 = vst [vmem:[#allocation63_spill] sm:$0xff] %v5550_v25  ;;  %v4130_v20 = vpop.f32.mrb[62].mxu0 }
 0x19b   :  { %v5555_v49 = vadd.f32 %v4130_v20, %v5304_v7  ;;  %v981_v37 = vpop.f32.mrb[63].mxu0 }
 0x19c   :  { %v5558_v19 = vadd.f32 %v5304_v7, %v981_v37 }
 0x19d   :  { %6830 = vst [vmem:[#allocation64_spill] sm:$0xff] %v5555_v49 }
 0x19e   :  { %6831 = vst [vmem:[#allocation65_spill] sm:$0xff] %v5558_v19 }
 0x19f   :  { %4723 = dma.done.wait [#allocation5], 2048 }
 0x1a0   :  { %4724 = vsyncadd [#allocation5], 4294965248 }
 0x1a1   :  { %4725 = dma.done.wait [#allocation5 + $0x2], 16 }
 0x1a2   :  { %4726 = vsyncadd [#allocation5 + $0x2], 4294967280  ;;  %s3648_s3 = sld [smem:[#allocation7 + $0x1]] }
 0x1a8   :  { %s3649_s17 = sshll.u32 %s3648_s3, 7 }
 0x1a9   :  { %s3510_s20 = scalar_lea.vmem %s6739_s4, %s3649_s17 }
 0x1aa   :  { %v5565_v43 = vld [vmem:[%s3510_s20 + $0x180] sm:$0xff]  ;;  %v5567_v20 = vld [vmem:[%s3510_s20 + $0x188] sm:$0xff]  ;;  %v5569_v7 = vld [vmem:[%s3510_s20 + $0x190] sm:$0xff] }
 0x1ab   :  { %6832 = vst [vmem:[#allocation66_spill] sm:$0xff] %v5565_v43  ;;  %6833 = vst [vmem:[#allocation67_spill] sm:$0xff] %v5567_v20  ;;  %v5571_v37 = vld [vmem:[%s3510_s20 + $0x198] sm:$0xff]  ;;  %v5573_v38 = vld [vmem:[%s3510_s20 + $0x1a0] sm:$0xff] }
 0x1ac   :  { %6834 = vst [vmem:[#allocation68_spill] sm:$0xff] %v5569_v7  ;;  %6835 = vst [vmem:[#allocation69_spill] sm:$0xff] %v5571_v37  ;;  %v5575_v26 = vld [vmem:[%s3510_s20 + $0x1a8] sm:$0xff]  ;;  %v5577_v12 = vld [vmem:[%s3510_s20 + $0x1b0] sm:$0xff] }
 0x1ad   :  { %6836 = vst [vmem:[#allocation70_spill] sm:$0xff] %v5573_v38  ;;  %6837 = vst [vmem:[#allocation71_spill] sm:$0xff] %v5575_v26  ;;  %v5579_v32 = vld [vmem:[%s3510_s20 + $0x1b8] sm:$0xff]  ;;  %v5581_v49 = vld [vmem:[%s3510_s20 + $0x1c0] sm:$0xff] }
 0x1ae   :  { %6838 = vst [vmem:[#allocation72_spill] sm:$0xff] %v5577_v12  ;;  %6839 = vst [vmem:[#allocation73_spill] sm:$0xff] %v5579_v32  ;;  %v5583_v19 = vld [vmem:[%s3510_s20 + $0x1c8] sm:$0xff]  ;;  %v5585_v55 = vld [vmem:[%s3510_s20 + $0x1d0] sm:$0xff] }
 0x1af   :  { %6840 = vst [vmem:[#allocation74_spill] sm:$0xff] %v5581_v49  ;;  %6841 = vst [vmem:[#allocation75_spill] sm:$0xff] %v5583_v19  ;;  %v5587_v43 = vld [vmem:[%s3510_s20 + $0x1d8] sm:$0xff]  ;;  %v5589_v20 = vld [vmem:[%s3510_s20 + $0x1e0] sm:$0xff] }
 0x1b0   :  { %6842 = vst [vmem:[#allocation76_spill] sm:$0xff] %v5585_v55  ;;  %6843 = vst [vmem:[#allocation77_spill] sm:$0xff] %v5587_v43  ;;  %v5591_v7 = vld [vmem:[%s3510_s20 + $0x1e8] sm:$0xff]  ;;  %v5593_v37 = vld [vmem:[%s3510_s20 + $0x1f0] sm:$0xff] }
 0x1b1   :  { %6844 = vst [vmem:[#allocation78_spill] sm:$0xff] %v5589_v20  ;;  %6845 = vst [vmem:[#allocation79_spill] sm:$0xff] %v5591_v7  ;;  %v5595_v38 = vld [vmem:[%s3510_s20 + $0x1f8] sm:$0xff] }
 0x1b2   :  { %6846 = vst [vmem:[#allocation80_spill] sm:$0xff] %v5593_v37  ;;  %6847 = vst [vmem:[#allocation81_spill] sm:$0xff] %v5595_v38 }
 0x1b3   :  { %1201 = vsyncadd [#allocation5 + $0x1], 2048  ;;  %s3512_s0 = scalar_lea.vmem %s6740_s5, %s3648_s3 }
 0x1b4   :  { %v3668_v49 = vld [vmem:[%s3512_s0 + $0x3] sm:$0x1] }
 0x1b5   :  { %1223 = vst [vmem:[#allocation4 + $0x1] sm:$0x1] %v3668_v49 }
 0x1b6   :  { %1248 = vsyncadd [#allocation5 + $0x3], 16  ;;  %v6848_v19 = vld [vmem:[#allocation29_spill] sm:$0xff]  ;;  %v6849_v55 = vld [vmem:[#allocation30_spill] sm:$0xff]  ;;  %v6852_v7 = vmax.f32 %v5310_v11, 0.0 }
 0x1b7   :  { %v4558_v32 = vpack.c.bf16 %v6849_v55, %v6848_v19  ;;  %v6850_v43 = vld [vmem:[#allocation31_spill] sm:$0xff]  ;;  %v6851_v12 = vld [vmem:[#allocation32_spill] sm:$0xff]  ;;  %v6853_v38 = vld [vmem:[#allocation33_spill] sm:$0xff] }
 0x1b8   :  { %v4562_v20 = vpack.c.bf16 %v6851_v12, %v6850_v43  ;;  %4163 = vmatprep.mubr.f32.mxu1 %v6852_v7  ;;  %v6854_v37 = vld [vmem:[#allocation34_spill] sm:$0xff]  ;;  %v6855_v25 = vld [vmem:[#allocation35_spill] sm:$0xff]  ;;  %v6856_v49 = vld [vmem:[#allocation36_spill] sm:$0xff] }
 0x1b9   :  { %4559 = vmatprep.subr.bf16.mxu1 %v4558_v32  ;;  %v4566_v26 = vpack.c.bf16 %v6854_v37, %v6853_v38  ;;  %v4570_v13 = vpack.c.bf16 %v6856_v49, %v6855_v25  ;;  %v6857_v19 = vld [vmem:[#allocation37_spill] sm:$0xff]  ;;  %v6858_v55 = vld [vmem:[#allocation38_spill] sm:$0xff]  ;;  %v6859_v11 = vld [vmem:[#allocation39_spill] sm:$0xff]  ;;  %v6868_v49 = vmax.f32 %v5326_v24, 0.0  ;;  %v6875_v24 = vmax.f32 %v5347_v40, 0.0 }
 0x1ba   :  { %4561 = vmatpush3.bf16.msra.mxu1 %v4558_v32  ;;  %v4574_v31 = vpack.c.bf16 %v6858_v55, %v6857_v19  ;;  %v6860_v12 = vld [vmem:[#allocation40_spill] sm:$0xff]  ;;  %v6861_v32 = vld [vmem:[#allocation41_spill] sm:$0xff]  ;;  %v6862_v7 = vld [vmem:[#allocation42_spill] sm:$0xff]  ;;  %v6869_v19 = vmax.f32 %v5323_v22, 0.0  ;;  %v6870_v55 = vmax.f32 %v5334_v30, 0.0  ;;  %v6876_v22 = vmax.f32 %v5358_v48, 0.0 }
 0x1bb   :  { %4563 = vmatprep.subr.bf16.mxu1 %v4562_v20  ;;  %v4578_v43 = vpack.c.bf16 %v6860_v12, %v6859_v11  ;;  %v4582_v38 = vpack.c.bf16 %v6862_v7, %v6861_v32  ;;  %v6864_v37 = vld [vmem:[#allocation44_spill] sm:$0xff]  ;;  %v6871_v11 = vmax.f32 %v5331_v28, 0.0  ;;  %v6877_v30 = vmax.f32 %v5355_v46, 0.0 }
 0x1bc   :  { %v6878_v28 = vmax.f32 %v5366_v54, 0.0  ;;  %v6882_v40 = vmax.f32 %v5382_v1, 0.0  ;;  %v6883_v48 = vmax.f32 %v5379_v16, 0.0  ;;  %v6884_v46 = vmax.f32 %v5390_v8, 0.0 }
 0x1bd   :  { %v6885_v54 = vmax.f32 %v5387_v5, 0.0  ;;  %v6889_v1 = vmax.f32 %v5403_v39, 0.0  ;;  %v6890_v16 = vmax.f32 %v5414_v63, 0.0  ;;  %v6891_v8 = vmax.f32 %v5411_v57, 0.0 }
 0x1be   :  { %4565 = vmatpush3.bf16.msra.mxu1 %v4562_v20  ;;  %v6863_v20 = vld [vmem:[#allocation43_spill] sm:$0xff]  ;;  %v6892_v5 = vmax.f32 %v5422_v35, 0.0  ;;  %v6896_v39 = vmax.f32 %v5438_v41, 0.0  ;;  %v6897_v63 = vmax.f32 %v5435_v23, 0.0  ;;  %v6898_v57 = vmax.f32 %v5446_v4, 0.0 }
 0x1bf   :  { %4567 = vmatprep.subr.bf16.mxu1 %v4566_v26  ;;  %v4586_v25 = vpack.c.bf16 %v6864_v37, %v6863_v20  ;;  %v6899_v35 = vmax.f32 %v5443_v51, 0.0  ;;  %v6903_v41 = vmax.f32 %v5459_v14, 0.0  ;;  %v6904_v23 = vmax.f32 %v5470_v47, 0.0 }
 0x1c0   :  { %v6905_v4 = vmax.f32 %v5467_v3, 0.0  ;;  %v6906_v51 = vmax.f32 %v5478_v29, 0.0  ;;  %v6910_v14 = vmax.f32 %v5494_v2, 0.0  ;;  %v6911_v47 = vmax.f32 %v5491_v50, 0.0  ;;  %v6920_v2 = vld [vmem:[#allocation54_spill] sm:$0xff]  ;;  %v6922_v50 = vld [vmem:[#allocation57_spill] sm:$0xff] }
 0x1c1   :  { %v6912_v3 = vmax.f32 %v5502_v61, 0.0  ;;  %v6913_v29 = vmax.f32 %v5499_v44, 0.0  ;;  %v6921_v7 = vmax.f32 %v6920_v2, 0.0  ;;  %v6924_v61 = vld [vmem:[#allocation56_spill] sm:$0xff]  ;;  %v6926_v44 = vld [vmem:[#allocation59_spill] sm:$0xff] }
 0x1c2   :  { %4569 = vmatpush3.bf16.msra.mxu1 %v4566_v26  ;;  %v6865_v26 = vmax.f32 %v5307_v9, 0.0  ;;  %v6872_v9 = vmax.f32 %v5342_v36, 0.0  ;;  %v6879_v36 = vmax.f32 %v5363_v52, 0.0  ;;  %v6886_v52 = vmax.f32 %v5398_v27, 0.0 }
 0x1c3   :  { %4571 = vmatprep.subr.bf16.mxu1 %v4570_v13  ;;  %v6893_v27 = vmax.f32 %v5419_v17, 0.0  ;;  %v6900_v17 = vmax.f32 %v5454_v53, 0.0  ;;  %v6907_v53 = vmax.f32 %v5475_v62, 0.0  ;;  %v6914_v62 = vld [vmem:[#allocation53_spill] sm:$0xff]  ;;  %v6925_v20 = vmax.f32 %v6924_v61, 0.0 }
 0x1c4   :  { %v6915_v12 = vmax.f32 %v6914_v62, 0.0  ;;  %v6927_v37 = vmax.f32 %v6926_v44, 0.0 }
 0x1c6   :  { %4573 = vmatpush3.bf16.msra.mxu1 %v4570_v13  ;;  %v6866_v13 = vmax.f32 %v5318_v18, 0.0  ;;  %v6873_v18 = vmax.f32 %v5339_v34, 0.0  ;;  %v6880_v34 = vmax.f32 %v5374_v60, 0.0  ;;  %v6887_v60 = vmax.f32 %v5395_v21, 0.0 }
 0x1c7   :  { %4575 = vmatprep.subr.bf16.mxu1 %v4574_v31  ;;  %v6894_v21 = vmax.f32 %v5430_v0, 0.0  ;;  %v6901_v0 = vmax.f32 %v5451_v33, 0.0  ;;  %v6908_v33 = vmax.f32 %v5486_v10, 0.0  ;;  %v6916_v10 = vld [vmem:[#allocation52_spill] sm:$0xff] }
 0x1ca   :  { %4577 = vmatpush3.bf16.msra.mxu1 %v4574_v31  ;;  %v6867_v31 = vmax.f32 %v5315_v15, 0.0  ;;  %v6874_v15 = vmax.f32 %v5350_v42, 0.0  ;;  %v6881_v42 = vmax.f32 %v5371_v58, 0.0  ;;  %v6888_v58 = vmax.f32 %v5406_v45, 0.0 }
 0x1cb   :  { %4579 = vmatprep.subr.bf16.mxu1 %v4578_v43  ;;  %v6895_v45 = vmax.f32 %v5427_v59, 0.0  ;;  %v6902_v59 = vmax.f32 %v5462_v6, 0.0  ;;  %v6909_v6 = vmax.f32 %v5483_v56, 0.0  ;;  %v6918_v56 = vld [vmem:[#allocation55_spill] sm:$0xff] }
 0x1cc   :  { %v6919_v32 = vmax.f32 %v6918_v56, 0.0 }
 0x1ce   :  { %4581 = vmatpush3.bf16.msra.mxu1 %v4578_v43  ;;  %v6917_v43 = vmax.f32 %v6916_v10, 0.0 }
 0x1cf   :  { %4583 = vmatprep.subr.bf16.mxu1 %v4582_v38 }
 0x1d2   :  { %4585 = vmatpush3.bf16.msra.mxu1 %v4582_v38  ;;  %v6923_v38 = vmax.f32 %v6922_v50, 0.0 }
 0x1d3   :  { %4587 = vmatprep.subr.bf16.mxu1 %v4586_v25 }
 0x1d6   :  { %4589 = vmatpush3.bf16.msra.mxu1 %v4586_v25  ;;  %v6928_v25 = vld [vmem:[#allocation58_spill] sm:$0xff] }
 0x1d9   :  { %4164 = vmatmul.mubr.f32.vlgmr.msra.gmra.mrb[0].mxu1 %v6865_v26  ;;  %v6929_v26 = vmax.f32 %v6928_v25, 0.0 }
 0x1da   :  { %4166 = vmatprep.mubr.f32.mxu1 %v6866_v13  ;;  %v6930_v13 = vld [vmem:[#allocation61_spill] sm:$0xff] }
 0x1dd   :  { %4167 = vmatmul.mubr.f32.gmra.mrb[2].mxu1 %v6867_v31  ;;  %v6931_v31 = vmax.f32 %v6930_v13, 0.0 }
 0x1de   :  { %4169 = vmatprep.mubr.f32.mxu1 %v6868_v49  ;;  %v6932_v49 = vld [vmem:[#allocation60_spill] sm:$0xff] }
 0x1e1   :  { %4170 = vmatmul.mubr.f32.gmra.mrb[4].mxu1 %v6869_v19  ;;  %v6933_v19 = vmax.f32 %v6932_v49, 0.0 }
 0x1e2   :  { %4172 = vmatprep.mubr.f32.mxu1 %v6870_v55  ;;  %v6934_v55 = vld [vmem:[#allocation63_spill] sm:$0xff] }
 0x1e5   :  { %4173 = vmatmul.mubr.f32.gmra.mrb[6].mxu1 %v6871_v11  ;;  %v6935_v11 = vmax.f32 %v6934_v55, 0.0 }
 0x1e6   :  { %4175 = vmatprep.mubr.f32.mxu1 %v6872_v9  ;;  %v6936_v9 = vld [vmem:[#allocation62_spill] sm:$0xff] }
 0x1e9   :  { %4176 = vmatmul.mubr.f32.gmra.mrb[8].mxu1 %v6873_v18  ;;  %v6937_v18 = vmax.f32 %v6936_v9, 0.0 }
 0x1ea   :  { %4178 = vmatprep.mubr.f32.mxu1 %v6874_v15  ;;  %v6938_v15 = vld [vmem:[#allocation65_spill] sm:$0xff] }
 0x1ed   :  { %4179 = vmatmul.mubr.f32.gmra.mrb[10].mxu1 %v6875_v24  ;;  %v6939_v24 = vmax.f32 %v6938_v15, 0.0 }
 0x1ee   :  { %4181 = vmatprep.mubr.f32.mxu1 %v6876_v22  ;;  %v6940_v22 = vld [vmem:[#allocation64_spill] sm:$0xff] }
 0x1f1   :  { %4182 = vmatmul.mubr.f32.gmra.mrb[12].mxu1 %v6877_v30  ;;  %v6941_v30 = vmax.f32 %v6940_v22, 0.0 }
 0x1f2   :  { %4184 = vmatprep.mubr.f32.mxu1 %v6878_v28  ;;  %v5744_v28 = vld [vmem:[#allocation4] ss:$0 sm:$0xff] }
 0x1f5   :  { %4185 = vmatmul.mubr.f32.gmra.mrb[14].mxu1 %v6879_v36 }
 0x1f6   :  { %4187 = vmatprep.mubr.f32.mxu1 %v6880_v34 }
 0x1f9   :  { %4188 = vmatmul.mubr.f32.gmra.mrb[16].mxu1 %v6881_v42 }
 0x1fa   :  { %4190 = vmatprep.mubr.f32.mxu1 %v6882_v40 }
 0x1fd   :  { %4191 = vmatmul.mubr.f32.gmra.mrb[18].mxu1 %v6883_v48 }
 0x1fe   :  { %4193 = vmatprep.mubr.f32.mxu1 %v6884_v46 }
 0x201   :  { %4194 = vmatmul.mubr.f32.gmra.mrb[20].mxu1 %v6885_v54 }
 0x202   :  { %4196 = vmatprep.mubr.f32.mxu1 %v6886_v52 }
 0x205   :  { %4197 = vmatmul.mubr.f32.gmra.mrb[22].mxu1 %v6887_v60 }
 0x206   :  { %4199 = vmatprep.mubr.f32.mxu1 %v6888_v58 }
 0x209   :  { %4200 = vmatmul.mubr.f32.gmra.mrb[24].mxu1 %v6889_v1 }
 0x20a   :  { %4202 = vmatprep.mubr.f32.mxu1 %v6890_v16 }
 0x20d   :  { %4203 = vmatmul.mubr.f32.gmra.mrb[26].mxu1 %v6891_v8 }
 0x20e   :  { %4205 = vmatprep.mubr.f32.mxu1 %v6892_v5 }
 0x211   :  { %4206 = vmatmul.mubr.f32.gmra.mrb[28].mxu1 %v6893_v27 }
 0x212   :  { %4208 = vmatprep.mubr.f32.mxu1 %v6894_v21 }
 0x215   :  { %4209 = vmatmul.mubr.f32.gmra.mrb[30].mxu1 %v6895_v45 }
 0x216   :  { %4211 = vmatprep.mubr.f32.mxu1 %v6896_v39 }
 0x219   :  { %4212 = vmatmul.mubr.f32.gmra.mrb[32].mxu1 %v6897_v63 }
 0x21a   :  { %4214 = vmatprep.mubr.f32.mxu1 %v6898_v57 }
 0x21d   :  { %4215 = vmatmul.mubr.f32.gmra.mrb[34].mxu1 %v6899_v35 }
 0x21e   :  { %4217 = vmatprep.mubr.f32.mxu1 %v6900_v17 }
 0x221   :  { %4218 = vmatmul.mubr.f32.gmra.mrb[36].mxu1 %v6901_v0 }
 0x222   :  { %4220 = vmatprep.mubr.f32.mxu1 %v6902_v59 }
 0x225   :  { %4221 = vmatmul.mubr.f32.gmra.mrb[38].mxu1 %v6903_v41 }
 0x226   :  { %4223 = vmatprep.mubr.f32.mxu1 %v6904_v23 }
 0x229   :  { %4224 = vmatmul.mubr.f32.gmra.mrb[40].mxu1 %v6905_v4 }
 0x22a   :  { %4226 = vmatprep.mubr.f32.mxu1 %v6906_v51 }
 0x22d   :  { %4227 = vmatmul.mubr.f32.gmra.mrb[42].mxu1 %v6907_v53 }
 0x22e   :  { %4229 = vmatprep.mubr.f32.mxu1 %v6908_v33 }
 0x231   :  { %4230 = vmatmul.mubr.f32.gmra.mrb[44].mxu1 %v6909_v6 }
 0x232   :  { %4232 = vmatprep.mubr.f32.mxu1 %v6910_v14 }
 0x235   :  { %4233 = vmatmul.mubr.f32.gmra.mrb[46].mxu1 %v6911_v47 }
 0x236   :  { %4235 = vmatprep.mubr.f32.mxu1 %v6912_v3 }
 0x239   :  { %4236 = vmatmul.mubr.f32.gmra.mrb[48].mxu1 %v6913_v29 }
 0x23a   :  { %4238 = vmatprep.mubr.f32.mxu1 %v6915_v12 }
 0x23d   :  { %4239 = vmatmul.mubr.f32.gmra.mrb[50].mxu1 %v6917_v43 }
 0x23e   :  { %4241 = vmatprep.mubr.f32.mxu1 %v6919_v32 }
 0x241   :  { %4242 = vmatmul.mubr.f32.gmra.mrb[52].mxu1 %v6921_v7 }
 0x242   :  { %4244 = vmatprep.mubr.f32.mxu1 %v6923_v38 }
 0x245   :  { %4245 = vmatmul.mubr.f32.gmra.mrb[54].mxu1 %v6925_v20 }
 0x246   :  { %4247 = vmatprep.mubr.f32.mxu1 %v6927_v37 }
 0x249   :  { %4248 = vmatmul.mubr.f32.gmra.mrb[56].mxu1 %v6929_v26 }
 0x24a   :  { %4250 = vmatprep.mubr.f32.mxu1 %v6931_v31 }
 0x24d   :  { %4251 = vmatmul.mubr.f32.gmra.mrb[58].mxu1 %v6933_v19 }
 0x24e   :  { %4253 = vmatprep.mubr.f32.mxu1 %v6935_v11 }
 0x251   :  { %4254 = vmatmul.mubr.f32.gmra.mrb[60].mxu1 %v6937_v18 }
 0x252   :  { %4256 = vmatprep.mubr.f32.mxu1 %v6939_v24 }
 0x255   :  { %4257 = vmatmul.mubr.f32.gmra.mrb[62].mxu1 %v6941_v30 }
 0x2ac   :  { %v4165_v36 = vpop.f32.mrb[0].mxu1 }
 0x2ad   :  { %v5747_v34 = vadd.f32 %v4165_v36, %v5744_v28  ;;  %v1402_v42 = vpop.f32.mrb[1].mxu1 }
 0x2ae   :  { %v5750_v40 = vadd.f32 %v5744_v28, %v1402_v42 }
 0x2b0   :  { %v4168_v54 = vpop.f32.mrb[2].mxu1 }
 0x2b1   :  { %v5755_v52 = vadd.f32 %v4168_v54, %v5744_v28  ;;  %v1412_v60 = vpop.f32.mrb[3].mxu1 }
 0x2b2   :  { %v5758_v58 = vadd.f32 %v5744_v28, %v1412_v60 }
 0x2b4   :  { %v4171_v8 = vpop.f32.mrb[4].mxu1 }
 0x2b5   :  { %v5763_v5 = vadd.f32 %v4171_v8, %v5744_v28  ;;  %v1422_v27 = vpop.f32.mrb[5].mxu1 }
 0x2b6   :  { %v5766_v21 = vadd.f32 %v5744_v28, %v1422_v27 }
 0x2b8   :  { %v4174_v63 = vpop.f32.mrb[6].mxu1 }
 0x2b9   :  { %v5771_v57 = vadd.f32 %v4174_v63, %v5744_v28  ;;  %v1432_v35 = vpop.f32.mrb[7].mxu1 }
 0x2ba   :  { %v5774_v17 = vadd.f32 %v5744_v28, %v1432_v35 }
 0x2bc   :  { %v4177_v41 = vpop.f32.mrb[8].mxu1 }
 0x2bd   :  { %v5779_v23 = vadd.f32 %v4177_v41, %v5744_v28  ;;  %v1442_v4 = vpop.f32.mrb[9].mxu1 }
 0x2be   :  { %v5782_v51 = vadd.f32 %v5744_v28, %v1442_v4 }
 0x2c0   :  { %v4180_v6 = vpop.f32.mrb[10].mxu1 }
 0x2c1   :  { %v5787_v14 = vadd.f32 %v4180_v6, %v5744_v28  ;;  %v1452_v47 = vpop.f32.mrb[11].mxu1 }
 0x2c2   :  { %v5790_v3 = vadd.f32 %v5744_v28, %v1452_v47 }
 0x2c4   :  { %v4183_v12 = vpop.f32.mrb[12].mxu1 }
 0x2c5   :  { %v5795_v10 = vadd.f32 %v4183_v12, %v5744_v28  ;;  %v1462_v43 = vpop.f32.mrb[13].mxu1 }
 0x2c6   :  { %v5798_v56 = vadd.f32 %v5744_v28, %v1462_v43 }
 0x2c8   :  { %v4186_v7 = vpop.f32.mrb[14].mxu1 }
 0x2c9   :  { %v5803_v50 = vadd.f32 %v4186_v7, %v5744_v28  ;;  %v1472_v38 = vpop.f32.mrb[15].mxu1 }
 0x2ca   :  { %v5806_v61 = vadd.f32 %v5744_v28, %v1472_v38 }
 0x2cc   :  { %v4189_v37 = vpop.f32.mrb[16].mxu1 }
 0x2cd   :  { %v5811_v25 = vadd.f32 %v4189_v37, %v5744_v28  ;;  %v1482_v26 = vpop.f32.mrb[17].mxu1 }
 0x2ce   :  { %v5814_v13 = vadd.f32 %v5744_v28, %v1482_v26 }
 0x2d0   :  { %v4192_v19 = vpop.f32.mrb[18].mxu1 }
 0x2d1   :  { %v5819_v55 = vadd.f32 %v4192_v19, %v5744_v28  ;;  %v1492_v11 = vpop.f32.mrb[19].mxu1 }
 0x2d2   :  { %v5822_v9 = vadd.f32 %v5744_v28, %v1492_v11 }
 0x2d4   :  { %v4195_v24 = vpop.f32.mrb[20].mxu1 }
 0x2d5   :  { %v5827_v22 = vadd.f32 %v4195_v24, %v5744_v28  ;;  %v1502_v30 = vpop.f32.mrb[21].mxu1 }
 0x2d6   :  { %v5830_v36 = vadd.f32 %v5744_v28, %v1502_v30 }
 0x2d8   :  { %v4198_v60 = vpop.f32.mrb[22].mxu1 }
 0x2d9   :  { %v5835_v8 = vadd.f32 %v4198_v60, %v5744_v28  ;;  %v1512_v27 = vpop.f32.mrb[23].mxu1 }
 0x2da   :  { %v5838_v63 = vadd.f32 %v5744_v28, %v1512_v27 }
 0x2dc   :  { %v4201_v4 = vpop.f32.mrb[24].mxu1 }
 0x2dd   :  { %v5843_v6 = vadd.f32 %v4201_v4, %v5744_v28  ;;  %v1522_v47 = vpop.f32.mrb[25].mxu1 }
 0x2de   :  { %v5846_v12 = vadd.f32 %v5744_v28, %v1522_v47 }
 0x2e0   :  { %v4204_v38 = vpop.f32.mrb[26].mxu1 }
 0x2e1   :  { %v5851_v37 = vadd.f32 %v4204_v38, %v5744_v28  ;;  %v1532_v26 = vpop.f32.mrb[27].mxu1 }
 0x2e2   :  { %v5854_v19 = vadd.f32 %v5744_v28, %v1532_v26 }
 0x2e4   :  { %v4207_v30 = vpop.f32.mrb[28].mxu1 }
 0x2e5   :  { %v5859_v60 = vadd.f32 %v4207_v30, %v5744_v28  ;;  %v1542_v27 = vpop.f32.mrb[29].mxu1 }
 0x2e6   :  { %v5862_v4 = vadd.f32 %v5744_v28, %v1542_v27 }
 0x2e8   :  { %v4210_v43 = vpop.f32.mrb[30].mxu1 }
 0x2e9   :  { %v5867_v26 = vadd.f32 %v4210_v43, %v5744_v28  ;;  %v1552_v7 = vpop.f32.mrb[31].mxu1 }
 0x2ea   :  { %v5870_v11 = vadd.f32 %v5744_v28, %v1552_v7 }
 0x2ec   :  { %v4213_v35 = vpop.f32.mrb[32].mxu1 }
 0x2ed   :  { %v5875_v27 = vadd.f32 %v4213_v35, %v5744_v28  ;;  %v1562_v41 = vpop.f32.mrb[33].mxu1 }
 0x2ee   :  { %v5878_v47 = vadd.f32 %v5744_v28, %v1562_v41 }
 0x2f0   :  { %v4216_v42 = vpop.f32.mrb[34].mxu1 }
 0x2f1   :  { %v5883_v7 = vadd.f32 %v4216_v42, %v5744_v28  ;;  %v1572_v54 = vpop.f32.mrb[35].mxu1 }
 0x2f2   :  { %v5886_v24 = vadd.f32 %v5744_v28, %v1572_v54 }
 0x2f4   :  { %v4219_v18 = vpop.f32.mrb[36].mxu1 }
 0x2f5   :  { %v5891_v41 = vadd.f32 %v4219_v18, %v5744_v28  ;;  %v1582_v15 = vpop.f32.mrb[37].mxu1 }
 0x2f6   :  { %v5894_v38 = vadd.f32 %v5744_v28, %v1582_v15 }
 0x2f8   :  { %v4222_v31 = vpop.f32.mrb[38].mxu1 }
 0x2f9   :  { %v5899_v54 = vadd.f32 %v4222_v31, %v5744_v28  ;;  %v1592_v49 = vpop.f32.mrb[39].mxu1 }
 0x2fa   :  { %v5902_v30 = vadd.f32 %v5744_v28, %v1592_v49 }
 0x2fc   :  { %v4225_v20 = vpop.f32.mrb[40].mxu1 }
 0x2fd   :  { %v5907_v15 = vadd.f32 %v4225_v20, %v5744_v28  ;;  %v1602_v44 = vpop.f32.mrb[41].mxu1 }
 0x2fe   :  { %v5910_v43 = vadd.f32 %v5744_v28, %v1602_v44 }
 0x300   :  { %v4228_v32 = vpop.f32.mrb[42].mxu1 }
 0x301   :  { %v5915_v49 = vadd.f32 %v4228_v32, %v5744_v28  ;;  %v1612_v2 = vpop.f32.mrb[43].mxu1 }
 0x302   :  { %v5918_v35 = vadd.f32 %v5744_v28, %v1612_v2 }
 0x304   :  { %v4231_v29 = vpop.f32.mrb[44].mxu1 }
 0x305   :  { %v5923_v44 = vadd.f32 %v4231_v29, %v5744_v28  ;;  %v1622_v62 = vpop.f32.mrb[45].mxu1 }
 0x306   :  { %v5926_v42 = vadd.f32 %v5744_v28, %v1622_v62 }
 0x308   :  { %v4234_v53 = vpop.f32.mrb[46].mxu1 }
 0x309   :  { %v5931_v2 = vadd.f32 %v4234_v53, %v5744_v28  ;;  %v1632_v33 = vpop.f32.mrb[47].mxu1 }
 0x30a   :  { %v5934_v18 = vadd.f32 %v5744_v28, %v1632_v33 }
 0x30c   :  { %v4237_v0 = vpop.f32.mrb[48].mxu1 }
 0x30d   :  { %v5939_v62 = vadd.f32 %v4237_v0, %v5744_v28  ;;  %v1642_v59 = vpop.f32.mrb[49].mxu1 }
 0x30e   :  { %v5942_v31 = vadd.f32 %v5744_v28, %v1642_v59 }
 0x310   :  { %v4240_v45 = vpop.f32.mrb[50].mxu1 }
 0x311   :  { %v5947_v33 = vadd.f32 %v4240_v45, %v5744_v28  ;;  %v1652_v39 = vpop.f32.mrb[51].mxu1 }
 0x312   :  { %v5950_v20 = vadd.f32 %v5744_v28, %v1652_v39 }
 0x313   :  { %6942 = vst [vmem:[#allocation29_spill] sm:$0xff] %v5947_v33 }
 0x314   :  { %6943 = vst [vmem:[#allocation30_spill] sm:$0xff] %v5950_v20  ;;  %v4243_v1 = vpop.f32.mrb[52].mxu1 }
 0x315   :  { %v5955_v59 = vadd.f32 %v4243_v1, %v5744_v28  ;;  %v1662_v16 = vpop.f32.mrb[53].mxu1 }
 0x316   :  { %v5958_v32 = vadd.f32 %v5744_v28, %v1662_v16 }
 0x317   :  { %6944 = vst [vmem:[#allocation31_spill] sm:$0xff] %v5955_v59 }
 0x318   :  { %6945 = vst [vmem:[#allocation32_spill] sm:$0xff] %v5958_v32  ;;  %v4246_v48 = vpop.f32.mrb[54].mxu1 }
 0x319   :  { %v5963_v39 = vadd.f32 %v4246_v48, %v5744_v28  ;;  %v1672_v46 = vpop.f32.mrb[55].mxu1 }
 0x31a   :  { %v5966_v29 = vadd.f32 %v5744_v28, %v1672_v46 }
 0x31b   :  { %6946 = vst [vmem:[#allocation33_spill] sm:$0xff] %v5963_v39 }
 0x31c   :  { %6947 = vst [vmem:[#allocation34_spill] sm:$0xff] %v5966_v29  ;;  %v4249_v33 = vpop.f32.mrb[56].mxu1 }
 0x31d   :  { %v5971_v16 = vadd.f32 %v4249_v33, %v5744_v28  ;;  %v1682_v20 = vpop.f32.mrb[57].mxu1 }
 0x31e   :  { %v5974_v53 = vadd.f32 %v5744_v28, %v1682_v20 }
 0x31f   :  { %6948 = vst [vmem:[#allocation35_spill] sm:$0xff] %v5971_v16 }
 0x320   :  { %6949 = vst [vmem:[#allocation36_spill] sm:$0xff] %v5974_v53  ;;  %v4252_v59 = vpop.f32.mrb[58].mxu1 }
 0x321   :  { %v5979_v46 = vadd.f32 %v4252_v59, %v5744_v28  ;;  %v1692_v32 = vpop.f32.mrb[59].mxu1 }
 0x322   :  { %v5982_v0 = vadd.f32 %v5744_v28, %v1692_v32 }
 0x323   :  { %6950 = vst [vmem:[#allocation37_spill] sm:$0xff] %v5979_v46 }
 0x324   :  { %6951 = vst [vmem:[#allocation38_spill] sm:$0xff] %v5982_v0  ;;  %v4255_v39 = vpop.f32.mrb[60].mxu1 }
 0x325   :  { %v5987_v20 = vadd.f32 %v4255_v39, %v5744_v28  ;;  %v1702_v29 = vpop.f32.mrb[61].mxu1 }
 0x326   :  { %v5990_v45 = vadd.f32 %v5744_v28, %v1702_v29 }
 0x327   :  { %6952 = vst [vmem:[#allocation39_spill] sm:$0xff] %v5987_v20 }
 0x328   :  { %6953 = vst [vmem:[#allocation40_spill] sm:$0xff] %v5990_v45  ;;  %v4258_v16 = vpop.f32.mrb[62].mxu1 }
 0x329   :  { %v5995_v32 = vadd.f32 %v4258_v16, %v5744_v28  ;;  %v1712_v53 = vpop.f32.mrb[63].mxu1 }
 0x32a   :  { %v5998_v1 = vadd.f32 %v5744_v28, %v1712_v53 }
 0x32b   :  { %6954 = vst [vmem:[#allocation41_spill] sm:$0xff] %v5995_v32 }
 0x32c   :  { %6955 = vst [vmem:[#allocation42_spill] sm:$0xff] %v5998_v1 }
 0x32d   :  { %4727 = dma.done.wait [#allocation5 + $0x1], 2048 }
 0x32e   :  { %4728 = vsyncadd [#allocation5 + $0x1], 4294965248 }
 0x32f   :  { %4729 = dma.done.wait [#allocation5 + $0x3], 16 }
 0x330   :  { %4730 = vsyncadd [#allocation5 + $0x3], 4294967280  ;;  %s3670_s23 = sld [smem:[#allocation7 + $0x2]] }
 0x336   :  { %s3671_s24 = sshll.u32 %s3670_s23, 7 }
 0x337   :  { %s3519_s27 = scalar_lea.vmem %s6739_s4, %s3671_s24 }
 0x338   :  { %v6005_v29 = vld [vmem:[%s3519_s27 + $0x300] sm:$0xff]  ;;  %v6007_v16 = vld [vmem:[%s3519_s27 + $0x308] sm:$0xff]  ;;  %v6009_v28 = vld [vmem:[%s3519_s27 + $0x310] sm:$0xff] }
 0x339   :  { %6956 = vst [vmem:[#allocation43_spill] sm:$0xff] %v6005_v29  ;;  %6957 = vst [vmem:[#allocation44_spill] sm:$0xff] %v6007_v16  ;;  %v6011_v53 = vld [vmem:[%s3519_s27 + $0x318] sm:$0xff]  ;;  %v6013_v33 = vld [vmem:[%s3519_s27 + $0x320] sm:$0xff] }
 0x33a   :  { %6958 = vst [vmem:[#allocation53_spill] sm:$0xff] %v6009_v28  ;;  %6959 = vst [vmem:[#allocation52_spill] sm:$0xff] %v6011_v53  ;;  %v6015_v39 = vld [vmem:[%s3519_s27 + $0x328] sm:$0xff]  ;;  %v6017_v48 = vld [vmem:[%s3519_s27 + $0x330] sm:$0xff] }
 0x33b   :  { %6960 = vst [vmem:[#allocation55_spill] sm:$0xff] %v6013_v33  ;;  %6961 = vst [vmem:[#allocation54_spill] sm:$0xff] %v6015_v39  ;;  %v6019_v59 = vld [vmem:[%s3519_s27 + $0x338] sm:$0xff]  ;;  %v6021_v32 = vld [vmem:[%s3519_s27 + $0x340] sm:$0xff] }
 0x33c   :  { %6962 = vst [vmem:[#allocation57_spill] sm:$0xff] %v6017_v48  ;;  %6963 = vst [vmem:[#allocation56_spill] sm:$0xff] %v6019_v59  ;;  %v6023_v1 = vld [vmem:[%s3519_s27 + $0x348] sm:$0xff]  ;;  %v6025_v20 = vld [vmem:[%s3519_s27 + $0x350] sm:$0xff] }
 0x33d   :  { %6964 = vst [vmem:[#allocation59_spill] sm:$0xff] %v6021_v32  ;;  %6965 = vst [vmem:[#allocation58_spill] sm:$0xff] %v6023_v1  ;;  %v6027_v29 = vld [vmem:[%s3519_s27 + $0x358] sm:$0xff]  ;;  %v6029_v16 = vld [vmem:[%s3519_s27 + $0x360] sm:$0xff] }
 0x33e   :  { %6966 = vst [vmem:[#allocation61_spill] sm:$0xff] %v6025_v20  ;;  %6967 = vst [vmem:[#allocation60_spill] sm:$0xff] %v6027_v29  ;;  %v6031_v28 = vld [vmem:[%s3519_s27 + $0x368] sm:$0xff]  ;;  %v6033_v53 = vld [vmem:[%s3519_s27 + $0x370] sm:$0xff] }
 0x33f   :  { %6968 = vst [vmem:[#allocation63_spill] sm:$0xff] %v6029_v16  ;;  %6969 = vst [vmem:[#allocation62_spill] sm:$0xff] %v6031_v28  ;;  %v6035_v33 = vld [vmem:[%s3519_s27 + $0x378] sm:$0xff] }
 0x340   :  { %6970 = vst [vmem:[#allocation65_spill] sm:$0xff] %v6033_v53  ;;  %6971 = vst [vmem:[#allocation64_spill] sm:$0xff] %v6035_v33 }
 0x341   :  { %1928 = vsyncadd [#allocation5], 2048  ;;  %s3521_s29 = scalar_lea.vmem %s6740_s5, %s3670_s23 }
 0x342   :  { %v3690_v32 = vld [vmem:[%s3521_s29 + $0x6] sm:$0x1] }
 0x343   :  { %1948 = vst [vmem:[#allocation4] sm:$0x1] %v3690_v32 }
 0x344   :  { %1973 = vsyncadd [#allocation5 + $0x2], 16  ;;  %v6972_v1 = vld [vmem:[#allocation66_spill] sm:$0xff]  ;;  %v6973_v20 = vld [vmem:[#allocation67_spill] sm:$0xff]  ;;  %v6976_v28 = vmax.f32 %v5750_v40, 0.0 }
 0x345   :  { %v4590_v59 = vpack.c.bf16 %v6973_v20, %v6972_v1  ;;  %v6974_v29 = vld [vmem:[#allocation68_spill] sm:$0xff]  ;;  %v6975_v48 = vld [vmem:[#allocation69_spill] sm:$0xff]  ;;  %v6977_v33 = vld [vmem:[#allocation70_spill] sm:$0xff] }
 0x346   :  { %v4594_v16 = vpack.c.bf16 %v6975_v48, %v6974_v29  ;;  %4291 = vmatprep.mubr.f32.mxu0 %v6976_v28  ;;  %v6978_v53 = vld [vmem:[#allocation71_spill] sm:$0xff]  ;;  %v6979_v45 = vld [vmem:[#allocation72_spill] sm:$0xff]  ;;  %v6980_v32 = vld [vmem:[#allocation73_spill] sm:$0xff] }
 0x347   :  { %4591 = vmatprep.subr.bf16.mxu0 %v4590_v59  ;;  %v4598_v39 = vpack.c.bf16 %v6978_v53, %v6977_v33  ;;  %v4602_v46 = vpack.c.bf16 %v6980_v32, %v6979_v45  ;;  %v6981_v1 = vld [vmem:[#allocation74_spill] sm:$0xff]  ;;  %v6982_v20 = vld [vmem:[#allocation75_spill] sm:$0xff]  ;;  %v6983_v40 = vld [vmem:[#allocation76_spill] sm:$0xff]  ;;  %v6992_v32 = vmax.f32 %v5766_v21, 0.0  ;;  %v6999_v21 = vmax.f32 %v5787_v14, 0.0 }
 0x348   :  { %4593 = vmatpush3.bf16.msra.mxu0 %v4590_v59  ;;  %v4606_v0 = vpack.c.bf16 %v6982_v20, %v6981_v1  ;;  %v6984_v48 = vld [vmem:[#allocation77_spill] sm:$0xff]  ;;  %v6985_v59 = vld [vmem:[#allocation78_spill] sm:$0xff]  ;;  %v6986_v28 = vld [vmem:[#allocation79_spill] sm:$0xff]  ;;  %v6993_v1 = vmax.f32 %v5763_v5, 0.0  ;;  %v6994_v20 = vmax.f32 %v5774_v17, 0.0  ;;  %v7000_v5 = vmax.f32 %v5798_v56, 0.0 }
 0x349   :  { %4595 = vmatprep.subr.bf16.mxu0 %v4594_v16  ;;  %v4610_v29 = vpack.c.bf16 %v6984_v48, %v6983_v40  ;;  %v4614_v33 = vpack.c.bf16 %v6986_v28, %v6985_v59  ;;  %v6988_v53 = vld [vmem:[#allocation81_spill] sm:$0xff]  ;;  %v6995_v40 = vmax.f32 %v5771_v57, 0.0  ;;  %v7001_v17 = vmax.f32 %v5795_v10, 0.0 }
 0x34a   :  { %v7002_v57 = vmax.f32 %v5806_v61, 0.0  ;;  %v7006_v14 = vmax.f32 %v5822_v9, 0.0  ;;  %v7007_v56 = vmax.f32 %v5819_v55, 0.0  ;;  %v7008_v10 = vmax.f32 %v5830_v36, 0.0 }
 0x34b   :  { %v7009_v61 = vmax.f32 %v5827_v22, 0.0  ;;  %v7013_v9 = vmax.f32 %v5843_v6, 0.0  ;;  %v7014_v55 = vmax.f32 %v5854_v19, 0.0  ;;  %v7015_v36 = vmax.f32 %v5851_v37, 0.0 }
 0x34c   :  { %4597 = vmatpush3.bf16.msra.mxu0 %v4594_v16  ;;  %v6987_v16 = vld [vmem:[#allocation80_spill] sm:$0xff]  ;;  %v7016_v22 = vmax.f32 %v5862_v4, 0.0  ;;  %v7020_v6 = vmax.f32 %v5878_v47, 0.0  ;;  %v7021_v19 = vmax.f32 %v5875_v27, 0.0  ;;  %v7022_v37 = vmax.f32 %v5886_v24, 0.0 }
 0x34d   :  { %4599 = vmatprep.subr.bf16.mxu0 %v4598_v39  ;;  %v4618_v45 = vpack.c.bf16 %v6988_v53, %v6987_v16  ;;  %v7023_v4 = vmax.f32 %v5883_v7, 0.0  ;;  %v7027_v47 = vmax.f32 %v5899_v54, 0.0  ;;  %v7028_v27 = vmax.f32 %v5910_v43, 0.0 }
 0x34e   :  { %v7029_v24 = vmax.f32 %v5907_v15, 0.0  ;;  %v7030_v7 = vmax.f32 %v5918_v35, 0.0  ;;  %v7034_v54 = vmax.f32 %v5934_v18, 0.0  ;;  %v7035_v43 = vmax.f32 %v5931_v2, 0.0  ;;  %v7044_v18 = vld [vmem:[#allocation31_spill] sm:$0xff]  ;;  %v7046_v2 = vld [vmem:[#allocation34_spill] sm:$0xff] }
 0x34f   :  { %v7036_v15 = vmax.f32 %v5942_v31, 0.0  ;;  %v7037_v35 = vmax.f32 %v5939_v62, 0.0  ;;  %v7045_v28 = vmax.f32 %v7044_v18, 0.0  ;;  %v7048_v31 = vld [vmem:[#allocation33_spill] sm:$0xff]  ;;  %v7050_v62 = vld [vmem:[#allocation36_spill] sm:$0xff] }
 0x350   :  { %4601 = vmatpush3.bf16.msra.mxu0 %v4598_v39  ;;  %v6989_v39 = vmax.f32 %v5747_v34, 0.0  ;;  %v6996_v34 = vmax.f32 %v5782_v51, 0.0  ;;  %v7003_v51 = vmax.f32 %v5803_v50, 0.0  ;;  %v7010_v50 = vmax.f32 %v5838_v63, 0.0 }
 0x351   :  { %4603 = vmatprep.subr.bf16.mxu0 %v4602_v46  ;;  %v7017_v63 = vmax.f32 %v5859_v60, 0.0  ;;  %v7024_v60 = vmax.f32 %v5894_v38, 0.0  ;;  %v7031_v38 = vmax.f32 %v5915_v49, 0.0  ;;  %v7038_v49 = vld [vmem:[#allocation30_spill] sm:$0xff]  ;;  %v7049_v16 = vmax.f32 %v7048_v31, 0.0 }
 0x352   :  { %v7039_v48 = vmax.f32 %v7038_v49, 0.0  ;;  %v7051_v53 = vmax.f32 %v7050_v62, 0.0 }
 0x354   :  { %4605 = vmatpush3.bf16.msra.mxu0 %v4602_v46  ;;  %v6990_v46 = vmax.f32 %v5758_v58, 0.0  ;;  %v6997_v58 = vmax.f32 %v5779_v23, 0.0  ;;  %v7004_v23 = vmax.f32 %v5814_v13, 0.0  ;;  %v7011_v13 = vmax.f32 %v5835_v8, 0.0 }
 0x355   :  { %4607 = vmatprep.subr.bf16.mxu0 %v4606_v0  ;;  %v7018_v8 = vmax.f32 %v5870_v11, 0.0  ;;  %v7025_v11 = vmax.f32 %v5891_v41, 0.0  ;;  %v7032_v41 = vmax.f32 %v5926_v42, 0.0  ;;  %v7040_v42 = vld [vmem:[#allocation29_spill] sm:$0xff] }
 0x358   :  { %4609 = vmatpush3.bf16.msra.mxu0 %v4606_v0  ;;  %v6991_v0 = vmax.f32 %v5755_v52, 0.0  ;;  %v6998_v52 = vmax.f32 %v5790_v3, 0.0  ;;  %v7005_v3 = vmax.f32 %v5811_v25, 0.0  ;;  %v7012_v25 = vmax.f32 %v5846_v12, 0.0 }
 0x359   :  { %4611 = vmatprep.subr.bf16.mxu0 %v4610_v29  ;;  %v7019_v12 = vmax.f32 %v5867_v26, 0.0  ;;  %v7026_v26 = vmax.f32 %v5902_v30, 0.0  ;;  %v7033_v30 = vmax.f32 %v5923_v44, 0.0  ;;  %v7042_v44 = vld [vmem:[#allocation32_spill] sm:$0xff] }
 0x35a   :  { %v7043_v59 = vmax.f32 %v7042_v44, 0.0 }
 0x35c   :  { %4613 = vmatpush3.bf16.msra.mxu0 %v4610_v29  ;;  %v7041_v29 = vmax.f32 %v7040_v42, 0.0 }
 0x35d   :  { %4615 = vmatprep.subr.bf16.mxu0 %v4614_v33 }
 0x360   :  { %4617 = vmatpush3.bf16.msra.mxu0 %v4614_v33  ;;  %v7047_v33 = vmax.f32 %v7046_v2, 0.0 }
 0x361   :  { %4619 = vmatprep.subr.bf16.mxu0 %v4618_v45 }
 0x364   :  { %4621 = vmatpush3.bf16.msra.mxu0 %v4618_v45  ;;  %v7052_v45 = vld [vmem:[#allocation35_spill] sm:$0xff] }
 0x367   :  { %4292 = vmatmul.mubr.f32.vlgmr.msra.gmra.mrb[64].mxu0 %v6989_v39  ;;  %v7053_v39 = vmax.f32 %v7052_v45, 0.0 }
 0x368   :  { %4294 = vmatprep.mubr.f32.mxu0 %v6990_v46  ;;  %v7054_v46 = vld [vmem:[#allocation38_spill] sm:$0xff] }
 0x36b   :  { %4295 = vmatmul.mubr.f32.gmra.mrb[66].mxu0 %v6991_v0  ;;  %v7055_v0 = vmax.f32 %v7054_v46, 0.0 }
 0x36c   :  { %4297 = vmatprep.mubr.f32.mxu0 %v6992_v32  ;;  %v7056_v32 = vld [vmem:[#allocation37_spill] sm:$0xff] }
 0x36f   :  { %4298 = vmatmul.mubr.f32.gmra.mrb[68].mxu0 %v6993_v1  ;;  %v7057_v1 = vmax.f32 %v7056_v32, 0.0 }
 0x370   :  { %4300 = vmatprep.mubr.f32.mxu0 %v6994_v20  ;;  %v7058_v20 = vld [vmem:[#allocation40_spill] sm:$0xff] }
 0x373   :  { %4301 = vmatmul.mubr.f32.gmra.mrb[70].mxu0 %v6995_v40  ;;  %v7059_v40 = vmax.f32 %v7058_v20, 0.0 }
 0x374   :  { %4303 = vmatprep.mubr.f32.mxu0 %v6996_v34  ;;  %v7060_v34 = vld [vmem:[#allocation39_spill] sm:$0xff] }
 0x377   :  { %4304 = vmatmul.mubr.f32.gmra.mrb[72].mxu0 %v6997_v58  ;;  %v7061_v58 = vmax.f32 %v7060_v34, 0.0 }
 0x378   :  { %4306 = vmatprep.mubr.f32.mxu0 %v6998_v52  ;;  %v7062_v52 = vld [vmem:[#allocation42_spill] sm:$0xff] }
 0x37b   :  { %4307 = vmatmul.mubr.f32.gmra.mrb[74].mxu0 %v6999_v21  ;;  %v7063_v21 = vmax.f32 %v7062_v52, 0.0 }
 0x37c   :  { %4309 = vmatprep.mubr.f32.mxu0 %v7000_v5  ;;  %v7064_v5 = vld [vmem:[#allocation41_spill] sm:$0xff] }
 0x37f   :  { %4310 = vmatmul.mubr.f32.gmra.mrb[76].mxu0 %v7001_v17  ;;  %v7065_v17 = vmax.f32 %v7064_v5, 0.0 }
 0x380   :  { %4312 = vmatprep.mubr.f32.mxu0 %v7002_v57  ;;  %v6184_v57 = vld [vmem:[#allocation4 + $0x1] ss:$0 sm:$0xff] }
 0x383   :  { %4313 = vmatmul.mubr.f32.gmra.mrb[78].mxu0 %v7003_v51 }
 0x384   :  { %4315 = vmatprep.mubr.f32.mxu0 %v7004_v23 }
 0x387   :  { %4316 = vmatmul.mubr.f32.gmra.mrb[80].mxu0 %v7005_v3 }
 0x388   :  { %4318 = vmatprep.mubr.f32.mxu0 %v7006_v14 }
 0x38b   :  { %4319 = vmatmul.mubr.f32.gmra.mrb[82].mxu0 %v7007_v56 }
 0x38c   :  { %4321 = vmatprep.mubr.f32.mxu0 %v7008_v10 }
 0x38f   :  { %4322 = vmatmul.mubr.f32.gmra.mrb[84].mxu0 %v7009_v61 }
 0x390   :  { %4324 = vmatprep.mubr.f32.mxu0 %v7010_v50 }
 0x393   :  { %4325 = vmatmul.mubr.f32.gmra.mrb[86].mxu0 %v7011_v13 }
 0x394   :  { %4327 = vmatprep.mubr.f32.mxu0 %v7012_v25 }
 0x397   :  { %4328 = vmatmul.mubr.f32.gmra.mrb[88].mxu0 %v7013_v9 }
 0x398   :  { %4330 = vmatprep.mubr.f32.mxu0 %v7014_v55 }
 0x39b   :  { %4331 = vmatmul.mubr.f32.gmra.mrb[90].mxu0 %v7015_v36 }
 0x39c   :  { %4333 = vmatprep.mubr.f32.mxu0 %v7016_v22 }
 0x39f   :  { %4334 = vmatmul.mubr.f32.gmra.mrb[92].mxu0 %v7017_v63 }
 0x3a0   :  { %4336 = vmatprep.mubr.f32.mxu0 %v7018_v8 }
 0x3a3   :  { %4337 = vmatmul.mubr.f32.gmra.mrb[94].mxu0 %v7019_v12 }
 0x3a4   :  { %4339 = vmatprep.mubr.f32.mxu0 %v7020_v6 }
 0x3a7   :  { %4340 = vmatmul.mubr.f32.gmra.mrb[96].mxu0 %v7021_v19 }
 0x3a8   :  { %4342 = vmatprep.mubr.f32.mxu0 %v7022_v37 }
 0x3ab   :  { %4343 = vmatmul.mubr.f32.gmra.mrb[98].mxu0 %v7023_v4 }
 0x3ac   :  { %4345 = vmatprep.mubr.f32.mxu0 %v7024_v60 }
 0x3af   :  { %4346 = vmatmul.mubr.f32.gmra.mrb[100].mxu0 %v7025_v11 }
 0x3b0   :  { %4348 = vmatprep.mubr.f32.mxu0 %v7026_v26 }
 0x3b3   :  { %4349 = vmatmul.mubr.f32.gmra.mrb[102].mxu0 %v7027_v47 }
 0x3b4   :  { %4351 = vmatprep.mubr.f32.mxu0 %v7028_v27 }
 0x3b7   :  { %4352 = vmatmul.mubr.f32.gmra.mrb[104].mxu0 %v7029_v24 }
 0x3b8   :  { %4354 = vmatprep.mubr.f32.mxu0 %v7030_v7 }
 0x3bb   :  { %4355 = vmatmul.mubr.f32.gmra.mrb[106].mxu0 %v7031_v38 }
 0x3bc   :  { %4357 = vmatprep.mubr.f32.mxu0 %v7032_v41 }
 0x3bf   :  { %4358 = vmatmul.mubr.f32.gmra.mrb[108].mxu0 %v7033_v30 }
 0x3c0   :  { %4360 = vmatprep.mubr.f32.mxu0 %v7034_v54 }
 0x3c3   :  { %4361 = vmatmul.mubr.f32.gmra.mrb[110].mxu0 %v7035_v43 }
 0x3c4   :  { %4363 = vmatprep.mubr.f32.mxu0 %v7036_v15 }
 0x3c7   :  { %4364 = vmatmul.mubr.f32.gmra.mrb[112].mxu0 %v7037_v35 }
 0x3c8   :  { %4366 = vmatprep.mubr.f32.mxu0 %v7039_v48 }
 0x3cb   :  { %4367 = vmatmul.mubr.f32.gmra.mrb[114].mxu0 %v7041_v29 }
 0x3cc   :  { %4369 = vmatprep.mubr.f32.mxu0 %v7043_v59 }
 0x3cf   :  { %4370 = vmatmul.mubr.f32.gmra.mrb[116].mxu0 %v7045_v28 }
 0x3d0   :  { %4372 = vmatprep.mubr.f32.mxu0 %v7047_v33 }
 0x3d3   :  { %4373 = vmatmul.mubr.f32.gmra.mrb[118].mxu0 %v7049_v16 }
 0x3d4   :  { %4375 = vmatprep.mubr.f32.mxu0 %v7051_v53 }
 0x3d7   :  { %4376 = vmatmul.mubr.f32.gmra.mrb[120].mxu0 %v7053_v39 }
 0x3d8   :  { %4378 = vmatprep.mubr.f32.mxu0 %v7055_v0 }
 0x3db   :  { %4379 = vmatmul.mubr.f32.gmra.mrb[122].mxu0 %v7057_v1 }
 0x3dc   :  { %4381 = vmatprep.mubr.f32.mxu0 %v7059_v40 }
 0x3df   :  { %4382 = vmatmul.mubr.f32.gmra.mrb[124].mxu0 %v7061_v58 }
 0x3e0   :  { %4384 = vmatprep.mubr.f32.mxu0 %v7063_v21 }
 0x3e3   :  { %4385 = vmatmul.mubr.f32.gmra.mrb[126].mxu0 %v7065_v17 }
 0x43a   :  { %v4293_v51 = vpop.f32.mrb[64].mxu0 }
 0x43b   :  { %v6187_v23 = vadd.f32 %v4293_v51, %v6184_v57  ;;  %v2127_v3 = vpop.f32.mrb[65].mxu0 }
 0x43c   :  { %v6190_v14 = vadd.f32 %v6184_v57, %v2127_v3 }
 0x43e   :  { %v4296_v61 = vpop.f32.mrb[66].mxu0 }
 0x43f   :  { %v6195_v50 = vadd.f32 %v4296_v61, %v6184_v57  ;;  %v2137_v13 = vpop.f32.mrb[67].mxu0 }
 0x440   :  { %v6198_v25 = vadd.f32 %v6184_v57, %v2137_v13 }
 0x442   :  { %v4299_v36 = vpop.f32.mrb[68].mxu0 }
 0x443   :  { %v6203_v22 = vadd.f32 %v4299_v36, %v6184_v57  ;;  %v2147_v63 = vpop.f32.mrb[69].mxu0 }
 0x444   :  { %v6206_v8 = vadd.f32 %v6184_v57, %v2147_v63 }
 0x446   :  { %v4302_v19 = vpop.f32.mrb[70].mxu0 }
 0x447   :  { %v6211_v37 = vadd.f32 %v4302_v19, %v6184_v57  ;;  %v2157_v4 = vpop.f32.mrb[71].mxu0 }
 0x448   :  { %v6214_v60 = vadd.f32 %v6184_v57, %v2157_v4 }
 0x44a   :  { %v4305_v47 = vpop.f32.mrb[72].mxu0 }
 0x44b   :  { %v6219_v27 = vadd.f32 %v4305_v47, %v6184_v57  ;;  %v2167_v24 = vpop.f32.mrb[73].mxu0 }
 0x44c   :  { %v6222_v7 = vadd.f32 %v6184_v57, %v2167_v24 }
 0x44e   :  { %v4308_v30 = vpop.f32.mrb[74].mxu0 }
 0x44f   :  { %v6227_v54 = vadd.f32 %v4308_v30, %v6184_v57  ;;  %v2177_v43 = vpop.f32.mrb[75].mxu0 }
 0x450   :  { %v6230_v15 = vadd.f32 %v6184_v57, %v2177_v43 }
 0x452   :  { %v4311_v48 = vpop.f32.mrb[76].mxu0 }
 0x453   :  { %v6235_v42 = vadd.f32 %v4311_v48, %v6184_v57  ;;  %v2187_v29 = vpop.f32.mrb[77].mxu0 }
 0x454   :  { %v6238_v44 = vadd.f32 %v6184_v57, %v2187_v29 }
 0x456   :  { %v4314_v28 = vpop.f32.mrb[78].mxu0 }
 0x457   :  { %v6243_v2 = vadd.f32 %v4314_v28, %v6184_v57  ;;  %v2197_v33 = vpop.f32.mrb[79].mxu0 }
 0x458   :  { %v6246_v31 = vadd.f32 %v6184_v57, %v2197_v33 }
 0x45a   :  { %v4317_v53 = vpop.f32.mrb[80].mxu0 }
 0x45b   :  { %v6251_v45 = vadd.f32 %v4317_v53, %v6184_v57  ;;  %v2207_v39 = vpop.f32.mrb[81].mxu0 }
 0x45c   :  { %v6254_v46 = vadd.f32 %v6184_v57, %v2207_v39 }
 0x45e   :  { %v4320_v1 = vpop.f32.mrb[82].mxu0 }
 0x45f   :  { %v6259_v20 = vadd.f32 %v4320_v1, %v6184_v57  ;;  %v2217_v40 = vpop.f32.mrb[83].mxu0 }
 0x460   :  { %v6262_v34 = vadd.f32 %v6184_v57, %v2217_v40 }
 0x462   :  { %v4323_v21 = vpop.f32.mrb[84].mxu0 }
 0x463   :  { %v6267_v5 = vadd.f32 %v4323_v21, %v6184_v57  ;;  %v2227_v17 = vpop.f32.mrb[85].mxu0 }
 0x464   :  { %v6270_v51 = vadd.f32 %v6184_v57, %v2227_v17 }
 0x466   :  { %v4326_v13 = vpop.f32.mrb[86].mxu0 }
 0x467   :  { %v6275_v36 = vadd.f32 %v4326_v13, %v6184_v57  ;;  %v2237_v63 = vpop.f32.mrb[87].mxu0 }
 0x468   :  { %v6278_v19 = vadd.f32 %v6184_v57, %v2237_v63 }
 0x46a   :  { %v4329_v24 = vpop.f32.mrb[88].mxu0 }
 0x46b   :  { %v6283_v30 = vadd.f32 %v4329_v24, %v6184_v57  ;;  %v2247_v43 = vpop.f32.mrb[89].mxu0 }
 0x46c   :  { %v6286_v48 = vadd.f32 %v6184_v57, %v2247_v43 }
 0x46e   :  { %v4332_v33 = vpop.f32.mrb[90].mxu0 }
 0x46f   :  { %v6291_v53 = vadd.f32 %v4332_v33, %v6184_v57  ;;  %v2257_v39 = vpop.f32.mrb[91].mxu0 }
 0x470   :  { %v6294_v1 = vadd.f32 %v6184_v57, %v2257_v39 }
 0x472   :  { %v4335_v17 = vpop.f32.mrb[92].mxu0 }
 0x473   :  { %v6299_v13 = vadd.f32 %v4335_v17, %v6184_v57  ;;  %v2267_v63 = vpop.f32.mrb[93].mxu0 }
 0x474   :  { %v6302_v24 = vadd.f32 %v6184_v57, %v2267_v63 }
 0x476   :  { %v4338_v29 = vpop.f32.mrb[94].mxu0 }
 0x477   :  { %v6307_v39 = vadd.f32 %v4338_v29, %v6184_v57  ;;  %v2277_v28 = vpop.f32.mrb[95].mxu0 }
 0x478   :  { %v6310_v40 = vadd.f32 %v6184_v57, %v2277_v28 }
 0x47a   :  { %v4341_v4 = vpop.f32.mrb[96].mxu0 }
 0x47b   :  { %v6315_v63 = vadd.f32 %v4341_v4, %v6184_v57  ;;  %v2287_v47 = vpop.f32.mrb[97].mxu0 }
 0x47c   :  { %v6318_v43 = vadd.f32 %v6184_v57, %v2287_v47 }
 0x47e   :  { %v4344_v3 = vpop.f32.mrb[98].mxu0 }
 0x47f   :  { %v6323_v28 = vadd.f32 %v4344_v3, %v6184_v57  ;;  %v2297_v61 = vpop.f32.mrb[99].mxu0 }
 0x480   :  { %v6326_v21 = vadd.f32 %v6184_v57, %v2297_v61 }
 0x482   :  { %v4347_v58 = vpop.f32.mrb[100].mxu0 }
 0x483   :  { %v6331_v47 = vadd.f32 %v4347_v58, %v6184_v57  ;;  %v2307_v52 = vpop.f32.mrb[101].mxu0 }
 0x484   :  { %v6334_v33 = vadd.f32 %v6184_v57, %v2307_v52 }
 0x486   :  { %v4350_v0 = vpop.f32.mrb[102].mxu0 }
 0x487   :  { %v6339_v61 = vadd.f32 %v4350_v0, %v6184_v57  ;;  %v2317_v32 = vpop.f32.mrb[103].mxu0 }
 0x488   :  { %v6342_v17 = vadd.f32 %v6184_v57, %v2317_v32 }
 0x48a   :  { %v4353_v16 = vpop.f32.mrb[104].mxu0 }
 0x48b   :  { %v6347_v52 = vadd.f32 %v4353_v16, %v6184_v57  ;;  %v2327_v62 = vpop.f32.mrb[105].mxu0 }
 0x48c   :  { %v6350_v29 = vadd.f32 %v6184_v57, %v2327_v62 }
 0x48e   :  { %v4356_v59 = vpop.f32.mrb[106].mxu0 }
 0x48f   :  { %v6355_v32 = vadd.f32 %v4356_v59, %v6184_v57  ;;  %v2337_v18 = vpop.f32.mrb[107].mxu0 }
 0x490   :  { %v6358_v4 = vadd.f32 %v6184_v57, %v2337_v18 }
 0x492   :  { %v4359_v35 = vpop.f32.mrb[108].mxu0 }
 0x493   :  { %v6363_v62 = vadd.f32 %v4359_v35, %v6184_v57  ;;  %v2347_v49 = vpop.f32.mrb[109].mxu0 }
 0x494   :  { %v6366_v3 = vadd.f32 %v6184_v57, %v2347_v49 }
 0x496   :  { %v4362_v38 = vpop.f32.mrb[110].mxu0 }
 0x497   :  { %v6371_v18 = vadd.f32 %v4362_v38, %v6184_v57  ;;  %v2357_v41 = vpop.f32.mrb[111].mxu0 }
 0x498   :  { %v6374_v58 = vadd.f32 %v6184_v57, %v2357_v41 }
 0x49a   :  { %v4365_v11 = vpop.f32.mrb[112].mxu0 }
 0x49b   :  { %v6379_v49 = vadd.f32 %v4365_v11, %v6184_v57  ;;  %v2367_v26 = vpop.f32.mrb[113].mxu0 }
 0x49c   :  { %v6382_v0 = vadd.f32 %v6184_v57, %v2367_v26 }
 0x49e   :  { %v4368_v12 = vpop.f32.mrb[114].mxu0 }
 0x49f   :  { %v6387_v41 = vadd.f32 %v4368_v12, %v6184_v57  ;;  %v2377_v6 = vpop.f32.mrb[115].mxu0 }
 0x4a0   :  { %v6390_v16 = vadd.f32 %v6184_v57, %v2377_v6 }
 0x4a1   :  { %7066 = vst [vmem:[#allocation66_spill] sm:$0xff] %v6387_v41 }
 0x4a2   :  { %7067 = vst [vmem:[#allocation67_spill] sm:$0xff] %v6390_v16  ;;  %v4371_v9 = vpop.f32.mrb[116].mxu0 }
 0x4a3   :  { %v6395_v26 = vadd.f32 %v4371_v9, %v6184_v57  ;;  %v2387_v55 = vpop.f32.mrb[117].mxu0 }
 0x4a4   :  { %v6398_v59 = vadd.f32 %v6184_v57, %v2387_v55 }
 0x4a5   :  { %7068 = vst [vmem:[#allocation68_spill] sm:$0xff] %v6395_v26 }
 0x4a6   :  { %7069 = vst [vmem:[#allocation69_spill] sm:$0xff] %v6398_v59  ;;  %v4374_v56 = vpop.f32.mrb[118].mxu0 }
 0x4a7   :  { %v6403_v6 = vadd.f32 %v4374_v56, %v6184_v57  ;;  %v2397_v10 = vpop.f32.mrb[119].mxu0 }
 0x4a8   :  { %v6406_v35 = vadd.f32 %v6184_v57, %v2397_v10 }
 0x4a9   :  { %7070 = vst [vmem:[#allocation70_spill] sm:$0xff] %v6403_v6 }
 0x4aa   :  { %7071 = vst [vmem:[#allocation71_spill] sm:$0xff] %v6406_v35  ;;  %v4377_v41 = vpop.f32.mrb[120].mxu0 }
 0x4ab   :  { %v6411_v55 = vadd.f32 %v4377_v41, %v6184_v57  ;;  %v2407_v16 = vpop.f32.mrb[121].mxu0 }
 0x4ac   :  { %v6414_v38 = vadd.f32 %v6184_v57, %v2407_v16 }
 0x4ad   :  { %7072 = vst [vmem:[#allocation72_spill] sm:$0xff] %v6411_v55 }
 0x4ae   :  { %7073 = vst [vmem:[#allocation73_spill] sm:$0xff] %v6414_v38  ;;  %v4380_v26 = vpop.f32.mrb[122].mxu0 }
 0x4af   :  { %v6419_v10 = vadd.f32 %v4380_v26, %v6184_v57  ;;  %v2417_v59 = vpop.f32.mrb[123].mxu0 }
 0x4b0   :  { %v6422_v11 = vadd.f32 %v6184_v57, %v2417_v59 }
 0x4b1   :  { %7074 = vst [vmem:[#allocation74_spill] sm:$0xff] %v6419_v10 }
 0x4b2   :  { %7075 = vst [vmem:[#allocation75_spill] sm:$0xff] %v6422_v11  ;;  %v4383_v6 = vpop.f32.mrb[124].mxu0 }
 0x4b3   :  { %v6427_v16 = vadd.f32 %v4383_v6, %v6184_v57  ;;  %v2427_v35 = vpop.f32.mrb[125].mxu0 }
 0x4b4   :  { %v6430_v12 = vadd.f32 %v6184_v57, %v2427_v35 }
 0x4b5   :  { %7076 = vst [vmem:[#allocation76_spill] sm:$0xff] %v6427_v16 }
 0x4b6   :  { %7077 = vst [vmem:[#allocation77_spill] sm:$0xff] %v6430_v12  ;;  %v4386_v55 = vpop.f32.mrb[126].mxu0 }
 0x4b7   :  { %v6435_v59 = vadd.f32 %v4386_v55, %v6184_v57  ;;  %v2437_v38 = vpop.f32.mrb[127].mxu0 }
 0x4b8   :  { %v6438_v9 = vadd.f32 %v6184_v57, %v2437_v38 }
 0x4b9   :  { %7078 = vst [vmem:[#allocation78_spill] sm:$0xff] %v6435_v59 }
 0x4ba   :  { %7079 = vst [vmem:[#allocation79_spill] sm:$0xff] %v6438_v9 }
 0x4bb   :  { %4731 = dma.done.wait [#allocation5], 2048 }
 0x4bc   :  { %4732 = vsyncadd [#allocation5], 4294965248  ;;  %v7080_v35 = vld [vmem:[#allocation43_spill] sm:$0xff]  ;;  %v7081_v10 = vld [vmem:[#allocation44_spill] sm:$0xff]  ;;  %v7084_v12 = vmax.f32 %v6190_v14, 0.0 }
 0x4bd   :  { %v4622_v11 = vpack.c.bf16 %v7081_v10, %v7080_v35  ;;  %v7082_v56 = vld [vmem:[#allocation53_spill] sm:$0xff]  ;;  %v7083_v16 = vld [vmem:[#allocation52_spill] sm:$0xff] }
 0x4be   :  { %v4626_v26 = vpack.c.bf16 %v7083_v16, %v7082_v56  ;;  %4419 = vmatprep.mubr.f32.mxu1 %v7084_v12 }
 0x4bf   :  { %4733 = dma.done.wait [#allocation5 + $0x2], 16 }
 0x4c0   :  { %4734 = vsyncadd [#allocation5 + $0x2], 4294967280  ;;  %4623 = vmatprep.subr.bf16.mxu1 %v4622_v11  ;;  %v7085_v57 = vld [vmem:[#allocation55_spill] sm:$0xff]  ;;  %v7086_v38 = vld [vmem:[#allocation54_spill] sm:$0xff]  ;;  %vm4739_vm1 = vmmov 0   ;;  %vm3343_vm2 = vcmask 1041409  }
 0x4c1   :  { %4625 = vmatpush3.bf16.msra.mxu1 %v4622_v11  ;;  %v4630_v55 = vpack.c.bf16 %v7086_v38, %v7085_v57  ;;  %v7087_v41 = vld [vmem:[#allocation57_spill] sm:$0xff]  ;;  %v7088_v6 = vld [vmem:[#allocation56_spill] sm:$0xff]  ;;  %v7089_v10 = vld [vmem:[#allocation59_spill] sm:$0xff]  ;;  %vm3420_vm4 = vcmask 1041408   ;;  %vm3445_vm7 = vcmask 1024   ;;  %s4741_s3 = smov [#allocation10]  }
 0x4c2   :  { %4627 = vmatprep.subr.bf16.mxu1 %v4626_v26  ;;  %v4634_v59 = vpack.c.bf16 %v7088_v6, %v7087_v41  ;;  %v7090_v56 = vld [vmem:[#allocation58_spill] sm:$0xff]  ;;  %v7091_v14 = vld [vmem:[#allocation61_spill] sm:$0xff]  ;;  %v7092_v12 = vld [vmem:[#allocation60_spill] sm:$0xff]  ;;  %v7097_v6 = vmax.f32 %v6187_v23, 0.0  ;;  %v7104_v23 = vmax.f32 %v6222_v7, 0.0  ;;  %v7111_v7 = vmax.f32 %v6243_v2, 0.0 }
 0x4c3   :  { %v4638_v16 = vpack.c.bf16 %v7090_v56, %v7089_v10  ;;  %v4642_v35 = vpack.c.bf16 %v7092_v12, %v7091_v14  ;;  %v7093_v11 = vld [vmem:[#allocation63_spill] sm:$0xff]  ;;  %v7094_v9 = vld [vmem:[#allocation62_spill] sm:$0xff]  ;;  %v7096_v38 = vld [vmem:[#allocation64_spill] sm:$0xff]  ;;  %v7100_v10 = vmax.f32 %v6206_v8, 0.0  ;;  %v7102_v56 = vmax.f32 %v6214_v60, 0.0  ;;  %s3468_s17 = sshll.u32 %s4741_s3, 4  ;;  %s3469_s17 = int_to_ptr.vmem [resolvable:$true] %s3468_s17 }
 0x4c4   :  { %v4646_v57 = vpack.c.bf16 %v7094_v9, %v7093_v11  ;;  %v7101_v9 = vmax.f32 %v6203_v22, 0.0  ;;  %v7107_v8 = vmax.f32 %v6227_v54, 0.0  ;;  %v7108_v22 = vmax.f32 %v6238_v44, 0.0  ;;  %s4697_s20 = scalar_lea.vmem %s3469_s17, 16  ;;  %s4701_s21 = scalar_lea.vmem %s3469_s17, 32 }
 0x4c5   :  { %4629 = vmatpush3.bf16.msra.mxu1 %v4626_v26  ;;  %v7095_v26 = vld [vmem:[#allocation65_spill] sm:$0xff]  ;;  %v7109_v60 = vmax.f32 %v6235_v42, 0.0  ;;  %v7114_v54 = vmax.f32 %v6262_v34, 0.0  ;;  %v7115_v44 = vmax.f32 %v6259_v20, 0.0  ;;  %v7116_v42 = vmax.f32 %v6270_v51, 0.0  ;;  %p4698_p5 = scmp.ne.s32.totalorder %s3469_s17, %s4697_s20  ;;  %p4702_p6 = scmp.lt.s32.totalorder %s3469_s17, %s3469_s17 }
 0x4c6   :  { %4631 = vmatprep.subr.bf16.mxu1 %v4630_v55  ;;  %v4650_v41 = vpack.c.bf16 %v7096_v38, %v7095_v26  ;;  %v7118_v2 = vmax.f32 %v6278_v19, 0.0  ;;  %v7121_v34 = vmax.f32 %v6283_v30, 0.0  ;;  %v7122_v20 = vmax.f32 %v6294_v1, 0.0  ;;  %p4703_p7 = scmp.lt.s32.totalorder %s4701_s21, %s4697_s20 }
 0x4c7   :  { %v7123_v51 = vmax.f32 %v6291_v53, 0.0  ;;  %v7125_v19 = vmax.f32 %v6299_v13, 0.0  ;;  %v7128_v30 = vmax.f32 %v6318_v43, 0.0  ;;  %v7129_v1 = vmax.f32 %v6315_v63, 0.0 }
 0x4c8   :  { %v7130_v53 = vmax.f32 %v6326_v21, 0.0  ;;  %v7132_v13 = vmax.f32 %v6334_v33, 0.0  ;;  %v7135_v43 = vmax.f32 %v6339_v61, 0.0  ;;  %v7136_v63 = vmax.f32 %v6350_v29, 0.0  ;;  %p4704_p8 = por %p4703_p7, %p4702_p6 }
 0x4c9   :  { %4633 = vmatpush3.bf16.msra.mxu1 %v4630_v55  ;;  %v7099_v55 = vmax.f32 %v6195_v50, 0.0  ;;  %v7106_v50 = vmax.f32 %v6230_v15, 0.0  ;;  %v7113_v15 = vmax.f32 %v6251_v45, 0.0  ;;  %v7120_v45 = vmax.f32 %v6286_v48, 0.0 }
 0x4ca   :  { %4635 = vmatprep.subr.bf16.mxu1 %v4634_v59  ;;  %v7127_v48 = vmax.f32 %v6307_v39, 0.0  ;;  %v7134_v39 = vmax.f32 %v6342_v17, 0.0  ;;  %v7137_v21 = vmax.f32 %v6347_v52, 0.0  ;;  %v7139_v33 = vmax.f32 %v6355_v32, 0.0  ;;  %v7146_v32 = vld [vmem:[#allocation67_spill] sm:$0xff]  ;;  %p4705_p9 = pnand %p4704_p8, %p4698_p5 }
 0x4cb   :  { %v7141_v17 = vmax.f32 %v6363_v62, 0.0  ;;  %v7142_v61 = vmax.f32 %v6374_v58, 0.0  ;;  %v7143_v29 = vmax.f32 %v6371_v18, 0.0  ;;  %v7144_v52 = vmax.f32 %v6382_v0, 0.0  ;;  %v7150_v62 = vld [vmem:[#allocation69_spill] sm:$0xff]  ;;  %v7152_v58 = vld [vmem:[#allocation68_spill] sm:$0xff] }
 0x4cc   :  { %v7147_v14 = vmax.f32 %v7146_v32, 0.0  ;;  %v7153_v11 = vmax.f32 %v7152_v58, 0.0  ;;  %v7154_v18 = vld [vmem:[#allocation71_spill] sm:$0xff]  ;;  %v7156_v0 = vld [vmem:[#allocation70_spill] sm:$0xff]  ;;  %vm3460_vm9 = vcmask 0  }
 0x4cd   :  { %4637 = vmatpush3.bf16.msra.mxu1 %v4634_v59  ;;  %v7098_v59 = vmax.f32 %v6198_v25, 0.0  ;;  %v7105_v25 = vmax.f32 %v6219_v27, 0.0  ;;  %v7112_v27 = vmax.f32 %v6254_v46, 0.0  ;;  %v7119_v46 = vmax.f32 %v6275_v36, 0.0  ;;  %v3333_v58 = vld [vmem:[%s6741_s6 + $0x78] sm:$0xff] }
 0x4ce   :  { %4639 = vmatprep.subr.bf16.mxu1 %v4638_v16  ;;  %v7126_v36 = vmax.f32 %v6310_v40, 0.0  ;;  %v7133_v40 = vmax.f32 %v6331_v47, 0.0  ;;  %v7140_v47 = vmax.f32 %v6366_v3, 0.0  ;;  %v7148_v3 = vld [vmem:[#allocation66_spill] sm:$0xff]  ;;  %v7157_v26 = vmax.f32 %v7156_v0, 0.0 }
 0x4cf   :  { %v7149_v12 = vmax.f32 %v7148_v3, 0.0  ;;  %v3330_v3 = vld [vmem:[%s6741_s6 + $0x60] sm:$0xff] }
 0x4d1   :  { %4641 = vmatpush3.bf16.msra.mxu1 %v4638_v16  ;;  %v7103_v16 = vmax.f32 %v6211_v37, 0.0  ;;  %v7110_v37 = vmax.f32 %v6246_v31, 0.0  ;;  %v7117_v31 = vmax.f32 %v6267_v5, 0.0  ;;  %v7124_v5 = vmax.f32 %v6302_v24, 0.0 }
 0x4d2   :  { %4643 = vmatprep.subr.bf16.mxu1 %v4642_v35  ;;  %v7131_v24 = vmax.f32 %v6323_v28, 0.0  ;;  %v7138_v28 = vmax.f32 %v6358_v4, 0.0  ;;  %v7145_v4 = vmax.f32 %v6379_v49, 0.0  ;;  %v7158_v49 = vld [vmem:[#allocation73_spill] sm:$0xff] }
 0x4d3   :  { %v7159_v38 = vmax.f32 %v7158_v49, 0.0 }
 0x4d5   :  { %4645 = vmatpush3.bf16.msra.mxu1 %v4642_v35  ;;  %v7151_v35 = vmax.f32 %v7150_v62, 0.0 }
 0x4d6   :  { %4647 = vmatprep.subr.bf16.mxu1 %v4646_v57 }
 0x4d9   :  { %4649 = vmatpush3.bf16.msra.mxu1 %v4646_v57  ;;  %v7155_v57 = vmax.f32 %v7154_v18, 0.0 }
 0x4da   :  { %4651 = vmatprep.subr.bf16.mxu1 %v4650_v41 }
 0x4dd   :  { %4653 = vmatpush3.bf16.msra.mxu1 %v4650_v41  ;;  %v7160_v41 = vld [vmem:[#allocation72_spill] sm:$0xff] }
 0x4e0   :  { %4420 = vmatmul.mubr.f32.vlgmr.msra.gmra.mrb[64].mxu1 %v7097_v6  ;;  %v7161_v6 = vmax.f32 %v7160_v41, 0.0 }
 0x4e1   :  { %4422 = vmatprep.mubr.f32.mxu1 %v7098_v59  ;;  %v7162_v59 = vld [vmem:[#allocation75_spill] sm:$0xff] }
 0x4e4   :  { %4423 = vmatmul.mubr.f32.gmra.mrb[66].mxu1 %v7099_v55  ;;  %v7163_v55 = vmax.f32 %v7162_v59, 0.0 }
 0x4e5   :  { %4425 = vmatprep.mubr.f32.mxu1 %v7100_v10  ;;  %v7164_v10 = vld [vmem:[#allocation74_spill] sm:$0xff] }
 0x4e8   :  { %4426 = vmatmul.mubr.f32.gmra.mrb[68].mxu1 %v7101_v9  ;;  %v7165_v9 = vmax.f32 %v7164_v10, 0.0 }
 0x4e9   :  { %4428 = vmatprep.mubr.f32.mxu1 %v7102_v56  ;;  %v7166_v56 = vld [vmem:[#allocation77_spill] sm:$0xff] }
 0x4ec   :  { %4429 = vmatmul.mubr.f32.gmra.mrb[70].mxu1 %v7103_v16  ;;  %v7167_v16 = vmax.f32 %v7166_v56, 0.0 }
 0x4ed   :  { %4431 = vmatprep.mubr.f32.mxu1 %v7104_v23  ;;  %v7168_v23 = vld [vmem:[#allocation76_spill] sm:$0xff] }
 0x4f0   :  { %4432 = vmatmul.mubr.f32.gmra.mrb[72].mxu1 %v7105_v25  ;;  %v7169_v25 = vmax.f32 %v7168_v23, 0.0 }
 0x4f1   :  { %4434 = vmatprep.mubr.f32.mxu1 %v7106_v50  ;;  %v7170_v50 = vld [vmem:[#allocation79_spill] sm:$0xff] }
 0x4f4   :  { %4435 = vmatmul.mubr.f32.gmra.mrb[74].mxu1 %v7107_v8  ;;  %v7171_v8 = vmax.f32 %v7170_v50, 0.0 }
 0x4f5   :  { %4437 = vmatprep.mubr.f32.mxu1 %v7108_v22  ;;  %v7172_v22 = vld [vmem:[#allocation78_spill] sm:$0xff] }
 0x4f8   :  { %4438 = vmatmul.mubr.f32.gmra.mrb[76].mxu1 %v7109_v60  ;;  %v7173_v60 = vmax.f32 %v7172_v22, 0.0 }
 0x4f9   :  { %4440 = vmatprep.mubr.f32.mxu1 %v7110_v37  ;;  %v3318_v37 = vld [vmem:[%s6741_s6] sm:$0xff] }
 0x4fc   :  { %4441 = vmatmul.mubr.f32.gmra.mrb[78].mxu1 %v7111_v7  ;;  %v3319_v7 = vld [vmem:[%s6741_s6 + $0x8] sm:$0xff] }
 0x4fd   :  { %4443 = vmatprep.mubr.f32.mxu1 %v7112_v27  ;;  %v4655_v27 = vpack.c.bf16 %v3319_v7, %v3318_v37 }
 0x500   :  { %4444 = vmatmul.mubr.f32.gmra.mrb[80].mxu1 %v7113_v15  ;;  %v4738_v15 = vmov 0.0|0.0  }
 0x501   :  { %4446 = vmatprep.mubr.f32.mxu1 %v7114_v54  ;;  %4654 = vmatprep.subr.bf16.mxu0 %v4738_v15  ;;  %v3320_v54 = vld [vmem:[%s6741_s6 + $0x10] sm:$0xff] }
 0x502   :  { %4656 = vmatpush3.bf16.msra.mxu0 %v4655_v27 }
 0x503   :  { %4657 = vmatprep.subr.bf16.mxu0 %v4738_v15 }
 0x504   :  { %4447 = vmatmul.mubr.f32.gmra.mrb[82].mxu1 %v7115_v44  ;;  %v3321_v44 = vld [vmem:[%s6741_s6 + $0x18] sm:$0xff] }
 0x505   :  { %4449 = vmatprep.mubr.f32.mxu1 %v7116_v42  ;;  %v4658_v42 = vpack.c.bf16 %v3321_v44, %v3320_v54 }
 0x507   :  { %4659 = vmatpush3.bf16.msra.mxu0 %v4658_v42 }
 0x508   :  { %4450 = vmatmul.mubr.f32.gmra.mrb[84].mxu1 %v7117_v31  ;;  %4660 = vmatprep.subr.bf16.mxu0 %v4738_v15  ;;  %v3322_v31 = vld [vmem:[%s6741_s6 + $0x20] sm:$0xff] }
 0x509   :  { %4452 = vmatprep.mubr.f32.mxu1 %v7118_v2  ;;  %v3323_v2 = vld [vmem:[%s6741_s6 + $0x28] sm:$0xff] }
 0x50c   :  { %4453 = vmatmul.mubr.f32.gmra.mrb[86].mxu1 %v7119_v46  ;;  %v4661_v46 = vpack.c.bf16 %v3323_v2, %v3322_v31 }
 0x50d   :  { %4455 = vmatprep.mubr.f32.mxu1 %v7120_v45  ;;  %v6607_v45 = vld [vmem:[#allocation4] ss:$0 sm:$0xff] }
 0x50e   :  { %4662 = vmatpush3.bf16.msra.mxu0 %v4661_v46 }
 0x50f   :  { %4663 = vmatprep.subr.bf16.mxu0 %v4738_v15 }
 0x510   :  { %4456 = vmatmul.mubr.f32.gmra.mrb[88].mxu1 %v7121_v34  ;;  %v3324_v34 = vld [vmem:[%s6741_s6 + $0x30] sm:$0xff] }
 0x511   :  { %4458 = vmatprep.mubr.f32.mxu1 %v7122_v20  ;;  %v3325_v20 = vld [vmem:[%s6741_s6 + $0x38] sm:$0xff] }
 0x514   :  { %4459 = vmatmul.mubr.f32.gmra.mrb[90].mxu1 %v7123_v51 }
 0x515   :  { %4461 = vmatprep.mubr.f32.mxu1 %v7124_v5  ;;  %v4664_v5 = vpack.c.bf16 %v3325_v20, %v3324_v34 }
 0x517   :  { %4665 = vmatpush3.bf16.msra.mxu0 %v4664_v5 }
 0x518   :  { %4462 = vmatmul.mubr.f32.gmra.mrb[92].mxu1 %v7125_v19  ;;  %4666 = vmatprep.subr.bf16.mxu0 %v4738_v15 }
 0x519   :  { %4464 = vmatprep.mubr.f32.mxu1 %v7126_v36 }
 0x51c   :  { %4465 = vmatmul.mubr.f32.gmra.mrb[94].mxu1 %v7127_v48 }
 0x51d   :  { %4467 = vmatprep.mubr.f32.mxu1 %v7128_v30 }
 0x520   :  { %4468 = vmatmul.mubr.f32.gmra.mrb[96].mxu1 %v7129_v1  ;;  %v3326_v1 = vld [vmem:[%s6741_s6 + $0x40] sm:$0xff] }
 0x521   :  { %4470 = vmatprep.mubr.f32.mxu1 %v7130_v53  ;;  %v3327_v53 = vld [vmem:[%s6741_s6 + $0x48] sm:$0xff] }
 0x524   :  { %4471 = vmatmul.mubr.f32.gmra.mrb[98].mxu1 %v7131_v24 }
 0x525   :  { %4473 = vmatprep.mubr.f32.mxu1 %v7132_v13 }
 0x528   :  { %4474 = vmatmul.mubr.f32.gmra.mrb[100].mxu1 %v7133_v40  ;;  %v4667_v40 = vpack.c.bf16 %v3327_v53, %v3326_v1 }
 0x529   :  { %4476 = vmatprep.mubr.f32.mxu1 %v7134_v39 }
 0x52a   :  { %4668 = vmatpush3.bf16.msra.mxu0 %v4667_v40 }
 0x52b   :  { %4669 = vmatprep.subr.bf16.mxu0 %v4738_v15 }
 0x52c   :  { %4477 = vmatmul.mubr.f32.gmra.mrb[102].mxu1 %v7135_v43 }
 0x52d   :  { %4479 = vmatprep.mubr.f32.mxu1 %v7136_v63 }
 0x530   :  { %4480 = vmatmul.mubr.f32.gmra.mrb[104].mxu1 %v7137_v21 }
 0x531   :  { %4482 = vmatprep.mubr.f32.mxu1 %v7138_v28  ;;  %v3328_v28 = vld [vmem:[%s6741_s6 + $0x50] sm:$0xff] }
 0x534   :  { %4483 = vmatmul.mubr.f32.gmra.mrb[106].mxu1 %v7139_v33  ;;  %v3329_v33 = vld [vmem:[%s6741_s6 + $0x58] sm:$0xff] }
 0x535   :  { %4485 = vmatprep.mubr.f32.mxu1 %v7140_v47 }
 0x538   :  { %4486 = vmatmul.mubr.f32.gmra.mrb[108].mxu1 %v7141_v17 }
 0x539   :  { %4488 = vmatprep.mubr.f32.mxu1 %v7142_v61  ;;  %v4670_v61 = vpack.c.bf16 %v3329_v33, %v3328_v28 }
 0x53b   :  { %4671 = vmatpush3.bf16.msra.mxu0 %v4670_v61 }
 0x53c   :  { %4489 = vmatmul.mubr.f32.gmra.mrb[110].mxu1 %v7143_v29  ;;  %4672 = vmatprep.subr.bf16.mxu0 %v4738_v15 }
 0x53d   :  { %4491 = vmatprep.mubr.f32.mxu1 %v7144_v52 }
 0x540   :  { %4492 = vmatmul.mubr.f32.gmra.mrb[112].mxu1 %v7145_v4 }
 0x541   :  { %4494 = vmatprep.mubr.f32.mxu1 %v7147_v14 }
 0x544   :  { %4495 = vmatmul.mubr.f32.gmra.mrb[114].mxu1 %v7149_v12  ;;  %v3331_v12 = vld [vmem:[%s6741_s6 + $0x68] sm:$0xff] }
 0x545   :  { %4497 = vmatprep.mubr.f32.mxu1 %v7151_v35  ;;  %v4673_v62 = vpack.c.bf16 %v3331_v12, %v3330_v3  ;;  %v3332_v35 = vld [vmem:[%s6741_s6 + $0x70] sm:$0xff] }
 0x546   :  { %v4676_v59 = vpack.c.bf16 %v3333_v58, %v3332_v35 }
 0x547   :  { %4674 = vmatpush3.bf16.msra.mxu0 %v4673_v62 }
 0x548   :  { %4498 = vmatmul.mubr.f32.gmra.mrb[116].mxu1 %v7153_v11  ;;  %v4740_v11 = vmov 0.0   ;;  %4675 = vmatprep.subr.bf16.mxu0 %v4738_v15 }
 0x549   :  { %4500 = vmatprep.mubr.f32.mxu1 %v7155_v57  ;;  %4547 = vmatprep.mubr.msk.f32.mxu0 %vm4739_vm1, %v4740_v11 }
 0x54b   :  { %4677 = vmatpush3.bf16.msra.mxu0 %v4676_v59 }
 0x54c   :  { %4501 = vmatmul.mubr.f32.gmra.mrb[118].mxu1 %v7157_v26 }
 0x54d   :  { %4503 = vmatprep.mubr.f32.mxu1 %v7159_v38 }
 0x550   :  { %4504 = vmatmul.mubr.f32.gmra.mrb[120].mxu1 %v7161_v6 }
 0x551   :  { %4506 = vmatprep.mubr.f32.mxu1 %v7163_v55 }
 0x554   :  { %4507 = vmatmul.mubr.f32.gmra.mrb[122].mxu1 %v7165_v9 }
 0x555   :  { %4509 = vmatprep.mubr.f32.mxu1 %v7167_v16 }
 0x558   :  { %4510 = vmatmul.mubr.f32.gmra.mrb[124].mxu1 %v7169_v25 }
 0x559   :  { %4512 = vmatprep.mubr.f32.mxu1 %v7171_v8 }
 0x55c   :  { %4513 = vmatmul.mubr.f32.gmra.mrb[126].mxu1 %v7173_v60 }
 0x5b3   :  { %v4421_v51 = vpop.f32.mrb[64].mxu1 }
 0x5b4   :  { %v2737_v19 = vadd.f32 %v4421_v51, %v6607_v45  ;;  %v2731_v36 = vpop.f32.mrb[65].mxu1 }
 0x5b5   :  { %v2732_v48 = vadd.f32 %v6607_v45, %v2731_v36 }
 0x5b6   :  { %v3051_v30 = vmax.f32 %v2737_v19, 0.0 }
 0x5b7   :  { %v3050_v24 = vmax.f32 %v2732_v48, 0.0  ;;  %v4424_v13 = vpop.f32.mrb[66].mxu1 }
 0x5b8   :  { %v2747_v39 = vadd.f32 %v4424_v13, %v6607_v45  ;;  %v2741_v43 = vpop.f32.mrb[67].mxu1 }
 0x5b9   :  { %v3242_v63 = vadd.f32 %v3051_v30, %v3050_v24  ;;  %v2742_v21 = vadd.f32 %v6607_v45, %v2741_v43 }
 0x5ba   :  { %v3053_v29 = vmax.f32 %v2747_v39, 0.0 }
 0x5bb   :  { %v3052_v47 = vmax.f32 %v2742_v21, 0.0  ;;  %v4427_v17 = vpop.f32.mrb[68].mxu1 }
 0x5bc   :  { %v2757_v52 = vadd.f32 %v4427_v17, %v6607_v45  ;;  %v2751_v4 = vpop.f32.mrb[69].mxu1 }
 0x5bd   :  { %v3243_v32 = vadd.f32 %v3242_v63, %v3052_v47  ;;  %v2752_v14 = vadd.f32 %v6607_v45, %v2751_v4 }
 0x5be   :  { %v3055_v26 = vmax.f32 %v2757_v52, 0.0 }
 0x5bf   :  { %v3054_v18 = vmax.f32 %v2752_v14, 0.0  ;;  %v3244_v57 = vadd.f32 %v3243_v32, %v3053_v29  ;;  %v4430_v0 = vpop.f32.mrb[70].mxu1 }
 0x5c0   :  { %v2761_v49 = vpop.f32.mrb[71].mxu1  ;;  %v2767_v41 = vadd.f32 %v4430_v0, %v6607_v45 }
 0x5c1   :  { %v3245_v38 = vadd.f32 %v3244_v57, %v3054_v18  ;;  %v2762_v6 = vadd.f32 %v6607_v45, %v2761_v49 }
 0x5c2   :  { %v3057_v16 = vmax.f32 %v2767_v41, 0.0 }
 0x5c3   :  { %v3056_v55 = vmax.f32 %v2762_v6, 0.0  ;;  %v3246_v10 = vadd.f32 %v3245_v38, %v3055_v26  ;;  %v4433_v9 = vpop.f32.mrb[72].mxu1 }
 0x5c4   :  { %v2771_v56 = vpop.f32.mrb[73].mxu1  ;;  %v2777_v25 = vadd.f32 %v4433_v9, %v6607_v45 }
 0x5c5   :  { %v3247_v23 = vadd.f32 %v3246_v10, %v3056_v55  ;;  %v2772_v50 = vadd.f32 %v6607_v45, %v2771_v56 }
 0x5c6   :  { %v3059_v7 = vmax.f32 %v2777_v25, 0.0 }
 0x5c7   :  { %v3058_v8 = vmax.f32 %v2772_v50, 0.0  ;;  %v3248_v22 = vadd.f32 %v3247_v23, %v3057_v16  ;;  %v4436_v60 = vpop.f32.mrb[74].mxu1 }
 0x5c8   :  { %v2781_v37 = vpop.f32.mrb[75].mxu1  ;;  %v2787_v54 = vadd.f32 %v4436_v60, %v6607_v45 }
 0x5c9   :  { %v3249_v27 = vadd.f32 %v3248_v22, %v3058_v8  ;;  %v2782_v15 = vadd.f32 %v6607_v45, %v2781_v37 }
 0x5ca   :  { %v3061_v46 = vmax.f32 %v2787_v54, 0.0 }
 0x5cb   :  { %v3060_v44 = vmax.f32 %v2782_v15, 0.0  ;;  %v3250_v42 = vadd.f32 %v3249_v27, %v3059_v7  ;;  %v4439_v31 = vpop.f32.mrb[76].mxu1 }
 0x5cc   :  { %v2791_v2 = vpop.f32.mrb[77].mxu1  ;;  %v2797_v20 = vadd.f32 %v4439_v31, %v6607_v45 }
 0x5cd   :  { %v3251_v34 = vadd.f32 %v3250_v42, %v3060_v44  ;;  %v2792_v51 = vadd.f32 %v6607_v45, %v2791_v2 }
 0x5ce   :  { %v3063_v30 = vmax.f32 %v2797_v20, 0.0 }
 0x5cf   :  { %v3062_v5 = vmax.f32 %v2792_v51, 0.0  ;;  %v3252_v19 = vadd.f32 %v3251_v34, %v3061_v46  ;;  %v4442_v36 = vpop.f32.mrb[78].mxu1 }
 0x5d0   :  { %v2801_v48 = vpop.f32.mrb[79].mxu1  ;;  %v2807_v53 = vadd.f32 %v4442_v36, %v6607_v45 }
 0x5d1   :  { %v3253_v1 = vadd.f32 %v3252_v19, %v3062_v5  ;;  %v2802_v24 = vadd.f32 %v6607_v45, %v2801_v48 }
 0x5d2   :  { %v3065_v63 = vmax.f32 %v2807_v53, 0.0 }
 0x5d3   :  { %v3064_v13 = vmax.f32 %v2802_v24, 0.0  ;;  %v3254_v40 = vadd.f32 %v3253_v1, %v3063_v30  ;;  %v4445_v39 = vpop.f32.mrb[80].mxu1 }
 0x5d4   :  { %v2811_v43 = vpop.f32.mrb[81].mxu1  ;;  %v2817_v28 = vadd.f32 %v4445_v39, %v6607_v45 }
 0x5d5   :  { %v3255_v21 = vadd.f32 %v3254_v40, %v3064_v13  ;;  %v2812_v33 = vadd.f32 %v6607_v45, %v2811_v43 }
 0x5d6   :  { %v3067_v52 = vmax.f32 %v2817_v28, 0.0 }
 0x5d7   :  { %v3066_v47 = vmax.f32 %v2812_v33, 0.0  ;;  %v3256_v17 = vadd.f32 %v3255_v21, %v3065_v63  ;;  %v4448_v61 = vpop.f32.mrb[82].mxu1 }
 0x5d8   :  { %v2821_v29 = vpop.f32.mrb[83].mxu1  ;;  %v2827_v32 = vadd.f32 %v4448_v61, %v6607_v45 }
 0x5d9   :  { %v3257_v4 = vadd.f32 %v3256_v17, %v3066_v47  ;;  %v2822_v14 = vadd.f32 %v6607_v45, %v2821_v29 }
 0x5da   :  { %v3069_v58 = vmax.f32 %v2827_v32, 0.0 }
 0x5db   :  { %v3068_v3 = vmax.f32 %v2822_v14, 0.0  ;;  %v3258_v12 = vadd.f32 %v3257_v4, %v3067_v52  ;;  %v4451_v62 = vpop.f32.mrb[84].mxu1 }
 0x5dc   :  { %v2831_v35 = vpop.f32.mrb[85].mxu1  ;;  %v2837_v57 = vadd.f32 %v4451_v62, %v6607_v45 }
 0x5dd   :  { %v3259_v18 = vadd.f32 %v3258_v12, %v3068_v3  ;;  %v2832_v0 = vadd.f32 %v6607_v45, %v2831_v35 }
 0x5de   :  { %v3071_v6 = vmax.f32 %v2837_v57, 0.0 }
 0x5df   :  { %v3070_v26 = vmax.f32 %v2832_v0, 0.0  ;;  %v3260_v49 = vadd.f32 %v3259_v18, %v3069_v58  ;;  %v4454_v38 = vpop.f32.mrb[86].mxu1 }
 0x5e0   :  { %v2841_v41 = vpop.f32.mrb[87].mxu1  ;;  %v2847_v55 = vadd.f32 %v4454_v38, %v6607_v45 }
 0x5e1   :  { %v3261_v59 = vadd.f32 %v3260_v49, %v3070_v26  ;;  %v2842_v10 = vadd.f32 %v6607_v45, %v2841_v41 }
 0x5e2   :  { %v3073_v25 = vmax.f32 %v2847_v55, 0.0 }
 0x5e3   :  { %v3072_v9 = vmax.f32 %v2842_v10, 0.0  ;;  %v3262_v56 = vadd.f32 %v3261_v59, %v3071_v6  ;;  %v4457_v16 = vpop.f32.mrb[88].mxu1 }
 0x5e4   :  { %v2851_v23 = vpop.f32.mrb[89].mxu1  ;;  %v2857_v8 = vadd.f32 %v4457_v16, %v6607_v45 }
 0x5e5   :  { %v3263_v50 = vadd.f32 %v3262_v56, %v3072_v9  ;;  %v2852_v22 = vadd.f32 %v6607_v45, %v2851_v23 }
 0x5e6   :  { %v3075_v54 = vmax.f32 %v2857_v8, 0.0 }
 0x5e7   :  { %v3074_v60 = vmax.f32 %v2852_v22, 0.0  ;;  %v3264_v37 = vadd.f32 %v3263_v50, %v3073_v25  ;;  %v4460_v7 = vpop.f32.mrb[90].mxu1 }
 0x5e8   :  { %v2861_v27 = vpop.f32.mrb[91].mxu1  ;;  %v2867_v44 = vadd.f32 %v4460_v7, %v6607_v45 }
 0x5e9   :  { %v3265_v15 = vadd.f32 %v3264_v37, %v3074_v60  ;;  %v2862_v42 = vadd.f32 %v6607_v45, %v2861_v27 }
 0x5ea   :  { %v3077_v20 = vmax.f32 %v2867_v44, 0.0 }
 0x5eb   :  { %v3076_v31 = vmax.f32 %v2862_v42, 0.0  ;;  %v3266_v2 = vadd.f32 %v3265_v15, %v3075_v54  ;;  %v4463_v46 = vpop.f32.mrb[92].mxu1 }
 0x5ec   :  { %v2871_v34 = vpop.f32.mrb[93].mxu1  ;;  %v2877_v5 = vadd.f32 %v4463_v46, %v6607_v45 }
 0x5ed   :  { %v3267_v51 = vadd.f32 %v3266_v2, %v3076_v31  ;;  %v2872_v19 = vadd.f32 %v6607_v45, %v2871_v34 }
 0x5ee   :  { %v3079_v53 = vmax.f32 %v2877_v5, 0.0 }
 0x5ef   :  { %v3078_v36 = vmax.f32 %v2872_v19, 0.0  ;;  %v3268_v48 = vadd.f32 %v3267_v51, %v3077_v20  ;;  %v4466_v30 = vpop.f32.mrb[94].mxu1 }
 0x5f0   :  { %v2881_v1 = vpop.f32.mrb[95].mxu1  ;;  %v2887_v13 = vadd.f32 %v4466_v30, %v6607_v45 }
 0x5f1   :  { %v3269_v24 = vadd.f32 %v3268_v48, %v3078_v36  ;;  %v2882_v40 = vadd.f32 %v6607_v45, %v2881_v1 }
 0x5f2   :  { %v3081_v33 = vmax.f32 %v2887_v13, 0.0 }
 0x5f3   :  { %v3080_v39 = vmax.f32 %v2882_v40, 0.0  ;;  %v3270_v43 = vadd.f32 %v3269_v24, %v3079_v53  ;;  %v4469_v63 = vpop.f32.mrb[96].mxu1 }
 0x5f4   :  { %v2897_v21 = vadd.f32 %v4469_v63, %v6607_v45  ;;  %v2891_v28 = vpop.f32.mrb[97].mxu1 }
 0x5f5   :  { %v3271_v47 = vadd.f32 %v3270_v43, %v3080_v39  ;;  %v2892_v17 = vadd.f32 %v6607_v45, %v2891_v28 }
 0x5f6   :  { %v3083_v61 = vmax.f32 %v2897_v21, 0.0 }
 0x5f7   :  { %v6679_v29 = vadd.f32 %v3271_v47, %v3081_v33  ;;  %v3082_v52 = vmax.f32 %v2892_v17, 0.0  ;;  %v4472_v4 = vpop.f32.mrb[98].mxu1 }
 0x5f8   :  { %v2901_v32 = vpop.f32.mrb[99].mxu1  ;;  %v2907_v3 = vadd.f32 %v4472_v4, %v6607_v45 }
 0x5f9   :  { %v3279_v14 = vadd.f32 %v3083_v61, %v3082_v52  ;;  %v2902_v12 = vadd.f32 %v6607_v45, %v2901_v32 }
 0x5fa   :  { %v3085_v18 = vmax.f32 %v2907_v3, 0.0 }
 0x5fb   :  { %v3084_v62 = vmax.f32 %v2902_v12, 0.0  ;;  %v4475_v35 = vpop.f32.mrb[100].mxu1 }
 0x5fc   :  { %v2911_v58 = vpop.f32.mrb[101].mxu1  ;;  %v2917_v0 = vadd.f32 %v4475_v35, %v6607_v45 }
 0x5fd   :  { %v3280_v57 = vadd.f32 %v3279_v14, %v3084_v62  ;;  %v2912_v26 = vadd.f32 %v6607_v45, %v2911_v58 }
 0x5fe   :  { %v3087_v59 = vmax.f32 %v2917_v0, 0.0 }
 0x5ff   :  { %v3086_v49 = vmax.f32 %v2912_v26, 0.0  ;;  %v3281_v38 = vadd.f32 %v3280_v57, %v3085_v18  ;;  %v4478_v41 = vpop.f32.mrb[102].mxu1 }
 0x600   :  { %v2921_v6 = vpop.f32.mrb[103].mxu1  ;;  %v2927_v10 = vadd.f32 %v4478_v41, %v6607_v45 }
 0x601   :  { %v3282_v55 = vadd.f32 %v3281_v38, %v3086_v49  ;;  %v2922_v9 = vadd.f32 %v6607_v45, %v2921_v6 }
 0x602   :  { %v3089_v50 = vmax.f32 %v2927_v10, 0.0 }
 0x603   :  { %v3088_v56 = vmax.f32 %v2922_v9, 0.0  ;;  %v3283_v16 = vadd.f32 %v3282_v55, %v3087_v59  ;;  %v4481_v23 = vpop.f32.mrb[104].mxu1 }
 0x604   :  { %v2931_v25 = vpop.f32.mrb[105].mxu1  ;;  %v2937_v22 = vadd.f32 %v4481_v23, %v6607_v45 }
 0x605   :  { %v3284_v8 = vadd.f32 %v3283_v16, %v3088_v56  ;;  %v2932_v60 = vadd.f32 %v6607_v45, %v2931_v25 }
 0x606   :  { %v3091_v15 = vmax.f32 %v2937_v22, 0.0 }
 0x607   :  { %v3090_v37 = vmax.f32 %v2932_v60, 0.0  ;;  %v3285_v7 = vadd.f32 %v3284_v8, %v3089_v50  ;;  %v4484_v27 = vpop.f32.mrb[106].mxu1 }
 0x608   :  { %v2941_v54 = vpop.f32.mrb[107].mxu1  ;;  %v2947_v42 = vadd.f32 %v4484_v27, %v6607_v45 }
 0x609   :  { %v3286_v44 = vadd.f32 %v3285_v7, %v3090_v37  ;;  %v2942_v31 = vadd.f32 %v6607_v45, %v2941_v54 }
 0x60a   :  { %v3093_v51 = vmax.f32 %v2947_v42, 0.0 }
 0x60b   :  { %v3092_v2 = vmax.f32 %v2942_v31, 0.0  ;;  %v3287_v46 = vadd.f32 %v3286_v44, %v3091_v15  ;;  %v4487_v34 = vpop.f32.mrb[108].mxu1 }
 0x60c   :  { %v2951_v20 = vpop.f32.mrb[109].mxu1  ;;  %v2957_v19 = vadd.f32 %v4487_v34, %v6607_v45 }
 0x60d   :  { %v3288_v5 = vadd.f32 %v3287_v46, %v3092_v2  ;;  %v2952_v36 = vadd.f32 %v6607_v45, %v2951_v20 }
 0x60e   :  { %v3095_v24 = vmax.f32 %v2957_v19, 0.0  ;;  %v3273_v19 = vrot.slane %v6679_v29, 4 }
 0x60f   :  { %v3094_v48 = vmax.f32 %v2952_v36, 0.0  ;;  %v3289_v30 = vadd.f32 %v3288_v5, %v3093_v51  ;;  %v4490_v1 = vpop.f32.mrb[110].mxu1 }
 0x610   :  { %v2961_v53 = vpop.f32.mrb[111].mxu1  ;;  %v2967_v40 = vadd.f32 %v4490_v1, %v6607_v45 }
 0x611   :  { %v3290_v13 = vadd.f32 %v3289_v30, %v3094_v48  ;;  %v2962_v39 = vadd.f32 %v6607_v45, %v2961_v53 }
 0x612   :  { %v3097_v33 = vmax.f32 %v2967_v40, 0.0 }
 0x613   :  { %v3096_v43 = vmax.f32 %v2962_v39, 0.0  ;;  %v3291_v63 = vadd.f32 %v3290_v13, %v3095_v24  ;;  %v4493_v21 = vpop.f32.mrb[112].mxu1  ;;  %v3274_v39 = vadd.f32 %v3273_v19, %v6679_v29 }
 0x614   :  { %v2971_v28 = vpop.f32.mrb[113].mxu1  ;;  %v2977_v17 = vadd.f32 %v4493_v21, %v6607_v45 }
 0x615   :  { %v3292_v47 = vadd.f32 %v3291_v63, %v3096_v43  ;;  %v2972_v61 = vadd.f32 %v6607_v45, %v2971_v28 }
 0x616   :  { %v3099_v3 = vmax.f32 %v2977_v17, 0.0 }
 0x617   :  { %v3098_v52 = vmax.f32 %v2972_v61, 0.0  ;;  %v3293_v4 = vadd.f32 %v3292_v47, %v3097_v33  ;;  %v4496_v32 = vpop.f32.mrb[114].mxu1  ;;  %v3275_v61 = vrot.slane %v3274_v39, 2 }
 0x618   :  { %v2981_v14 = vpop.f32.mrb[115].mxu1  ;;  %v2987_v62 = vadd.f32 %v4496_v32, %v6607_v45 }
 0x619   :  { %v3294_v12 = vadd.f32 %v3293_v4, %v3098_v52  ;;  %v2982_v35 = vadd.f32 %v6607_v45, %v2981_v14 }
 0x61a   :  { %v3101_v26 = vmax.f32 %v2987_v62, 0.0 }
 0x61b   :  { %v3100_v58 = vmax.f32 %v2982_v35, 0.0  ;;  %v3295_v18 = vadd.f32 %v3294_v12, %v3099_v3  ;;  %v4499_v57 = vpop.f32.mrb[116].mxu1  ;;  %v3276_v3 = vadd.f32 %v3275_v61, %v3274_v39 }
 0x61c   :  { %v2991_v0 = vpop.f32.mrb[117].mxu1  ;;  %v2997_v38 = vadd.f32 %v4499_v57, %v6607_v45 }
 0x61d   :  { %v3296_v49 = vadd.f32 %v3295_v18, %v3100_v58  ;;  %v2992_v41 = vadd.f32 %v6607_v45, %v2991_v0  ;;  %v3277_v35 = vrot.slane %v3276_v3, 1 }
 0x61e   :  { %v3103_v9 = vmax.f32 %v2997_v38, 0.0 }
 0x61f   :  { %v3102_v6 = vmax.f32 %v2992_v41, 0.0  ;;  %v3297_v59 = vadd.f32 %v3296_v49, %v3101_v26  ;;  %v4502_v55 = vpop.f32.mrb[118].mxu1  ;;  %v3278_v29 = vadd.f32 %v3277_v35, %v3276_v3  ;;  %v3693_v41 = vld [vmem:[%s6742_s7] ss:$0 sm:$0xff] }
 0x620   :  { %v3001_v10 = vpop.f32.mrb[119].mxu1  ;;  %v3007_v16 = vadd.f32 %v4502_v55, %v6607_v45 }
 0x621   :  { %v3298_v56 = vadd.f32 %v3297_v59, %v3102_v6  ;;  %v3002_v23 = vadd.f32 %v6607_v45, %v3001_v10  ;;  %v3316_v0 = vmul.f32 0.00390625, %v3278_v29 }
 0x622   :  { %v3105_v60 = vmax.f32 %v3007_v16, 0.0 }
 0x623   :  { %v3104_v25 = vmax.f32 %v3002_v23, 0.0  ;;  %v3299_v50 = vadd.f32 %v3298_v56, %v3103_v9  ;;  %v4505_v8 = vpop.f32.mrb[120].mxu1 }
 0x624   :  { %v3011_v22 = vpop.f32.mrb[121].mxu1  ;;  %v3017_v7 = vadd.f32 %v4505_v8, %v6607_v45 }
 0x625   :  { %v3300_v37 = vadd.f32 %v3299_v50, %v3104_v25  ;;  %v3012_v27 = vadd.f32 %v6607_v45, %v3011_v22 }
 0x626   :  { %v3107_v31 = vmax.f32 %v3017_v7, 0.0 }
 0x627   :  { %v3106_v54 = vmax.f32 %v3012_v27, 0.0  ;;  %v3301_v15 = vadd.f32 %v3300_v37, %v3105_v60  ;;  %v4508_v44 = vpop.f32.mrb[122].mxu1 }
 0x628   :  { %v3021_v42 = vpop.f32.mrb[123].mxu1  ;;  %v3027_v46 = vadd.f32 %v4508_v44, %v6607_v45  ;;  %v3441_v44 = vld [vmem:[%s6743_s8] sm:$0x3] }
 0x629   :  { %v3302_v2 = vadd.f32 %v3301_v15, %v3106_v54  ;;  %v3022_v34 = vadd.f32 %v6607_v45, %v3021_v42 }
 0x62a   :  { %v3109_v48 = vmax.f32 %v3027_v46, 0.0 }
 0x62b   :  { %v3108_v20 = vmax.f32 %v3022_v34, 0.0  ;;  %v3303_v51 = vadd.f32 %v3302_v2, %v3107_v31  ;;  %v4511_v5 = vpop.f32.mrb[124].mxu1 }
 0x62c   :  { %v3031_v36 = vpop.f32.mrb[125].mxu1  ;;  %v3037_v1 = vadd.f32 %v4511_v5, %v6607_v45 }
 0x62d   :  { %v3304_v30 = vadd.f32 %v3303_v51, %v3108_v20  ;;  %v3032_v53 = vadd.f32 %v6607_v45, %v3031_v36 }
 0x62e   :  { %v3111_v63 = vmax.f32 %v3037_v1, 0.0 }
 0x62f   :  { %v3110_v24 = vmax.f32 %v3032_v53, 0.0  ;;  %v3305_v13 = vadd.f32 %v3304_v30, %v3109_v48  ;;  %v4514_v40 = vpop.f32.mrb[126].mxu1 }
 0x630   :  { %v3041_v43 = vpop.f32.mrb[127].mxu1  ;;  %v3047_v28 = vadd.f32 %v4514_v40, %v6607_v45 }
 0x631   :  { %v3306_v21 = vadd.f32 %v3305_v13, %v3110_v24  ;;  %v3042_v33 = vadd.f32 %v6607_v45, %v3041_v43  ;;  %v3416_v45 = vlaneseq }
 0x632   :  { %v3113_v52 = vmax.f32 %v3047_v28, 0.0 }
 0x633   :  { %v3112_v47 = vmax.f32 %v3042_v33, 0.0  ;;  %v3307_v17 = vadd.f32 %v3306_v21, %v3111_v63  ;;  %v3417_v38 = vand.u32 127, %v3416_v45 }
 0x635   :  { %v3308_v4 = vadd.f32 %v3307_v17, %v3112_v47  ;;  %vm3418_vm3 = vcmp.lt.s32.totalorder %v3417_v38, 16 }
 0x637   :  { %v3309_v32 = vadd.f32 %v3308_v4, %v3113_v52 }
 0x639   :  { %v3310_v14 = vrot.slane %v3309_v32, 4 }
 0x63b   :  { %v3311_v12 = vadd.f32 %v3310_v14, %v3309_v32 }
 0x63d   :  { %v3312_v62 = vrot.slane %v3311_v12, 2 }
 0x63f   :  { %v3313_v58 = vadd.f32 %v3312_v62, %v3311_v12 }
 0x641   :  { %v3314_v18 = vrot.slane %v3313_v58, 1 }
 0x643   :  { %v3315_v57 = vadd.f32 %v3314_v18, %v3313_v58 }
 0x645   :  { %v3317_v26 = vmul.f32 0.00390625, %v3315_v57 }
 0x647   :  { %v3344_v49 = vsel %vm3343_vm2, %v3317_v26, %v3316_v0 }
 0x648   :  { %4548 = vmatmul.mubr.f32.vlgmr.msra.gmra.mrb[128].mxu0 %v3344_v49 }
 0x71b   :  { %v3412_v6 = vpop.f32.mrb[128].mxu0 }
 0x71c   :  { %v3413_v59 = vadd.f32 %v3693_v41, %v3412_v6  ;;  %v4549_v55 = vpop.f32.mrb[129].mxu0 }
 0x71e   :  { %v3419_v10 = vsel %vm3418_vm3, %v3413_v59, -inf }
 0x71f   :  { %v3421_v9 = vsel %vm3420_vm4, %v3419_v10, -inf }
 0x720   :  { %3422 = vmax.xlane.f32.xlu0 %v3421_v9 }
 0x7ad   :  { %v3423_v56 = vpop.xlane.xlu0 %3422 }
 0x7ae   :  { %vm3424_vm5 = vcmp.eq.f32.partialorder %v3419_v10, %v3423_v56 }
 0x7af   :  { %v3425_v16 = vsel %vm3424_vm5, %v3417_v38, 128 }
 0x7b0   :  { %v3426_v23 = vsel %vm3420_vm4, %v3425_v16, 2147483647 }
 0x7b1   :  { %v3428_v25 = vshra.s32 %v3426_v23, 16  ;;  %v3427_v8 = vand.u32 65535, %v3426_v23 }
 0x7b3   :  { %v3430_v50 = vcvt.s32.f32 %v3428_v25  ;;  %v3429_v60 = vcvt.s32.f32 %v3427_v8 }
 0x7b5   :  { %3431 = vmin.xlane.f32.xlu0 %v3430_v50 }
 0x842   :  { %v3432_v22 = vpop.xlane.xlu0 %3431 }
 0x843   :  { %vm3433_vm6 = vcmp.eq.f32.partialorder %v3430_v50, %v3432_v22  ;;  %v3438_v7 = vcvt.f32.s32 %v3432_v22 }
 0x844   :  { %v3434_v37 = vsel %vm3433_vm6, %v3429_v60, inf }
 0x845   :  { %3435 = vmin.xlane.f32.xlu1 %v3434_v37  ;;  %v3439_v54 = vshll.u32 %v3438_v7, 16 }
 0x8d2   :  { %v3436_v27 = vpop.xlane.xlu1 %3435 }
 0x8d3   :  { %v3437_v15 = vcvt.f32.s32 %v3436_v27 }
 0x8d5   :  { %v3440_v42 = vadd.s32 %v3439_v54, %v3437_v15 }
 0x8d7   :  { %vm3442_vm8 = vcmp.eq.s32.totalorder %v3440_v42, %v3441_v44 }
 0x8d8   :  { %v3694_v31 = vsel %vm3442_vm8, 1.0, %v4740_v11 }
 0x8d9   :  { %v3446_v2 = vsel %vm3445_vm7, %v3694_v31, 0.0 }
 0x8da   :  { %3447 = vadd.xlane.f32.xlu1 %v3446_v2 }
 0x967   :  { %v3448_v46 = vpop.xlane.xlu1 %3447 }
 0x968   :  { %v3449_v34 = vrot.slane %v3448_v46, 4 }
 0x96a   :  { %v3450_v20 = vadd.f32 %v3449_v34, %v3448_v46 }
 0x96c   :  { %v3451_v51 = vrot.slane %v3450_v20, 2 }
 0x96e   :  { %v3452_v5 = vadd.f32 %v3451_v51, %v3450_v20 }
 0x970   :  { %v3453_v19 = vrot.slane %v3452_v5, 1 }
 0x972   :  { %v3454_v36 = vadd.f32 %v3453_v19, %v3452_v5 }
 0x974   :  { %4678 = vpush %v3454_v36 }
 0x9a5   :  { %s4679_s2 = spop %4678 }
 0x9a6   :  { %s3456_s16 = smul.f32 0.5, %s4679_s2 }
 0x9a8   :  { %s3458_s19 = ssub.f32 %s3456_s16, %s6744_s9 }
 0x9aa   :  { %v3459_v11 = vstv %s3458_s19 }
 0x9ab   :  { %3461 = vst.msk [vmem:[#allocation10] sm:$0x1] %vm3460_vm9, %v3459_v11 }
 0x9ac   :  { %4708 = shalt.err (!%p4705_p9)
}
 0x9ad   :  { %s4709_s23 = scalar_lea.hbm %s6745_s10, 16 }
 0x9ae   :  { %p4710_p10 = scmp.ne.s32.totalorder %s6745_s10, %s4709_s23  ;;  %p4713_p11 = scmp.lt.u32.totalorder %s4709_s23, %s6745_s10 }
 0x9b0   :  { %p4715_p12 = pnand %p4713_p11, %p4710_p10 }
 0x9b2   :  { %4718 = shalt.err (!%p4715_p12)
}
 0x9b3   :  { %3471 = dma.vmem_to_hbm [thread:$0]  %s3469_s17, 16, %s6745_s10, [#allocation8]  }
 0x9b4   :  { %4735 = dma.done.wait [#allocation8], 16  }
 0x9b5   :  { %4736 = vsyncadd [#allocation8], 4294967280 }
 0x9b6   :  { %3475 = vsyncpa [#allocation8], 1 }
 0x9b7   :  { %3476 = vsyncpa [#allocation9], 1 }
 0x9b8   :  { %3477 = vsyncmov [#allocation5] }
 0x9bb   :  { %s3478_s28 = vpop.sfrf %3477 }
 0x9bc   :  { %p3695_p13 = scmp.ne.s32.totalorder %s3478_s28, 0 }
 0x9be   :  { %3482 = shalt.err (%p3695_p13)  }
 0x9bf   :  { %3484 = vsyncmov [#allocation5 + $0x1] }
 0x9c2   :  { %s3485_s29 = vpop.sfrf %3484 }
 0x9c3   :  { %p3696_p0 = scmp.ne.s32.totalorder %s3485_s29, 0 }
 0x9c5   :  { %3489 = shalt.err (%p3696_p0)  }
 0x9c6   :  { %3491 = vsyncmov [#allocation5 + $0x2] }
 0x9c9   :  { %s3492_s5 = vpop.sfrf %3491 }
 0x9ca   :  { %p3697_p1 = scmp.ne.s32.totalorder %s3492_s5, 0 }
 0x9cc   :  { %3496 = shalt.err (%p3697_p1)  }
 0x9cd   :  { %3498 = vsyncmov [#allocation5 + $0x3] }
 0x9d0   :  { %s3499_s30 = vpop.sfrf %3498 }
 0x9d1   :  { %p3698_p2 = scmp.ne.s32.totalorder %s3499_s30, 0 }
 0x9d3   :  { %3503 = shalt.err (%p3698_p2)  }

</bundles_post_ra>
